<compile_context>
chip_gen: v7x
topology: tpu7x:2x2x1
jax: 0.10.0
libtpu: 0.0.40
codegen_flags: <defaults>
</compile_context>

<pallas_src>
import functools

import jax
import jax.numpy as jnp
from jax import lax
from jax.experimental import pallas as pl
from jax.experimental.pallas import tpu as pltpu


# ---------------------------------------------------------------------------
# Fused kernel: one grid step == TB images.
# Row convention: row = h*TB + img  (h is the spatial row of the current stage,
# dilated by the pooling strides), so adjacent h are TB rows apart and the TB
# images of a given h are a contiguous row slice.
# Lane conventions: input lane = w*3+c ; conv1 out lane = w*6+o ;
# pool1 lane = 12*w2+c ; conv2 out lane = 16*w3+o ; pool2 lane = 32*w4+o.
# ---------------------------------------------------------------------------
def _net_fused_kernel(x_ref, wb1_ref, b1_ref, wb2_ref, b2_ref,
                      wf1_ref, bf1_ref, wf2_ref, bf2_ref,
                      wf3_ref, bf3_ref, out_ref, *, tb):
    f32 = jnp.float32
    R1 = 30 * tb          # conv1 output rows (h in [0,30))
    R2 = 25 * tb          # conv2 output rows (row = 2*h3*tb + img, h3 in [0,13))

    # ---- conv1: 3 banded matmuls (one per kernel row), K = (kw, cin) in lanes
    acc1 = jnp.dot(x_ref[pl.ds(0, R1), :], wb1_ref[0], preferred_element_type=f32)
    acc1 = acc1 + jnp.dot(x_ref[pl.ds(tb, R1), :], wb1_ref[1],
                          preferred_element_type=f32)
    acc1 = acc1 + jnp.dot(x_ref[pl.ds(2 * tb, R1), :], wb1_ref[2],
                          preferred_element_type=f32)
    y1 = jnp.maximum(acc1 + b1_ref[...], 0.0)           # (30*tb, 180)

    # ---- pool1 2x2/2: rows h,h+1 are tb apart; cols w,w+1 are 6 lanes apart
    hm1 = jnp.maximum(y1[:-tb], y1[tb:])                # (29*tb, 180)
    wm1 = jnp.maximum(hm1[:, :174], hm1[:, 6:180])      # (29*tb, 174)

    # ---- conv2: 3 banded matmuls on the pooled (15x15x6) map
    acc2 = jnp.dot(wm1[0:R2], wb2_ref[0], preferred_element_type=f32)
    acc2 = acc2 + jnp.dot(wm1[2 * tb:2 * tb + R2], wb2_ref[1],
                          preferred_element_type=f32)
    acc2 = acc2 + jnp.dot(wm1[4 * tb:4 * tb + R2], wb2_ref[2],
                          preferred_element_type=f32)
    y2 = jnp.maximum(acc2 + b2_ref[...], 0.0)           # (25*tb, 208)

    # ---- pool2 2x2/2 (floor, 13->6): rows 2*tb apart; cols 16 lanes apart
    hm2 = jnp.maximum(y2[:-2 * tb], y2[2 * tb:])        # (23*tb, 208)
    wm2 = jnp.maximum(hm2[:, :192], hm2[:, 16:208])     # (23*tb, 192)

    # ---- flatten + fc1: 6 contiguous (tb, 192) row slices (one per h4)
    acc_f = jnp.dot(wm2[0:tb], wf1_ref[0], preferred_element_type=f32)
    for h4 in range(1, 6):
        acc_f = acc_f + jnp.dot(wm2[4 * h4 * tb:4 * h4 * tb + tb], wf1_ref[h4],
                                preferred_element_type=f32)
    z1 = jnp.maximum(acc_f + bf1_ref[...], 0.0)         # (tb, 120)

    # ---- fc2 + ReLU, dropout (identity in eval), fc3 (padded to 128 lanes)
    z2 = jnp.maximum(jnp.dot(z1, wf2_ref[...], preferred_element_type=f32)
                     + bf2_ref[...], 0.0)               # (tb, 84)
    # TODO(synk): training-mode Dropout(p=0.25) not implemented (eval = identity).
    z3 = jnp.dot(z2, wf3_ref[...], preferred_element_type=f32) + bf3_ref[...]

    out_ref[...] = z3.astype(out_ref.dtype)             # one (tb,128) dense store


# ---------------------------------------------------------------------------
# One-time weight repack: banded conv weights, lane-packed fc1, padded fc3.
# ---------------------------------------------------------------------------
def prepare_params(params):
    f32 = jnp.float32
    c1 = params["conv1_w"].astype(f32)                  # (6, 3, 3, 3)  O,I,KH,KW
    c2 = params["conv2_w"].astype(f32)                  # (16, 6, 3, 3)

    # conv1 banded weights: (3, 96, 180); row 3*wi+ci -> col 6*w+o when wi=w+dx.
    wb1 = jnp.stack([
        sum(jnp.kron(jnp.eye(32, 30, k=-dx, dtype=f32), c1[:, :, dy, dx].T)
            for dx in range(3))
        for dy in range(3)])
    b1 = jnp.tile(params["conv1_b"].astype(f32), 30).reshape(1, 180)

    # conv2 banded weights: (3, 174, 208); row 12*wi+ci (ci<6 real, 6..11 zero)
    # -> col 16*w3+o when wi=w3+dx.
    def k2pad(dy, dx):
        k = c2[:, :, dy, dx].T                          # (6, 16)
        return jnp.concatenate([k, jnp.zeros((6, 16), f32)], axis=0)  # (12, 16)

    wb2 = jnp.stack([
        sum(jnp.kron(jnp.eye(15, 13, k=-dx, dtype=f32), k2pad(dy, dx))
            for dx in range(3))[:174]
        for dy in range(3)])
    b2 = jnp.tile(params["conv2_b"].astype(f32), 13).reshape(1, 208)

    # fc1: (6, 192, 120); row 32*w4+o (o<16 real, 16..31 zero) of slice h4
    # matches PyTorch flatten index o*36 + h4*6 + w4.
    w = params["fc1_w"].astype(f32).reshape(120, 16, 6, 6)   # (f, o, h4, w4)
    w = jnp.transpose(w, (2, 3, 1, 0))                       # (h4, w4, o, f)
    w = jnp.pad(w, ((0, 0), (0, 0), (0, 16), (0, 0)))        # (6, 6, 32, 120)
    wf1 = w.reshape(6, 192, 120)

    wf2 = params["fc2_w"].astype(f32).T                      # (120, 84)
    wf3 = jnp.zeros((84, 128), f32).at[:, :10].set(params["fc3_w"].astype(f32).T)
    bf3 = jnp.zeros((1, 128), f32).at[0, :10].set(params["fc3_b"].astype(f32))
    return dict(
        wb1=wb1, b1=b1, wb2=wb2, b2=b2, wf1=wf1,
        bf1=params["fc1_b"].astype(f32).reshape(1, 120),
        wf2=wf2, bf2=params["fc2_b"].astype(f32).reshape(1, 84),
        wf3=wf3, bf3=bf3)


# ---------------------------------------------------------------------------
# Forward pass: one fused pallas_call, grid over groups of TB images.
# ---------------------------------------------------------------------------
def net_forward(kp, x_nchw, tb=8):
    B = x_nchw.shape[0]
    Bp = ((B + tb - 1) // tb) * tb
    if Bp != B:                                          # pad batch to a TB multiple
        x_nchw = jnp.pad(x_nchw, ((0, Bp - B), (0, 0), (0, 0), (0, 0)))
    G = Bp // tb

    # NCHW -> (B, 32, 96) with lane = w*3+c, then interleave images within each
    # TB-group so that kernel row = h*tb + img (all slices become contiguous).
    xr = jnp.transpose(x_nchw, (0, 2, 3, 1)).reshape(Bp, 32, 96)
    x_rows = jnp.transpose(xr.reshape(G, tb, 32, 96),
                           (0, 2, 1, 3)).reshape(G * 32 * tb, 96)

    kernel = functools.partial(_net_fused_kernel, tb=tb)
    out = pl.pallas_call(
        kernel,
        out_shape=jax.ShapeDtypeStruct((Bp, 128), jnp.float32),
        grid=(G,),
        in_specs=[
            pl.BlockSpec((32 * tb, 96), lambda i: (i, 0)),      # input rows
            pl.BlockSpec((3, 96, 180), lambda i: (0, 0, 0)),    # conv1 banded W
            pl.BlockSpec((1, 180), lambda i: (0, 0)),
            pl.BlockSpec((3, 174, 208), lambda i: (0, 0, 0)),   # conv2 banded W
            pl.BlockSpec((1, 208), lambda i: (0, 0)),
            pl.BlockSpec((6, 192, 120), lambda i: (0, 0, 0)),   # fc1 (lane-packed)
            pl.BlockSpec((1, 120), lambda i: (0, 0)),
            pl.BlockSpec((120, 84), lambda i: (0, 0)),          # fc2
            pl.BlockSpec((1, 84), lambda i: (0, 0)),
            pl.BlockSpec((84, 128), lambda i: (0, 0)),          # fc3 (padded)
            pl.BlockSpec((1, 128), lambda i: (0, 0)),
        ],
        out_specs=pl.BlockSpec((tb, 128), lambda i: (i, 0)),
        compiler_params=pltpu.CompilerParams(
            dimension_semantics=("parallel",),      # both v7x TCs get a grid step
            vmem_limit_bytes=32 * 1024 * 1024),
    )(x_rows, kp["wb1"], kp["b1"], kp["wb2"], kp["b2"],
      kp["wf1"], kp["bf1"], kp["wf2"], kp["bf2"], kp["wf3"], kp["bf3"])

    return out[:B, :10]                                  # (B, 10)


# ---------------------------------------------------------------------------
# Deterministic parameter init (PyTorch-default-like uniform bounds).
# ---------------------------------------------------------------------------
def init_params(key):
    ks = jax.random.split(key, 10)

    def u(k, shape, fan_in):
        bound = 1.0 / jnp.sqrt(jnp.float32(fan_in))
        return jax.random.uniform(k, shape, jnp.float32, -bound, bound)

    return {
        "conv1_w": u(ks[0], (6, 3, 3, 3), 3 * 9),
        "conv1_b": u(ks[1], (6,), 3 * 9),
        "conv2_w": u(ks[2], (16, 6, 3, 3), 6 * 9),
        "conv2_b": u(ks[3], (16,), 6 * 9),
        "fc1_w": u(ks[4], (120, 16 * 6 * 6), 16 * 6 * 6),
        "fc1_b": u(ks[5], (120,), 16 * 6 * 6),
        "fc2_w": u(ks[6], (84, 120), 120),
        "fc2_b": u(ks[7], (84,), 120),
        "fc3_w": u(ks[8], (10, 84), 84),
        "fc3_b": u(ks[9], (10,), 84),
    }


# ---------------------------------------------------------------------------
# Pure-JAX reference (mirrors the PyTorch module in eval mode) for self-check.
# ---------------------------------------------------------------------------
def _maxpool2x2_nchw(y):
    B, C, H, W = y.shape
    Ho, Wo = H // 2, W // 2
    return y[:, :, :Ho * 2, :Wo * 2].reshape(B, C, Ho, 2, Wo, 2).max(axis=(3, 5))


def reference_forward(params, x):
    dn = ("NCHW", "OIHW", "NCHW")
    y = lax.conv_general_dilated(x, params["conv1_w"], (1, 1), "VALID",
                                 dimension_numbers=dn,
                                 precision=lax.Precision.HIGHEST)
    y = jnp.maximum(y + params["conv1_b"][None, :, None, None], 0.0)
    y = _maxpool2x2_nchw(y)
    y = lax.conv_general_dilated(y, params["conv2_w"], (1, 1), "VALID",
                                 dimension_numbers=dn,
                                 precision=lax.Precision.HIGHEST)
    y = jnp.maximum(y + params["conv2_b"][None, :, None, None], 0.0)
    y = _maxpool2x2_nchw(y)
    y = y.reshape(y.shape[0], -1)                        # PyTorch view(-1, 576)
    y = jnp.maximum(y @ params["fc1_w"].T + params["fc1_b"], 0.0)
    y = jnp.maximum(y @ params["fc2_w"].T + params["fc2_b"], 0.0)
    return y @ params["fc3_w"].T + params["fc3_b"]       # dropout = identity (eval)


if __name__ == "__main__":
    key = jax.random.PRNGKey(0)
    k_param, k_input = jax.random.split(key)
    params = init_params(k_param)
    # Input spatial size is fixed by fc1 (16*6*6): 32x32 RGB.  Batch 16 = two
    # grid steps of TB=8 images each.
    x = jax.random.normal(k_input, (16, 3, 32, 32), dtype=jnp.float32)

    kp = prepare_params(params)                          # one-time weight repack
    out = jax.block_until_ready(jax.jit(net_forward)(kp, x))

    assert out.shape == (16, 10), out.shape
    assert out.dtype == jnp.float32, out.dtype

    ref = jax.block_until_ready(jax.jit(reference_forward)(params, x))
    assert bool(jnp.allclose(out, ref, rtol=5e-2, atol=5e-2)), (
        "Pallas fused kernel disagrees with reference forward pass")

    print("KERNEL_OK")
</pallas_src>

<mosaic_0001>
module attributes {stable_mosaic.version = 11 : i64} {
  func.func @_net_fused_kernel(%arg0: i32, %arg1: memref<256x96xf32, #tpu.memory_space<vmem>>, %arg2: memref<3x96x180xf32, #tpu.memory_space<vmem>>, %arg3: memref<1x180xf32, #tpu.memory_space<vmem>>, %arg4: memref<3x174x208xf32, #tpu.memory_space<vmem>>, %arg5: memref<1x208xf32, #tpu.memory_space<vmem>>, %arg6: memref<6x192x120xf32, #tpu.memory_space<vmem>>, %arg7: memref<1x120xf32, #tpu.memory_space<vmem>>, %arg8: memref<120x84xf32, #tpu.memory_space<vmem>>, %arg9: memref<1x84xf32, #tpu.memory_space<vmem>>, %arg10: memref<84x128xf32, #tpu.memory_space<vmem>>, %arg11: memref<1x128xf32, #tpu.memory_space<vmem>>, %arg12: memref<8x128xf32, #tpu.memory_space<vmem>>) attributes {dimension_semantics = [#tpu.dimension_semantics<parallel>], iteration_bounds = array<i64: 2>, scalar_prefetch = 0 : i64, scratch_operands = 0 : i64, tpu.core_type = #tpu.core_type<tc>, window_params = [{transform_indices = @transform_0, window_bounds = array<i64: 256, 96>}, {pipeline_mode = #tpu.pipeline_mode<synchronous>, transform_indices = @transform_1, window_bounds = array<i64: 3, 96, 180>}, {pipeline_mode = #tpu.pipeline_mode<synchronous>, transform_indices = @transform_2, window_bounds = array<i64: 1, 180>}, {pipeline_mode = #tpu.pipeline_mode<synchronous>, transform_indices = @transform_3, window_bounds = array<i64: 3, 174, 208>}, {pipeline_mode = #tpu.pipeline_mode<synchronous>, transform_indices = @transform_4, window_bounds = array<i64: 1, 208>}, {pipeline_mode = #tpu.pipeline_mode<synchronous>, transform_indices = @transform_5, window_bounds = array<i64: 6, 192, 120>}, {pipeline_mode = #tpu.pipeline_mode<synchronous>, transform_indices = @transform_6, window_bounds = array<i64: 1, 120>}, {pipeline_mode = #tpu.pipeline_mode<synchronous>, transform_indices = @transform_7, window_bounds = array<i64: 120, 84>}, {pipeline_mode = #tpu.pipeline_mode<synchronous>, transform_indices = @transform_8, window_bounds = array<i64: 1, 84>}, {pipeline_mode = #tpu.pipeline_mode<synchronous>, transform_indices = @transform_9, window_bounds = array<i64: 84, 128>}, {pipeline_mode = #tpu.pipeline_mode<synchronous>, transform_indices = @transform_10, window_bounds = array<i64: 1, 128>}, {transform_indices = @transform_11, window_bounds = array<i64: 8, 128>}]} {
    %c0 = arith.constant 0 : index
    %c0_0 = arith.constant 0 : index
    %0 = vector.load %arg1[%c0, %c0_0] : memref<256x96xf32, #tpu.memory_space<vmem>>, vector<240x96xf32>
    %c0_1 = arith.constant 0 : index
    %c0_2 = arith.constant 0 : index
    %c0_3 = arith.constant 0 : index
    %1 = vector.load %arg2[%c0_1, %c0_2, %c0_3] : memref<3x96x180xf32, #tpu.memory_space<vmem>>, vector<1x96x180xf32>
    %2 = vector.shape_cast %1 : vector<1x96x180xf32> to vector<96x180xf32>
    %cst = arith.constant dense<0.000000e+00> : vector<240x180xf32>
    %3 = tpu.matmul %0, %2, %cst {dimension_numbers = #tpu.dot_dimension_numbers<[1], [0], [0], [1], [0, 0, 1, 1], [], []>} : vector<240x96xf32>, vector<96x180xf32>, vector<240x180xf32> -> vector<240x180xf32>
    %c8 = arith.constant 8 : index
    %c0_4 = arith.constant 0 : index
    %4 = vector.load %arg1[%c8, %c0_4] : memref<256x96xf32, #tpu.memory_space<vmem>>, vector<240x96xf32>
    %c1 = arith.constant 1 : index
    %c0_5 = arith.constant 0 : index
    %c0_6 = arith.constant 0 : index
    %5 = vector.load %arg2[%c1, %c0_5, %c0_6] : memref<3x96x180xf32, #tpu.memory_space<vmem>>, vector<1x96x180xf32>
    %6 = vector.shape_cast %5 : vector<1x96x180xf32> to vector<96x180xf32>
    %cst_7 = arith.constant dense<0.000000e+00> : vector<240x180xf32>
    %7 = tpu.matmul %4, %6, %cst_7 {dimension_numbers = #tpu.dot_dimension_numbers<[1], [0], [0], [1], [0, 0, 1, 1], [], []>} : vector<240x96xf32>, vector<96x180xf32>, vector<240x180xf32> -> vector<240x180xf32>
    %8 = arith.addf %3, %7 : vector<240x180xf32>
    %c16 = arith.constant 16 : index
    %c0_8 = arith.constant 0 : index
    %9 = vector.load %arg1[%c16, %c0_8] : memref<256x96xf32, #tpu.memory_space<vmem>>, vector<240x96xf32>
    %c2 = arith.constant 2 : index
    %c0_9 = arith.constant 0 : index
    %c0_10 = arith.constant 0 : index
    %10 = vector.load %arg2[%c2, %c0_9, %c0_10] : memref<3x96x180xf32, #tpu.memory_space<vmem>>, vector<1x96x180xf32>
    %11 = vector.shape_cast %10 : vector<1x96x180xf32> to vector<96x180xf32>
    %cst_11 = arith.constant dense<0.000000e+00> : vector<240x180xf32>
    %12 = tpu.matmul %9, %11, %cst_11 {dimension_numbers = #tpu.dot_dimension_numbers<[1], [0], [0], [1], [0, 0, 1, 1], [], []>} : vector<240x96xf32>, vector<96x180xf32>, vector<240x180xf32> -> vector<240x180xf32>
    %13 = arith.addf %8, %12 : vector<240x180xf32>
    %c0_12 = arith.constant 0 : index
    %c0_13 = arith.constant 0 : index
    %14 = vector.load %arg3[%c0_12, %c0_13] : memref<1x180xf32, #tpu.memory_space<vmem>>, vector<1x180xf32>
    %15 = vector.broadcast %14 : vector<1x180xf32> to vector<240x180xf32>
    %16 = arith.addf %13, %15 : vector<240x180xf32>
    %cst_14 = arith.constant 0.000000e+00 : f32
    %17 = vector.broadcast %cst_14 : f32 to vector<240x180xf32>
    %18 = arith.maximumf %16, %17 : vector<240x180xf32>
    %19 = vector.extract_strided_slice %18 {offsets = [0, 0], sizes = [232, 180], strides = [1, 1]} : vector<240x180xf32> to vector<232x180xf32>
    %20 = vector.extract_strided_slice %18 {offsets = [8, 0], sizes = [232, 180], strides = [1, 1]} : vector<240x180xf32> to vector<232x180xf32>
    %21 = arith.maximumf %19, %20 : vector<232x180xf32>
    %22 = vector.extract_strided_slice %21 {offsets = [0, 0], sizes = [232, 174], strides = [1, 1]} : vector<232x180xf32> to vector<232x174xf32>
    %23 = vector.extract_strided_slice %21 {offsets = [0, 6], sizes = [232, 174], strides = [1, 1]} : vector<232x180xf32> to vector<232x174xf32>
    %24 = arith.maximumf %22, %23 : vector<232x174xf32>
    %25 = vector.extract_strided_slice %24 {offsets = [0, 0], sizes = [200, 174], strides = [1, 1]} : vector<232x174xf32> to vector<200x174xf32>
    %c0_15 = arith.constant 0 : index
    %c0_16 = arith.constant 0 : index
    %c0_17 = arith.constant 0 : index
    %26 = vector.load %arg4[%c0_15, %c0_16, %c0_17] : memref<3x174x208xf32, #tpu.memory_space<vmem>>, vector<1x174x208xf32>
    %27 = vector.shape_cast %26 : vector<1x174x208xf32> to vector<174x208xf32>
    %cst_18 = arith.constant dense<0.000000e+00> : vector<200x208xf32>
    %28 = tpu.matmul %25, %27, %cst_18 {dimension_numbers = #tpu.dot_dimension_numbers<[1], [0], [0], [1], [0, 0, 1, 1], [], []>} : vector<200x174xf32>, vector<174x208xf32>, vector<200x208xf32> -> vector<200x208xf32>
    %29 = vector.extract_strided_slice %24 {offsets = [16, 0], sizes = [200, 174], strides = [1, 1]} : vector<232x174xf32> to vector<200x174xf32>
    %c1_19 = arith.constant 1 : index
    %c0_20 = arith.constant 0 : index
    %c0_21 = arith.constant 0 : index
    %30 = vector.load %arg4[%c1_19, %c0_20, %c0_21] : memref<3x174x208xf32, #tpu.memory_space<vmem>>, vector<1x174x208xf32>
    %31 = vector.shape_cast %30 : vector<1x174x208xf32> to vector<174x208xf32>
    %cst_22 = arith.constant dense<0.000000e+00> : vector<200x208xf32>
    %32 = tpu.matmul %29, %31, %cst_22 {dimension_numbers = #tpu.dot_dimension_numbers<[1], [0], [0], [1], [0, 0, 1, 1], [], []>} : vector<200x174xf32>, vector<174x208xf32>, vector<200x208xf32> -> vector<200x208xf32>
    %33 = arith.addf %28, %32 : vector<200x208xf32>
    %34 = vector.extract_strided_slice %24 {offsets = [32, 0], sizes = [200, 174], strides = [1, 1]} : vector<232x174xf32> to vector<200x174xf32>
    %c2_23 = arith.constant 2 : index
    %c0_24 = arith.constant 0 : index
    %c0_25 = arith.constant 0 : index
    %35 = vector.load %arg4[%c2_23, %c0_24, %c0_25] : memref<3x174x208xf32, #tpu.memory_space<vmem>>, vector<1x174x208xf32>
    %36 = vector.shape_cast %35 : vector<1x174x208xf32> to vector<174x208xf32>
    %cst_26 = arith.constant dense<0.000000e+00> : vector<200x208xf32>
    %37 = tpu.matmul %34, %36, %cst_26 {dimension_numbers = #tpu.dot_dimension_numbers<[1], [0], [0], [1], [0, 0, 1, 1], [], []>} : vector<200x174xf32>, vector<174x208xf32>, vector<200x208xf32> -> vector<200x208xf32>
    %38 = arith.addf %33, %37 : vector<200x208xf32>
    %c0_27 = arith.constant 0 : index
    %c0_28 = arith.constant 0 : index
    %39 = vector.load %arg5[%c0_27, %c0_28] : memref<1x208xf32, #tpu.memory_space<vmem>>, vector<1x208xf32>
    %40 = vector.broadcast %39 : vector<1x208xf32> to vector<200x208xf32>
    %41 = arith.addf %38, %40 : vector<200x208xf32>
    %cst_29 = arith.constant 0.000000e+00 : f32
    %42 = vector.broadcast %cst_29 : f32 to vector<200x208xf32>
    %43 = arith.maximumf %41, %42 : vector<200x208xf32>
    %44 = vector.extract_strided_slice %43 {offsets = [0, 0], sizes = [184, 208], strides = [1, 1]} : vector<200x208xf32> to vector<184x208xf32>
    %45 = vector.extract_strided_slice %43 {offsets = [16, 0], sizes = [184, 208], strides = [1, 1]} : vector<200x208xf32> to vector<184x208xf32>
    %46 = arith.maximumf %44, %45 : vector<184x208xf32>
    %47 = vector.extract_strided_slice %46 {offsets = [0, 0], sizes = [184, 192], strides = [1, 1]} : vector<184x208xf32> to vector<184x192xf32>
    %48 = vector.extract_strided_slice %46 {offsets = [0, 16], sizes = [184, 192], strides = [1, 1]} : vector<184x208xf32> to vector<184x192xf32>
    %49 = arith.maximumf %47, %48 : vector<184x192xf32>
    %50 = vector.extract_strided_slice %49 {offsets = [0, 0], sizes = [8, 192], strides = [1, 1]} : vector<184x192xf32> to vector<8x192xf32>
    %c0_30 = arith.constant 0 : index
    %c0_31 = arith.constant 0 : index
    %c0_32 = arith.constant 0 : index
    %51 = vector.load %arg6[%c0_30, %c0_31, %c0_32] : memref<6x192x120xf32, #tpu.memory_space<vmem>>, vector<1x192x120xf32>
    %52 = vector.shape_cast %51 : vector<1x192x120xf32> to vector<192x120xf32>
    %cst_33 = arith.constant dense<0.000000e+00> : vector<8x120xf32>
    %53 = tpu.matmul %50, %52, %cst_33 {dimension_numbers = #tpu.dot_dimension_numbers<[1], [0], [0], [1], [0, 0, 1, 1], [], []>} : vector<8x192xf32>, vector<192x120xf32>, vector<8x120xf32> -> vector<8x120xf32>
    %54 = vector.extract_strided_slice %49 {offsets = [32, 0], sizes = [8, 192], strides = [1, 1]} : vector<184x192xf32> to vector<8x192xf32>
    %c1_34 = arith.constant 1 : index
    %c0_35 = arith.constant 0 : index
    %c0_36 = arith.constant 0 : index
    %55 = vector.load %arg6[%c1_34, %c0_35, %c0_36] : memref<6x192x120xf32, #tpu.memory_space<vmem>>, vector<1x192x120xf32>
    %56 = vector.shape_cast %55 : vector<1x192x120xf32> to vector<192x120xf32>
    %cst_37 = arith.constant dense<0.000000e+00> : vector<8x120xf32>
    %57 = tpu.matmul %54, %56, %cst_37 {dimension_numbers = #tpu.dot_dimension_numbers<[1], [0], [0], [1], [0, 0, 1, 1], [], []>} : vector<8x192xf32>, vector<192x120xf32>, vector<8x120xf32> -> vector<8x120xf32>
    %58 = arith.addf %53, %57 : vector<8x120xf32>
    %59 = vector.extract_strided_slice %49 {offsets = [64, 0], sizes = [8, 192], strides = [1, 1]} : vector<184x192xf32> to vector<8x192xf32>
    %c2_38 = arith.constant 2 : index
    %c0_39 = arith.constant 0 : index
    %c0_40 = arith.constant 0 : index
    %60 = vector.load %arg6[%c2_38, %c0_39, %c0_40] : memref<6x192x120xf32, #tpu.memory_space<vmem>>, vector<1x192x120xf32>
    %61 = vector.shape_cast %60 : vector<1x192x120xf32> to vector<192x120xf32>
    %cst_41 = arith.constant dense<0.000000e+00> : vector<8x120xf32>
    %62 = tpu.matmul %59, %61, %cst_41 {dimension_numbers = #tpu.dot_dimension_numbers<[1], [0], [0], [1], [0, 0, 1, 1], [], []>} : vector<8x192xf32>, vector<192x120xf32>, vector<8x120xf32> -> vector<8x120xf32>
    %63 = arith.addf %58, %62 : vector<8x120xf32>
    %64 = vector.extract_strided_slice %49 {offsets = [96, 0], sizes = [8, 192], strides = [1, 1]} : vector<184x192xf32> to vector<8x192xf32>
    %c3 = arith.constant 3 : index
    %c0_42 = arith.constant 0 : index
    %c0_43 = arith.constant 0 : index
    %65 = vector.load %arg6[%c3, %c0_42, %c0_43] : memref<6x192x120xf32, #tpu.memory_space<vmem>>, vector<1x192x120xf32>
    %66 = vector.shape_cast %65 : vector<1x192x120xf32> to vector<192x120xf32>
    %cst_44 = arith.constant dense<0.000000e+00> : vector<8x120xf32>
    %67 = tpu.matmul %64, %66, %cst_44 {dimension_numbers = #tpu.dot_dimension_numbers<[1], [0], [0], [1], [0, 0, 1, 1], [], []>} : vector<8x192xf32>, vector<192x120xf32>, vector<8x120xf32> -> vector<8x120xf32>
    %68 = arith.addf %63, %67 : vector<8x120xf32>
    %69 = vector.extract_strided_slice %49 {offsets = [128, 0], sizes = [8, 192], strides = [1, 1]} : vector<184x192xf32> to vector<8x192xf32>
    %c4 = arith.constant 4 : index
    %c0_45 = arith.constant 0 : index
    %c0_46 = arith.constant 0 : index
    %70 = vector.load %arg6[%c4, %c0_45, %c0_46] : memref<6x192x120xf32, #tpu.memory_space<vmem>>, vector<1x192x120xf32>
    %71 = vector.shape_cast %70 : vector<1x192x120xf32> to vector<192x120xf32>
    %cst_47 = arith.constant dense<0.000000e+00> : vector<8x120xf32>
    %72 = tpu.matmul %69, %71, %cst_47 {dimension_numbers = #tpu.dot_dimension_numbers<[1], [0], [0], [1], [0, 0, 1, 1], [], []>} : vector<8x192xf32>, vector<192x120xf32>, vector<8x120xf32> -> vector<8x120xf32>
    %73 = arith.addf %68, %72 : vector<8x120xf32>
    %74 = vector.extract_strided_slice %49 {offsets = [160, 0], sizes = [8, 192], strides = [1, 1]} : vector<184x192xf32> to vector<8x192xf32>
    %c5 = arith.constant 5 : index
    %c0_48 = arith.constant 0 : index
    %c0_49 = arith.constant 0 : index
    %75 = vector.load %arg6[%c5, %c0_48, %c0_49] : memref<6x192x120xf32, #tpu.memory_space<vmem>>, vector<1x192x120xf32>
    %76 = vector.shape_cast %75 : vector<1x192x120xf32> to vector<192x120xf32>
    %cst_50 = arith.constant dense<0.000000e+00> : vector<8x120xf32>
    %77 = tpu.matmul %74, %76, %cst_50 {dimension_numbers = #tpu.dot_dimension_numbers<[1], [0], [0], [1], [0, 0, 1, 1], [], []>} : vector<8x192xf32>, vector<192x120xf32>, vector<8x120xf32> -> vector<8x120xf32>
    %78 = arith.addf %73, %77 : vector<8x120xf32>
    %c0_51 = arith.constant 0 : index
    %c0_52 = arith.constant 0 : index
    %79 = vector.load %arg7[%c0_51, %c0_52] : memref<1x120xf32, #tpu.memory_space<vmem>>, vector<1x120xf32>
    %80 = vector.broadcast %79 : vector<1x120xf32> to vector<8x120xf32>
    %81 = arith.addf %78, %80 : vector<8x120xf32>
    %cst_53 = arith.constant 0.000000e+00 : f32
    %82 = vector.broadcast %cst_53 : f32 to vector<8x120xf32>
    %83 = arith.maximumf %81, %82 : vector<8x120xf32>
    %c0_54 = arith.constant 0 : index
    %c0_55 = arith.constant 0 : index
    %84 = vector.load %arg8[%c0_54, %c0_55] : memref<120x84xf32, #tpu.memory_space<vmem>>, vector<120x84xf32>
    %cst_56 = arith.constant dense<0.000000e+00> : vector<8x84xf32>
    %85 = tpu.matmul %83, %84, %cst_56 {dimension_numbers = #tpu.dot_dimension_numbers<[1], [0], [0], [1], [0, 0, 1, 1], [], []>} : vector<8x120xf32>, vector<120x84xf32>, vector<8x84xf32> -> vector<8x84xf32>
    %c0_57 = arith.constant 0 : index
    %c0_58 = arith.constant 0 : index
    %86 = vector.load %arg9[%c0_57, %c0_58] : memref<1x84xf32, #tpu.memory_space<vmem>>, vector<1x84xf32>
    %87 = vector.broadcast %86 : vector<1x84xf32> to vector<8x84xf32>
    %88 = arith.addf %85, %87 : vector<8x84xf32>
    %cst_59 = arith.constant 0.000000e+00 : f32
    %89 = vector.broadcast %cst_59 : f32 to vector<8x84xf32>
    %90 = arith.maximumf %88, %89 : vector<8x84xf32>
    %c0_60 = arith.constant 0 : index
    %c0_61 = arith.constant 0 : index
    %91 = vector.load %arg10[%c0_60, %c0_61] : memref<84x128xf32, #tpu.memory_space<vmem>>, vector<84x128xf32>
    %cst_62 = arith.constant dense<0.000000e+00> : vector<8x128xf32>
    %92 = tpu.matmul %90, %91, %cst_62 {dimension_numbers = #tpu.dot_dimension_numbers<[1], [0], [0], [1], [0, 0, 1, 1], [], []>} : vector<8x84xf32>, vector<84x128xf32>, vector<8x128xf32> -> vector<8x128xf32>
    %c0_63 = arith.constant 0 : index
    %c0_64 = arith.constant 0 : index
    %93 = vector.load %arg11[%c0_63, %c0_64] : memref<1x128xf32, #tpu.memory_space<vmem>>, vector<1x128xf32>
    %94 = vector.broadcast %93 : vector<1x128xf32> to vector<8x128xf32>
    %95 = arith.addf %92, %94 : vector<8x128xf32>
    %c0_65 = arith.constant 0 : index
    %c0_66 = arith.constant 0 : index
    %96 = vector.load %arg12[%c0_65, %c0_66] : memref<8x128xf32, #tpu.memory_space<vmem>>, vector<8x128xf32>
    tpu.vector_store %arg12[%c0_65, %c0_66], %95 {strides = array<i32>} : memref<8x128xf32, #tpu.memory_space<vmem>>, vector<8x128xf32>,
    return
  }
  func.func @transform_0(%arg0: i32) -> (i32, i32) {
    %c0_i32 = arith.constant 0 : i32
    %c0_i32_0 = arith.constant 0 : i32
    return %arg0, %c0_i32 : i32, i32
  }
  func.func @transform_1(%arg0: i32) -> (i32, i32, i32) {
    %c0_i32 = arith.constant 0 : i32
    %c0_i32_0 = arith.constant 0 : i32
    %c0_i32_1 = arith.constant 0 : i32
    %c0_i32_2 = arith.constant 0 : i32
    return %c0_i32, %c0_i32_0, %c0_i32_1 : i32, i32, i32
  }
  func.func @transform_2(%arg0: i32) -> (i32, i32) {
    %c0_i32 = arith.constant 0 : i32
    %c0_i32_0 = arith.constant 0 : i32
    %c0_i32_1 = arith.constant 0 : i32
    return %c0_i32, %c0_i32_0 : i32, i32
  }
  func.func @transform_3(%arg0: i32) -> (i32, i32, i32) {
    %c0_i32 = arith.constant 0 : i32
    %c0_i32_0 = arith.constant 0 : i32
    %c0_i32_1 = arith.constant 0 : i32
    %c0_i32_2 = arith.constant 0 : i32
    return %c0_i32, %c0_i32_0, %c0_i32_1 : i32, i32, i32
  }
  func.func @transform_4(%arg0: i32) -> (i32, i32) {
    %c0_i32 = arith.constant 0 : i32
    %c0_i32_0 = arith.constant 0 : i32
    %c0_i32_1 = arith.constant 0 : i32
    return %c0_i32, %c0_i32_0 : i32, i32
  }
  func.func @transform_5(%arg0: i32) -> (i32, i32, i32) {
    %c0_i32 = arith.constant 0 : i32
    %c0_i32_0 = arith.constant 0 : i32
    %c0_i32_1 = arith.constant 0 : i32
    %c0_i32_2 = arith.constant 0 : i32
    return %c0_i32, %c0_i32_0, %c0_i32_1 : i32, i32, i32
  }
  func.func @transform_6(%arg0: i32) -> (i32, i32) {
    %c0_i32 = arith.constant 0 : i32
    %c0_i32_0 = arith.constant 0 : i32
    %c0_i32_1 = arith.constant 0 : i32
    return %c0_i32, %c0_i32_0 : i32, i32
  }
  func.func @transform_7(%arg0: i32) -> (i32, i32) {
    %c0_i32 = arith.constant 0 : i32
    %c0_i32_0 = arith.constant 0 : i32
    %c0_i32_1 = arith.constant 0 : i32
    return %c0_i32, %c0_i32_0 : i32, i32
  }
  func.func @transform_8(%arg0: i32) -> (i32, i32) {
    %c0_i32 = arith.constant 0 : i32
    %c0_i32_0 = arith.constant 0 : i32
    %c0_i32_1 = arith.constant 0 : i32
    return %c0_i32, %c0_i32_0 : i32, i32
  }
  func.func @transform_9(%arg0: i32) -> (i32, i32) {
    %c0_i32 = arith.constant 0 : i32
    %c0_i32_0 = arith.constant 0 : i32
    %c0_i32_1 = arith.constant 0 : i32
    return %c0_i32, %c0_i32_0 : i32, i32
  }
  func.func @transform_10(%arg0: i32) -> (i32, i32) {
    %c0_i32 = arith.constant 0 : i32
    %c0_i32_0 = arith.constant 0 : i32
    %c0_i32_1 = arith.constant 0 : i32
    return %c0_i32, %c0_i32_0 : i32, i32
  }
  func.func @transform_11(%arg0: i32) -> (i32, i32) {
    %c0_i32 = arith.constant 0 : i32
    %c0_i32_0 = arith.constant 0 : i32
    return %arg0, %c0_i32 : i32, i32
  }
}

</mosaic_0001>

<bundles_post_ra>
// kernel: net_forward.1
= control target key start
LH: loop header
LB: loop body
LE: loop exit
PB: predicated region body
PF: predicated region fallthrough
CT: control target
= control target key end

     0   :  { %16 = vsyncpa [#allocation3], 0  ;;  %s7740_s0 = inlined_call_operand.vmem [shape: f32[512,96], index: 0, kind: input, shape index: {}]   ;;  %s7741_s1 = inlined_call_operand.vmem [shape: f32[3,96,180], index: 1, kind: input, shape index: {}]   ;;  %s7742_s2 = inlined_call_operand.vmem [shape: f32[1,180], index: 2, kind: input, shape index: {}]   ;;  %s7743_s3 = inlined_call_operand.vmem [shape: f32[3,174,208], index: 3, kind: input, shape index: {}]   ;;  %s7744_s4 = inlined_call_operand.vmem [shape: f32[1,208], index: 4, kind: input, shape index: {}]   ;;  %s7745_s5 = inlined_call_operand.vmem [shape: f32[6,192,120], index: 5, kind: input, shape index: {}]   ;;  %s7746_s6 = inlined_call_operand.vmem [shape: f32[1,120], index: 6, kind: input, shape index: {}]   ;;  %s7747_s7 = inlined_call_operand.vmem [shape: f32[120,84], index: 7, kind: input, shape index: {}]   ;;  %s7748_s8 = inlined_call_operand.vmem [shape: f32[1,84], index: 8, kind: input, shape index: {}]   ;;  %s7749_s9 = inlined_call_operand.vmem [shape: f32[84,128], index: 9, kind: input, shape index: {}]   ;;  %s7750_s10 = inlined_call_operand.vmem [shape: f32[1,128], index: 10, kind: input, shape index: {}]   ;;  %s7751_s11 = inlined_call_operand.hbm [shape: f32[16,128], index: 11, kind: output, shape index: {}]  }
   0x1   :  { %18 = vsyncpa [#allocation3 + $0x1], 0  ;;  %s5212_s17 = smov 0   ;;  %s5214_s18 = smov 0  }
   0x2   :  { %s5216_s19 = smov 0   ;;  %s5218_s20 = smov 0  }
   0x3 LB: > { %7778 = sst [smem:[#allocation5_spill]] %s5139_s19  ;;  %s5233_s21 = sadd.s32 4294967295, %s5143_s20   ;;  %s5143_s20 = sphi %s5218_s20, %s7827_s20   ;;  %s5139_s19 = sphi %s5216_s19, %s7824_s19   ;;  %s5135_s18 = sphi %s5214_s18, %s7826_s18   ;;  %s5131_s17 = sphi %s5212_s17, %s7825_s17  }
   0x4   : > { %s3850_s22 = sadd.s32 4294967294, %s5143_s20   ;;  %s5237_s23 = sadd.s32 1, %s5143_s20  }
   0x5   : > { %s267_s24 = sadd.s32 1, %s5139_s19  ;;  %s264_s25 = ssub.s32 %s5143_s20, %s5237_s23 }
   0x6   : > { %p277_p0 = scmp.ne.s32.totalorder %s5139_s19, %s5135_s18  ;;  %p265_p1 = scmp.eq.s32.totalorder %s264_s25, 0 }
   0x7   : > { %p278_p2 = scmp.eq.s32.totalorder %s5233_s21, 1  ;;  %p283_p3 = scmp.ne.s32.totalorder %s5135_s18, %s5131_s17 }
   0x8   : > { %p284_p4 = scmp.eq.s32.totalorder %s3850_s22, 1  ;;  %p3853_p7 = scmp.ge.s32.totalorder %s5143_s20, 1 }
   0x9   : > { %s5248_s26 = scalar_select %p265_p1, %s5139_s19, %s267_s24  }
   0xa   : > { %p5250_p5 = por %p278_p2, %p277_p0  ;;  %p5254_p6 = por %p284_p4, %p283_p3 }
   0xb   : > { %7779 = sst [smem:[#allocation6_spill]] %s5248_s26  ;;  %p341_p8 = scmp.lt.s32.totalorder %s5143_s20, 3 }
   0xd   : > { %p342_p9 = pnand %p3853_p7, %p341_p8 }
   0xf   : > { %345 = sbr.rel (%p342_p9) target bundleno = 1965 (0x7ad), region = 64 }
  0x16   : > { %v3858_v0 = vld [vmem:[%s7741_s1 + $0xc8] sm:$0xff]  ;;  %v3860_v1 = vld [vmem:[%s7741_s1 + $0xd8] sm:$0xff]  ;;  %v3857_v2 = vld [vmem:[%s7741_s1 + $0xc0] sm:$0xff]  ;;  %v7753_v7 = vmov 0.0   ;;  %s3855_s16 = sshll.u32 %s5233_s21, 5  ;;  %vm467_vm0 = vcmask 785408  }
  0x17   : > { %v4386_v3 = vpack.c.bf16 %v3860_v1, %v3858_v0  ;;  %v3859_v4 = vld [vmem:[%s7741_s1 + $0xd0] sm:$0xff]  ;;  %v3862_v5 = vld [vmem:[%s7741_s1 + $0xe8] sm:$0xff]  ;;  %v3864_v6 = vld [vmem:[%s7741_s1 + $0xf8] sm:$0xff]  ;;  %622 = vmatprep.mubr.f32.mxu0 %v7753_v7  ;;  %p382_p10 = scmp.lt.s32.totalorder %s3855_s16, 63  ;;  %vm2176_vm1 = vcmask 1045504   ;;  %vm5146_vm2 = vmmov 1  }
  0x18   : > { %v4388_v8 = vpack.c.bf16 %v3859_v4, %v3857_v2  ;;  %v4390_v9 = vpack.c.bf16 %v3864_v6, %v3862_v5  ;;  %v3861_v10 = vld [vmem:[%s7741_s1 + $0xe0] sm:$0xff]  ;;  %v3863_v11 = vld [vmem:[%s7741_s1 + $0xf0] sm:$0xff]  ;;  %v3866_v12 = vld [vmem:[%s7741_s1 + $0x108] sm:$0xff]  ;;  %s5147_s14 = smov 122   ;;  %vm1865_vm4 = vcmask 998400   ;;  %vm2100_vm5 = vcmask 375808  }
  0x19   : > { %4387 = vmatprep.subr.bf16.mxu0 %v4386_v3  ;;  %v3868_v13 = vld [vmem:[%s7741_s1 + $0x118] sm:$0xff]  ;;  %v4392_v14 = vpack.c.bf16 %v3863_v11, %v3861_v10  ;;  %v3865_v16 = vld [vmem:[%s7741_s1 + $0x100] sm:$0xff]  ;;  %v3867_v17 = vld [vmem:[%s7741_s1 + $0x110] sm:$0xff]  ;;  %s7829_s16 = smov (!%p382_p10, %s3855_s16), 63  ;;  %vm3031_vm6 = vcmask 523264   ;;  %vm2951_vm7 = vcmask 916480  }
  0x1a   : > { %4389 = vmatpush1.bf16.msra.mxu0 %v4388_v8  ;;  %v4394_v15 = vpack.c.bf16 %v3868_v13, %v3866_v12  ;;  %v3870_v18 = vld [vmem:[%s7741_s1 + $0x128] sm:$0xff]  ;;  %v3872_v19 = vld [vmem:[%s7741_s1 + $0x138] sm:$0xff]  ;;  %v4396_v20 = vpack.c.bf16 %v3867_v17, %v3865_v16  ;;  %v3869_v22 = vld [vmem:[%s7741_s1 + $0x120] sm:$0xff]  ;;  %s3856_s26 = sshll.u32 %s7829_s16, 3  ;;  %vm5150_vm8 = vmmov 0   ;;  %vm3605_vm9 = vcmask 982016  }
  0x1b   : > { %4391 = vmatprep.subr.bf16.mxu0 %v4390_v9  ;;  %v4398_v21 = vpack.c.bf16 %v3872_v19, %v3870_v18  ;;  %v3871_v23 = vld [vmem:[%s7741_s1 + $0x130] sm:$0xff]  ;;  %v3874_v24 = vld [vmem:[%s7741_s1 + $0x148] sm:$0xff]  ;;  %v3876_v25 = vld [vmem:[%s7741_s1 + $0x158] sm:$0xff]  ;;  %s5343_s12 = scalar_lea.vmem %s7740_s0, %s3856_s26  ;;  %s5149_s26 = smov 112   ;;  %vm3702_vm10 = vcmask 1043456   ;;  %vm3698_vm11 = vcmask 687104  }
  0x1c   : > { %v4400_v26 = vpack.c.bf16 %v3871_v23, %v3869_v22  ;;  %v4402_v27 = vpack.c.bf16 %v3876_v25, %v3874_v24  ;;  %v3873_v28 = vld [vmem:[%s7741_s1 + $0x140] sm:$0xff]  ;;  %v3875_v29 = vld [vmem:[%s7741_s1 + $0x150] sm:$0xff]  ;;  %v3878_v30 = vld [vmem:[%s7741_s1 + $0x168] sm:$0xff]  ;;  %s378_s25 = sand.u32 1, %s5135_s18   ;;  %s4297_s30 = sshll.u32 %s5233_s21, 7 }
  0x1d   : > { %v3880_v31 = vld [vmem:[%s7741_s1 + $0x178] sm:$0xff]  ;;  %v4404_v32 = vpack.c.bf16 %v3875_v29, %v3873_v28  ;;  %v3877_v34 = vld [vmem:[%s7741_s1 + $0x160] sm:$0xff]  ;;  %v3879_v35 = vld [vmem:[%s7741_s1 + $0x170] sm:$0xff]  ;;  %s3854_s29 = sshll.u32 %s378_s25, 3  ;;  %s7698_s15 = scalar_lea.hbm %s7751_s11, %s4297_s30 }
  0x1e   : > { %4393 = vmatpush1.bf16.msra.mxu0 %v4392_v14  ;;  %v4406_v33 = vpack.c.bf16 %v3880_v31, %v3878_v30  ;;  %v418_v36 = vld [vmem:[%s7741_s1 + $0x8] sm:$0xff]  ;;  %v420_v37 = vld [vmem:[%s7741_s1 + $0x18] sm:$0xff]  ;;  %v4408_v38 = vpack.c.bf16 %v3879_v35, %v3877_v34  ;;  %v417_v40 = vld [vmem:[%s7741_s1] sm:$0xff]  ;;  %s380_s13 = scalar_lea.vmem [#allocation2], %s3854_s29  ;;  %s3778_s22 = scalar_lea.sflag [#allocation3], %s378_s25 }
  0x1f   : > { %4395 = vmatprep.subr.bf16.mxu0 %v4394_v15  ;;  %v4410_v39 = vpack.c.bf16 %v420_v37, %v418_v36  ;;  %v419_v41 = vld [vmem:[%s7741_s1 + $0x10] sm:$0xff]  ;;  %v422_v42 = vld [vmem:[%s7741_s1 + $0x28] sm:$0xff]  ;;  %v424_v43 = vld [vmem:[%s7741_s1 + $0x38] sm:$0xff]  ;;  %s5151_s21 = smov [#allocation2]  }
  0x20   : > { %v5358_v44 = vld [vmem:[%s5343_s12 + $0x8] sm:$0xff]  ;;  %v4412_v45 = vpack.c.bf16 %v419_v41, %v417_v40  ;;  %v4414_v46 = vpack.c.bf16 %v424_v43, %v422_v42  ;;  %v421_v47 = vld [vmem:[%s7741_s1 + $0x20] sm:$0xff]  ;;  %v423_v48 = vld [vmem:[%s7741_s1 + $0x30] sm:$0xff]  ;;  %s5085_s29 = sshll.u32 %s5151_s21, 4  ;;  %s5086_s29 = int_to_ptr.vmem [resolvable:$false] %s5085_s29 }
  0x21   : > { %v426_v49 = vld [vmem:[%s7741_s1 + $0x48] sm:$0xff]  ;;  %v428_v50 = vld [vmem:[%s7741_s1 + $0x58] sm:$0xff]  ;;  %v5376_v51 = vld [vmem:[%s5343_s12 + $0x10] sm:$0xff]  ;;  %v4416_v52 = vpack.c.bf16 %v423_v48, %v421_v47  ;;  %s5087_s19 = scalar_lea.vmem %s5086_s29, 256 }
  0x22   : > { %4397 = vmatpush1.bf16.msra.mxu0 %v4396_v20  ;;  %v4418_v53 = vpack.c.bf16 %v428_v50, %v426_v49  ;;  %v425_v54 = vld [vmem:[%s7741_s1 + $0x40] sm:$0xff]  ;;  %v427_v55 = vld [vmem:[%s7741_s1 + $0x50] sm:$0xff]  ;;  %v430_v56 = vld [vmem:[%s7741_s1 + $0x68] sm:$0xff] }
  0x23   : > { %4399 = vmatprep.subr.bf16.mxu0 %v4398_v21  ;;  %v432_v57 = vld [vmem:[%s7741_s1 + $0x78] sm:$0xff]  ;;  %v4420_v59 = vpack.c.bf16 %v427_v55, %v425_v54  ;;  %v429_v61 = vld [vmem:[%s7741_s1 + $0x60] sm:$0xff]  ;;  %v431_v62 = vld [vmem:[%s7741_s1 + $0x70] sm:$0xff] }
  0x24   : > { %v5394_v58 = vld [vmem:[%s5343_s12 + $0x18] sm:$0xff]  ;;  %v4422_v60 = vpack.c.bf16 %v432_v57, %v430_v56  ;;  %v434_v63 = vld [vmem:[%s7741_s1 + $0x88] sm:$0xff]  ;;  %v5412_v1 = vld [vmem:[%s5343_s12 + $0x20] sm:$0xff]  ;;  %v4424_v2 = vpack.c.bf16 %v431_v62, %v429_v61 }
  0x25   : > { %v436_v0 = vld [vmem:[%s7741_s1 + $0x98] sm:$0xff]  ;;  %v433_v4 = vld [vmem:[%s7741_s1 + $0x80] sm:$0xff]  ;;  %v435_v5 = vld [vmem:[%s7741_s1 + $0x90] sm:$0xff] }
  0x26   : > { %4401 = vmatpush1.bf16.msra.mxu0 %v4400_v26  ;;  %v4426_v3 = vpack.c.bf16 %v436_v0, %v434_v63  ;;  %v438_v6 = vld [vmem:[%s7741_s1 + $0xa8] sm:$0xff]  ;;  %v440_v8 = vld [vmem:[%s7741_s1 + $0xb8] sm:$0xff]  ;;  %v4428_v10 = vpack.c.bf16 %v435_v5, %v433_v4  ;;  %v437_v12 = vld [vmem:[%s7741_s1 + $0xa0] sm:$0xff] }
  0x27   : > { %4403 = vmatprep.subr.bf16.mxu0 %v4402_v27  ;;  %v5430_v9 = vld [vmem:[%s5343_s12 + $0x28] sm:$0xff]  ;;  %v4430_v11 = vpack.c.bf16 %v440_v8, %v438_v6  ;;  %v439_v13 = vld [vmem:[%s7741_s1 + $0xb0] sm:$0xff]  ;;  %v3944_v15 = vld [vmem:[%s7741_s1 + $0x198] sm:$0xff] }
  0x28   : > { %v3942_v14 = vld [vmem:[%s7741_s1 + $0x188] sm:$0xff]  ;;  %v5448_v16 = vld [vmem:[%s5343_s12 + $0x30] sm:$0xff]  ;;  %v4432_v17 = vpack.c.bf16 %v439_v13, %v437_v12  ;;  %v5454_v19 = vld [vmem:[%s5343_s12 + $0x38] sm:$0xff] }
  0x29   : > { %v4434_v18 = vpack.c.bf16 %v3944_v15, %v3942_v14  ;;  %v5460_v20 = vld [vmem:[%s5343_s12 + $0x40] sm:$0xff]  ;;  %v5466_v21 = vld [vmem:[%s5343_s12 + $0x48] sm:$0xff]  ;;  %v5472_v22 = vld [vmem:[%s5343_s12 + $0x50] sm:$0xff] }
  0x2a   : > { %4405 = vmatpush1.bf16.msra.mxu0 %v4404_v32  ;;  %v5478_v23 = vld [vmem:[%s5343_s12 + $0x58] sm:$0xff]  ;;  %v5484_v24 = vld [vmem:[%s5343_s12 + $0x60] sm:$0xff]  ;;  %v5490_v25 = vld [vmem:[%s5343_s12 + $0x68] sm:$0xff] }
  0x2b   : > { %4407 = vmatprep.subr.bf16.mxu0 %v4406_v33  ;;  %v5496_v26 = vld [vmem:[%s5343_s12 + $0x70] sm:$0xff]  ;;  %v5502_v27 = vld [vmem:[%s5343_s12 + $0x78] sm:$0xff]  ;;  %v5508_v28 = vld [vmem:[%s5343_s12 + $0x80] sm:$0xff] }
  0x2c   : > { %v5514_v29 = vld [vmem:[%s5343_s12 + $0x88] sm:$0xff]  ;;  %v5520_v30 = vld [vmem:[%s5343_s12 + $0x90] sm:$0xff]  ;;  %v5526_v31 = vld [vmem:[%s5343_s12 + $0x98] sm:$0xff] }
  0x2d   : > { %v5532_v32 = vld [vmem:[%s5343_s12 + $0xa0] sm:$0xff]  ;;  %v5538_v33 = vld [vmem:[%s5343_s12 + $0xa8] sm:$0xff]  ;;  %v5544_v34 = vld [vmem:[%s5343_s12 + $0xb0] sm:$0xff] }
  0x2e   : > { %4409 = vmatpush1.bf16.msra.mxu0 %v4408_v38  ;;  %v5550_v35 = vld [vmem:[%s5343_s12 + $0xb8] sm:$0xff]  ;;  %v5556_v36 = vld [vmem:[%s5343_s12 + $0xc0] sm:$0xff]  ;;  %v5562_v37 = vld [vmem:[%s5343_s12 + $0xc8] sm:$0xff] }
  0x2f   : > { %4411 = vmatprep.subr.bf16.mxu0 %v4410_v39  ;;  %v5568_v38 = vld [vmem:[%s5343_s12 + $0xd0] sm:$0xff]  ;;  %v5574_v39 = vld [vmem:[%s5343_s12 + $0xd8] sm:$0xff]  ;;  %v5580_v40 = vld [vmem:[%s5343_s12 + $0xe0] sm:$0xff] }
  0x30   : > { %v5586_v41 = vld [vmem:[%s5343_s12 + $0xe8] sm:$0xff]  ;;  %v5592_v42 = vld [vmem:[%s5343_s12 + $0xf0] sm:$0xff]  ;;  %v3941_v43 = vld [vmem:[%s7741_s1 + $0x180] sm:$0xff] }
  0x31   : > { %3881 = vmatmul.mubr.msk.f32.vlgmr.msra.gmra.mrb[0].mxu0 %vm467_vm0, %v5358_v44  ;;  %v3948_v47 = vld [vmem:[%s7741_s1 + $0x1b8] sm:$0xff]  ;;  %v387_v48 = vld [vmem:[%s5343_s12] sm:$0xff]  ;;  %v3950_v54 = vld [vmem:[%s7741_s1 + $0x1c8] sm:$0xff] }
  0x32   : > { %4413 = vmatpush1.bf16.msra.mxu0 %v4412_v45  ;;  %628 = vmatprep.mubr.f32.mxu0 %v7753_v7  ;;  %v3943_v45 = vld [vmem:[%s7741_s1 + $0x190] sm:$0xff]  ;;  %v3952_v55 = vld [vmem:[%s7741_s1 + $0x1d8] sm:$0xff]  ;;  %v3954_v61 = vld [vmem:[%s7741_s1 + $0x1e8] sm:$0xff] }
  0x33   : > { %4415 = vmatprep.subr.bf16.mxu0 %v4414_v46  ;;  %v3946_v46 = vld [vmem:[%s7741_s1 + $0x1a8] sm:$0xff]  ;;  %v4436_v49 = vpack.c.bf16 %v3943_v45, %v3941_v43  ;;  %v4442_v57 = vpack.c.bf16 %v3952_v55, %v3950_v54  ;;  %v3956_v62 = vld [vmem:[%s7741_s1 + $0x1f8] sm:$0xff]  ;;  %v3957_v8 = vld [vmem:[%s7741_s1 + $0x200] sm:$0xff] }
  0x34   : > { %v4438_v50 = vpack.c.bf16 %v3948_v47, %v3946_v46  ;;  %v4446_v0 = vpack.c.bf16 %v3956_v62, %v3954_v61  ;;  %v3958_v4 = vld [vmem:[%s7741_s1 + $0x208] sm:$0xff]  ;;  %v3964_v12 = vld [vmem:[%s7741_s1 + $0x238] sm:$0xff]  ;;  %v3961_v15 = vld [vmem:[%s7741_s1 + $0x220] sm:$0xff] }
  0x35   : > { %3882 = vmatmul.mubr.msk.f32.gmra.mrb[2].mxu0 %vm467_vm0, %v5376_v51  ;;  %v4013_v43 = vld [vmem:[%s7743_s3 + $0x1f0] sm:$0xff]  ;;  %v4016_v46 = vld [vmem:[%s7743_s3 + $0x208] sm:$0xff]  ;;  %v4018_v47 = vld [vmem:[%s7743_s3 + $0x218] sm:$0xff] }
  0x36   : > { %634 = vmatprep.mubr.f32.mxu0 %v7753_v7  ;;  %4417 = vmatpush1.bf16.msra.mxu0 %v4416_v52  ;;  %v3945_v52 = vld [vmem:[%s7741_s1 + $0x1a0] sm:$0xff]  ;;  %v4020_v54 = vld [vmem:[%s7743_s3 + $0x228] sm:$0xff]  ;;  %v4022_v55 = vld [vmem:[%s7743_s3 + $0x238] sm:$0xff] }
  0x37   : > { %4419 = vmatprep.subr.bf16.mxu0 %v4418_v53  ;;  %v3947_v53 = vld [vmem:[%s7741_s1 + $0x1b0] sm:$0xff]  ;;  %v4024_v62 = vld [vmem:[%s7743_s3 + $0x248] sm:$0xff]  ;;  %vm5987_vm3 = vmpackc.low %vm2176_vm1, %vm5146_vm2 }
  0x38   : > { %v4440_v56 = vpack.c.bf16 %v3947_v53, %v3945_v52  ;;  %v4017_v52 = vld [vmem:[%s7743_s3 + $0x210] sm:$0xff] }
  0x39   : > { %3883 = vmatmul.mubr.msk.f32.gmra.mrb[4].mxu0 %vm467_vm0, %v5394_v58 }
  0x3a   : > { %640 = vmatprep.mubr.f32.mxu0 %v7753_v7  ;;  %4421 = vmatpush1.bf16.msra.mxu0 %v4420_v59  ;;  %v3949_v59 = vld [vmem:[%s7741_s1 + $0x1c0] sm:$0xff] }
  0x3b   : > { %4423 = vmatprep.subr.bf16.mxu0 %v4422_v60  ;;  %v3951_v60 = vld [vmem:[%s7741_s1 + $0x1d0] sm:$0xff] }
  0x3c   : > { %v4444_v63 = vpack.c.bf16 %v3951_v60, %v3949_v59  ;;  %v4019_v59 = vld [vmem:[%s7743_s3 + $0x220] sm:$0xff]  ;;  %v4021_v60 = vld [vmem:[%s7743_s3 + $0x230] sm:$0xff] }
  0x3d   : > { %3884 = vmatmul.mubr.msk.f32.gmra.mrb[6].mxu0 %vm467_vm0, %v5412_v1  ;;  %v4484_v61 = vpack.c.bf16 %v4021_v60, %v4019_v59 }
  0x3e   : > { %646 = vmatprep.mubr.f32.mxu0 %v7753_v7  ;;  %4425 = vmatpush1.bf16.msra.mxu0 %v4424_v2  ;;  %v3953_v2 = vld [vmem:[%s7741_s1 + $0x1e0] sm:$0xff] }
  0x3f   : > { %4427 = vmatprep.subr.bf16.mxu0 %v4426_v3  ;;  %v3955_v3 = vld [vmem:[%s7741_s1 + $0x1f0] sm:$0xff] }
  0x40   : > { %v4448_v5 = vpack.c.bf16 %v3955_v3, %v3953_v2  ;;  %v4023_v3 = vld [vmem:[%s7743_s3 + $0x240] sm:$0xff] }
  0x41   : > { %3885 = vmatmul.mubr.msk.f32.gmra.mrb[8].mxu0 %vm467_vm0, %v5430_v9 }
  0x42   : > { %652 = vmatprep.mubr.f32.mxu0 %v7753_v7  ;;  %4429 = vmatpush1.bf16.msra.mxu0 %v4428_v10  ;;  %v3959_v10 = vld [vmem:[%s7741_s1 + $0x210] sm:$0xff] }
  0x43   : > { %4431 = vmatprep.subr.bf16.mxu0 %v4430_v11  ;;  %v3962_v11 = vld [vmem:[%s7741_s1 + $0x228] sm:$0xff]  ;;  %v4452_v13 = vpack.c.bf16 %v3959_v10, %v3957_v8  ;;  %v4030_v10 = vld [vmem:[%s7743_s3 + $0x278] sm:$0xff] }
  0x44   : > { %v4454_v14 = vpack.c.bf16 %v3964_v12, %v3962_v11  ;;  %v4028_v8 = vld [vmem:[%s7743_s3 + $0x268] sm:$0xff] }
  0x45   : > { %3886 = vmatmul.mubr.msk.f32.gmra.mrb[10].mxu0 %vm467_vm0, %v5448_v16  ;;  %v4490_v12 = vpack.c.bf16 %v4030_v10, %v4028_v8 }
  0x46   : > { %658 = vmatprep.mubr.f32.mxu0 %v7753_v7  ;;  %4433 = vmatpush1.bf16.msra.mxu0 %v4432_v17  ;;  %v3963_v17 = vld [vmem:[%s7741_s1 + $0x230] sm:$0xff] }
  0x47   : > { %4435 = vmatprep.subr.bf16.mxu0 %v4434_v18  ;;  %v4456_v18 = vpack.c.bf16 %v3963_v17, %v3961_v15 }
  0x49   : > { %3887 = vmatmul.mubr.msk.f32.gmra.mrb[12].mxu0 %vm467_vm0, %v5454_v19 }
  0x4a   : > { %664 = vmatprep.mubr.f32.mxu0 %v7753_v7 }
  0x4d   : > { %3888 = vmatmul.mubr.msk.f32.gmra.mrb[14].mxu0 %vm467_vm0, %v5460_v20 }
  0x4e   : > { %670 = vmatprep.mubr.f32.mxu0 %v7753_v7 }
  0x51   : > { %3889 = vmatmul.mubr.msk.f32.gmra.mrb[16].mxu0 %vm467_vm0, %v5466_v21 }
  0x52   : > { %676 = vmatprep.mubr.f32.mxu0 %v7753_v7 }
  0x55   : > { %3890 = vmatmul.mubr.msk.f32.gmra.mrb[18].mxu0 %vm467_vm0, %v5472_v22 }
  0x56   : > { %682 = vmatprep.mubr.f32.mxu0 %v7753_v7 }
  0x59   : > { %3891 = vmatmul.mubr.msk.f32.gmra.mrb[20].mxu0 %vm467_vm0, %v5478_v23 }
  0x5a   : > { %688 = vmatprep.mubr.f32.mxu0 %v7753_v7 }
  0x5d   : > { %3892 = vmatmul.mubr.msk.f32.gmra.mrb[22].mxu0 %vm467_vm0, %v5484_v24 }
  0x5e   : > { %694 = vmatprep.mubr.f32.mxu0 %v7753_v7 }
  0x61   : > { %3893 = vmatmul.mubr.msk.f32.gmra.mrb[24].mxu0 %vm467_vm0, %v5490_v25 }
  0x62   : > { %700 = vmatprep.mubr.f32.mxu0 %v7753_v7 }
  0x65   : > { %3894 = vmatmul.mubr.msk.f32.gmra.mrb[26].mxu0 %vm467_vm0, %v5496_v26 }
  0x66   : > { %706 = vmatprep.mubr.f32.mxu0 %v7753_v7 }
  0x69   : > { %3895 = vmatmul.mubr.msk.f32.gmra.mrb[28].mxu0 %vm467_vm0, %v5502_v27 }
  0x6a   : > { %712 = vmatprep.mubr.f32.mxu0 %v7753_v7 }
  0x6d   : > { %3896 = vmatmul.mubr.msk.f32.gmra.mrb[30].mxu0 %vm467_vm0, %v5508_v28 }
  0x6e   : > { %718 = vmatprep.mubr.f32.mxu0 %v7753_v7 }
  0x71   : > { %3897 = vmatmul.mubr.msk.f32.gmra.mrb[32].mxu0 %vm467_vm0, %v5514_v29 }
  0x72   : > { %724 = vmatprep.mubr.f32.mxu0 %v7753_v7 }
  0x75   : > { %3898 = vmatmul.mubr.msk.f32.gmra.mrb[34].mxu0 %vm467_vm0, %v5520_v30 }
  0x76   : > { %730 = vmatprep.mubr.f32.mxu0 %v7753_v7 }
  0x79   : > { %3899 = vmatmul.mubr.msk.f32.gmra.mrb[36].mxu0 %vm467_vm0, %v5526_v31 }
  0x7a   : > { %736 = vmatprep.mubr.f32.mxu0 %v7753_v7 }
  0x7d   : > { %3900 = vmatmul.mubr.msk.f32.gmra.mrb[38].mxu0 %vm467_vm0, %v5532_v32 }
  0x7e   : > { %742 = vmatprep.mubr.f32.mxu0 %v7753_v7 }
  0x81   : > { %3901 = vmatmul.mubr.msk.f32.gmra.mrb[40].mxu0 %vm467_vm0, %v5538_v33 }
  0x82   : > { %748 = vmatprep.mubr.f32.mxu0 %v7753_v7 }
  0x85   : > { %3902 = vmatmul.mubr.msk.f32.gmra.mrb[42].mxu0 %vm467_vm0, %v5544_v34 }
  0x86   : > { %754 = vmatprep.mubr.f32.mxu0 %v7753_v7 }
  0x89   : > { %3903 = vmatmul.mubr.msk.f32.gmra.mrb[44].mxu0 %vm467_vm0, %v5550_v35 }
  0x8a   : > { %760 = vmatprep.mubr.f32.mxu0 %v7753_v7 }
  0x8d   : > { %3904 = vmatmul.mubr.msk.f32.gmra.mrb[46].mxu0 %vm467_vm0, %v5556_v36 }
  0x8e   : > { %766 = vmatprep.mubr.f32.mxu0 %v7753_v7 }
  0x91   : > { %3905 = vmatmul.mubr.msk.f32.gmra.mrb[48].mxu0 %vm467_vm0, %v5562_v37 }
  0x92   : > { %772 = vmatprep.mubr.f32.mxu0 %v7753_v7 }
  0x95   : > { %3906 = vmatmul.mubr.msk.f32.gmra.mrb[50].mxu0 %vm467_vm0, %v5568_v38 }
  0x96   : > { %778 = vmatprep.mubr.f32.mxu0 %v7753_v7 }
  0x99   : > { %3907 = vmatmul.mubr.msk.f32.gmra.mrb[52].mxu0 %vm467_vm0, %v5574_v39 }
  0x9a   : > { %784 = vmatprep.mubr.f32.mxu0 %v7753_v7 }
  0x9d   : > { %3908 = vmatmul.mubr.msk.f32.gmra.mrb[54].mxu0 %vm467_vm0, %v5580_v40 }
  0x9e   : > { %790 = vmatprep.mubr.f32.mxu0 %v7753_v7 }
  0xa1   : > { %3909 = vmatmul.mubr.msk.f32.gmra.mrb[56].mxu0 %vm467_vm0, %v5586_v41 }
  0xa2   : > { %796 = vmatprep.mubr.f32.mxu0 %v7753_v7 }
  0xa5   : > { %3910 = vmatmul.mubr.msk.f32.gmra.mrb[58].mxu0 %vm467_vm0, %v5592_v42 }
  0xa6   : > { %870 = vmatprep.mubr.f32.mxu0 %v7753_v7 }
  0xa9   : > { %3911 = vmatmul.mubr.msk.f32.vlgmr.msra.gmra.mrb[0].mxu0 %vm467_vm0, %v387_v48  ;;  %v1503_v48 = vlaneseq }
  0xaa   : > { %4437 = vmatpush1.bf16.msra.mxu0 %v4436_v49  ;;  %876 = vmatprep.mubr.f32.mxu0 %v7753_v7  ;;  %v4478_v49 = vpack.c.bf16 %v4018_v47, %v4016_v46 }
  0xab   : > { %4439 = vmatprep.subr.bf16.mxu0 %v4438_v50  ;;  %v4015_v50 = vld [vmem:[%s7743_s3 + $0x200] sm:$0xff] }
  0xac   : > { %v4480_v53 = vpack.c.bf16 %v4017_v52, %v4015_v50  ;;  %v2012_v52 = vld [vmem:[%s7743_s3 + $0x8] sm:$0xff] }
  0xad   : > { %3912 = vmatmul.mubr.msk.f32.gmra.mrb[2].mxu0 %vm467_vm0, %v5358_v44  ;;  %v3960_v44 = vld [vmem:[%s7741_s1 + $0x218] sm:$0xff] }
  0xae   : > { %882 = vmatprep.mubr.f32.mxu0 %v7753_v7  ;;  %4441 = vmatpush1.bf16.msra.mxu0 %v4440_v56  ;;  %v4450_v6 = vpack.c.bf16 %v3960_v44, %v3958_v4  ;;  %v5920_v56 = vshrl.u32 %v1503_v48, 7  ;;  %v4025_v4 = vld [vmem:[%s7743_s3 + $0x250] sm:$0xff]  ;;  %v1501_v44 = vld [vmem:[%s7742_s2] sm:$0x3] }
  0xaf   : > { %4443 = vmatprep.subr.bf16.mxu0 %v4442_v57  ;;  %v4482_v57 = vpack.c.bf16 %v4022_v55, %v4020_v54 }
  0xb0   : > { %7782 = vst [vmem:[#allocation7_spill] sm:$0xff] %v5920_v56 }
  0xb1   : > { %3913 = vmatmul.mubr.msk.f32.gmra.mrb[4].mxu0 %vm467_vm0, %v5376_v51 }
  0xb2   : > { %888 = vmatprep.mubr.f32.mxu0 %v7753_v7  ;;  %4445 = vmatpush1.bf16.msra.mxu0 %v4444_v63  ;;  %v4026_v63 = vld [vmem:[%s7743_s3 + $0x258] sm:$0xff] }
  0xb3   : > { %4447 = vmatprep.subr.bf16.mxu0 %v4446_v0  ;;  %v7756_v0 = vsub.s32 0, %v5920_v56  ;;  %v4486_v2 = vpack.c.bf16 %v4026_v63, %v4024_v62 }
  0xb5   : > { %3914 = vmatmul.mubr.msk.f32.gmra.mrb[6].mxu0 %vm467_vm0, %v5394_v58  ;;  %v5953_v11 = vrot.slane %v1501_v44, %v7756_v0 }
  0xb6   : > { %894 = vmatprep.mubr.f32.mxu0 %v7753_v7  ;;  %4449 = vmatpush1.bf16.msra.mxu0 %v4448_v5  ;;  %v7755_v5 = vsub.s32 1, %v5920_v56 }
  0xb7   : > { %4451 = vmatprep.subr.bf16.mxu0 %v4450_v6  ;;  %v4488_v6 = vpack.c.bf16 %v4025_v4, %v4023_v3 }
  0xb8   : > { %v5963_v17 = vrot.slane %v1501_v44, %v7755_v5 }
  0xb9   : > { %3915 = vmatmul.mubr.msk.f32.gmra.mrb[8].mxu0 %vm467_vm0, %v5412_v1 }
  0xba   : > { %900 = vmatprep.mubr.f32.mxu0 %v7753_v7  ;;  %4453 = vmatpush1.bf16.msra.mxu0 %v4452_v13  ;;  %v4027_v13 = vld [vmem:[%s7743_s3 + $0x260] sm:$0xff] }
  0xbb   : > { %4455 = vmatprep.subr.bf16.mxu0 %v4454_v14  ;;  %v4029_v14 = vld [vmem:[%s7743_s3 + $0x270] sm:$0xff] }
  0xbd   : > { %3916 = vmatmul.mubr.msk.f32.gmra.mrb[10].mxu0 %vm467_vm0, %v5430_v9 }
  0xbe   : > { %906 = vmatprep.mubr.f32.mxu0 %v7753_v7  ;;  %4457 = vmatpush1.bf16.msra.mxu0 %v4456_v18  ;;  %v4492_v18 = vpack.c.bf16 %v4029_v14, %v4027_v13 }
  0xc1   : > { %3917 = vmatmul.mubr.msk.f32.gmra.mrb[12].mxu0 %vm467_vm0, %v5448_v16 }
  0xc2   : > { %912 = vmatprep.mubr.f32.mxu0 %v7753_v7 }
  0xc5   : > { %3918 = vmatmul.mubr.msk.f32.gmra.mrb[14].mxu0 %vm467_vm0, %v5454_v19 }
  0xc6   : > { %918 = vmatprep.mubr.f32.mxu0 %v7753_v7 }
  0xc9   : > { %3919 = vmatmul.mubr.msk.f32.gmra.mrb[16].mxu0 %vm467_vm0, %v5460_v20 }
  0xca   : > { %924 = vmatprep.mubr.f32.mxu0 %v7753_v7 }
  0xcd   : > { %3920 = vmatmul.mubr.msk.f32.gmra.mrb[18].mxu0 %vm467_vm0, %v5466_v21 }
  0xce   : > { %930 = vmatprep.mubr.f32.mxu0 %v7753_v7 }
  0xd1   : > { %3921 = vmatmul.mubr.msk.f32.gmra.mrb[20].mxu0 %vm467_vm0, %v5472_v22 }
  0xd2   : > { %936 = vmatprep.mubr.f32.mxu0 %v7753_v7 }
  0xd5   : > { %3922 = vmatmul.mubr.msk.f32.gmra.mrb[22].mxu0 %vm467_vm0, %v5478_v23 }
  0xd6   : > { %942 = vmatprep.mubr.f32.mxu0 %v7753_v7 }
  0xd9   : > { %3923 = vmatmul.mubr.msk.f32.gmra.mrb[24].mxu0 %vm467_vm0, %v5484_v24 }
  0xda   : > { %948 = vmatprep.mubr.f32.mxu0 %v7753_v7 }
  0xdd   : > { %3924 = vmatmul.mubr.msk.f32.gmra.mrb[26].mxu0 %vm467_vm0, %v5490_v25 }
  0xde   : > { %954 = vmatprep.mubr.f32.mxu0 %v7753_v7 }
  0xe1   : > { %3925 = vmatmul.mubr.msk.f32.gmra.mrb[28].mxu0 %vm467_vm0, %v5496_v26 }
  0xe2   : > { %960 = vmatprep.mubr.f32.mxu0 %v7753_v7 }
  0xe5   : > { %3926 = vmatmul.mubr.msk.f32.gmra.mrb[30].mxu0 %vm467_vm0, %v5502_v27 }
  0xe6   : > { %966 = vmatprep.mubr.f32.mxu0 %v7753_v7 }
  0xe9   : > { %3927 = vmatmul.mubr.msk.f32.gmra.mrb[32].mxu0 %vm467_vm0, %v5508_v28 }
  0xea   : > { %972 = vmatprep.mubr.f32.mxu0 %v7753_v7 }
  0xed   : > { %3928 = vmatmul.mubr.msk.f32.gmra.mrb[34].mxu0 %vm467_vm0, %v5514_v29 }
  0xee   : > { %978 = vmatprep.mubr.f32.mxu0 %v7753_v7 }
  0xf1   : > { %3929 = vmatmul.mubr.msk.f32.gmra.mrb[36].mxu0 %vm467_vm0, %v5520_v30 }
  0xf2   : > { %984 = vmatprep.mubr.f32.mxu0 %v7753_v7 }
  0xf5   : > { %3930 = vmatmul.mubr.msk.f32.gmra.mrb[38].mxu0 %vm467_vm0, %v5526_v31 }
  0xf6   : > { %990 = vmatprep.mubr.f32.mxu0 %v7753_v7 }
  0xf9   : > { %3931 = vmatmul.mubr.msk.f32.gmra.mrb[40].mxu0 %vm467_vm0, %v5532_v32 }
  0xfa   : > { %996 = vmatprep.mubr.f32.mxu0 %v7753_v7 }
  0xfd   : > { %3932 = vmatmul.mubr.msk.f32.gmra.mrb[42].mxu0 %vm467_vm0, %v5538_v33 }
  0xfe   : > { %1002 = vmatprep.mubr.f32.mxu0 %v7753_v7 }
 0x101   : > { %3933 = vmatmul.mubr.msk.f32.gmra.mrb[44].mxu0 %vm467_vm0, %v5544_v34 }
 0x102   : > { %1008 = vmatprep.mubr.f32.mxu0 %v7753_v7 }
 0x105   : > { %3934 = vmatmul.mubr.msk.f32.gmra.mrb[46].mxu0 %vm467_vm0, %v5550_v35 }
 0x106   : > { %1014 = vmatprep.mubr.f32.mxu0 %v7753_v7 }
 0x109   : > { %3935 = vmatmul.mubr.msk.f32.gmra.mrb[48].mxu0 %vm467_vm0, %v5556_v36 }
 0x10a   : > { %1020 = vmatprep.mubr.f32.mxu0 %v7753_v7 }
 0x10d   : > { %3936 = vmatmul.mubr.msk.f32.gmra.mrb[50].mxu0 %vm467_vm0, %v5562_v37 }
 0x10e   : > { %1026 = vmatprep.mubr.f32.mxu0 %v7753_v7 }
 0x111   : > { %3937 = vmatmul.mubr.msk.f32.gmra.mrb[52].mxu0 %vm467_vm0, %v5568_v38 }
 0x112   : > { %1032 = vmatprep.mubr.f32.mxu0 %v7753_v7 }
 0x115   : > { %3938 = vmatmul.mubr.msk.f32.gmra.mrb[54].mxu0 %vm467_vm0, %v5574_v39 }
 0x116   : > { %1038 = vmatprep.mubr.f32.mxu0 %v7753_v7 }
 0x119   : > { %3939 = vmatmul.mubr.msk.f32.gmra.mrb[56].mxu0 %vm467_vm0, %v5580_v40 }
 0x11a   : > { %1044 = vmatprep.mubr.f32.mxu0 %v7753_v7 }
 0x11d   : > { %3940 = vmatmul.mubr.msk.f32.gmra.mrb[58].mxu0 %vm467_vm0, %v5586_v41 }
 0x11e   : > { %1260 = vmatprep.mubr.f32.mxu0 %v7753_v7 }
 0x121   : > { %3965 = vmatmul.mubr.msk.f32.vlgmr.msra.gmra.mrb[0].mxu0 %vm467_vm0, %v5376_v51  ;;  %v1080_v51 = vld [vmem:[%s5343_s12 + $0xf8] sm:$0xff]  ;;  %s3791_s12 = sshll.u32 %s380_s13, 4  ;;  %s7700_s12 = int_to_ptr.vmem [resolvable:$true] %s3791_s12 }
 0x122   : > { %1266 = vmatprep.mubr.f32.mxu0 %v7753_v7  ;;  %s5081_s24 = scalar_lea.vmem %s7700_s12, 128  ;;  %p5088_p0 = scmp.lt.s32.totalorder %s7700_s12, %s5086_s29 }
 0x123   : > { %p5082_p11 = scmp.ne.s32.totalorder %s7700_s12, %s5081_s24  ;;  %p5089_p1 = scmp.lt.s32.totalorder %s5087_s19, %s5081_s24 }
 0x125   : > { %3966 = vmatmul.mubr.msk.f32.gmra.mrb[2].mxu0 %vm467_vm0, %v5394_v58  ;;  %v3996_v58 = vld [vmem:[%s7743_s3 + $0x168] sm:$0xff]  ;;  %p5083_p12 = pnand %p5082_p11, %p5250_p5  ;;  %p5090_p2 = por %p5089_p1, %p5088_p0 }
 0x126   : > { %1272 = vmatprep.mubr.f32.mxu0 %v7753_v7 }
 0x127   : > { %p5084_p13 = pneg %p5083_p12 }
 0x129   : > { %3967 = vmatmul.mubr.msk.f32.gmra.mrb[4].mxu0 %vm467_vm0, %v5412_v1  ;;  %v3998_v1 = vld [vmem:[%s7743_s3 + $0x178] sm:$0xff]  ;;  %p5091_p3 = pnand %p5090_p2, %p5084_p13 }
 0x12a   : > { %1278 = vmatprep.mubr.f32.mxu0 %v7753_v7 }
 0x12d   : > { %3968 = vmatmul.mubr.msk.f32.gmra.mrb[6].mxu0 %vm467_vm0, %v5430_v9  ;;  %v4458_v9 = vpack.c.bf16 %v3998_v1, %v3996_v58  ;;  %v4032_v58 = vld [vmem:[%s7743_s3 + $0x288] sm:$0xff]  ;;  %v4034_v1 = vld [vmem:[%s7743_s3 + $0x298] sm:$0xff] }
 0x12e   : > { %1284 = vmatprep.mubr.f32.mxu0 %v7753_v7 }
 0x12f   : > { %4459 = vmatprep.subr.bf16.mxu1 %v4458_v9 }
 0x131   : > { %3969 = vmatmul.mubr.msk.f32.gmra.mrb[8].mxu0 %vm467_vm0, %v5448_v16  ;;  %v3995_v16 = vld [vmem:[%s7743_s3 + $0x160] sm:$0xff] }
 0x132   : > { %1290 = vmatprep.mubr.f32.mxu0 %v7753_v7 }
 0x135   : > { %3970 = vmatmul.mubr.msk.f32.gmra.mrb[10].mxu0 %vm467_vm0, %v5454_v19  ;;  %v3997_v19 = vld [vmem:[%s7743_s3 + $0x170] sm:$0xff] }
 0x136   : > { %1296 = vmatprep.mubr.f32.mxu0 %v7753_v7 }
 0x139   : > { %3971 = vmatmul.mubr.msk.f32.gmra.mrb[12].mxu0 %vm467_vm0, %v5460_v20  ;;  %v4460_v20 = vpack.c.bf16 %v3997_v19, %v3995_v16  ;;  %v4494_v16 = vpack.c.bf16 %v4034_v1, %v4032_v58  ;;  %v4031_v19 = vld [vmem:[%s7743_s3 + $0x280] sm:$0xff] }
 0x13a   : > { %1302 = vmatprep.mubr.f32.mxu0 %v7753_v7 }
 0x13b   : > { %4461 = vmatpush1.bf16.msra.mxu1 %v4460_v20  ;;  %v4033_v20 = vld [vmem:[%s7743_s3 + $0x290] sm:$0xff] }
 0x13d   : > { %3972 = vmatmul.mubr.msk.f32.gmra.mrb[14].mxu0 %vm467_vm0, %v5466_v21  ;;  %v4000_v21 = vld [vmem:[%s7743_s3 + $0x188] sm:$0xff] }
 0x13e   : > { %1308 = vmatprep.mubr.f32.mxu0 %v7753_v7 }
 0x141   : > { %3973 = vmatmul.mubr.msk.f32.gmra.mrb[16].mxu0 %vm467_vm0, %v5472_v22  ;;  %v4002_v22 = vld [vmem:[%s7743_s3 + $0x198] sm:$0xff] }
 0x142   : > { %1314 = vmatprep.mubr.f32.mxu0 %v7753_v7 }
 0x145   : > { %3974 = vmatmul.mubr.msk.f32.gmra.mrb[18].mxu0 %vm467_vm0, %v5478_v23  ;;  %v4462_v23 = vpack.c.bf16 %v4002_v22, %v4000_v21 }
 0x146   : > { %1320 = vmatprep.mubr.f32.mxu0 %v7753_v7 }
 0x147   : > { %4463 = vmatprep.subr.bf16.mxu1 %v4462_v23  ;;  %v4496_v23 = vpack.c.bf16 %v4033_v20, %v4031_v19 }
 0x149   : > { %3975 = vmatmul.mubr.msk.f32.gmra.mrb[20].mxu0 %vm467_vm0, %v5484_v24  ;;  %v3999_v24 = vld [vmem:[%s7743_s3 + $0x180] sm:$0xff] }
 0x14a   : > { %1326 = vmatprep.mubr.f32.mxu0 %v7753_v7 }
 0x14d   : > { %3976 = vmatmul.mubr.msk.f32.gmra.mrb[22].mxu0 %vm467_vm0, %v5490_v25  ;;  %v4001_v25 = vld [vmem:[%s7743_s3 + $0x190] sm:$0xff] }
 0x14e   : > { %1332 = vmatprep.mubr.f32.mxu0 %v7753_v7 }
 0x151   : > { %3977 = vmatmul.mubr.msk.f32.gmra.mrb[24].mxu0 %vm467_vm0, %v5496_v26  ;;  %v4464_v26 = vpack.c.bf16 %v4001_v25, %v3999_v24 }
 0x152   : > { %1338 = vmatprep.mubr.f32.mxu0 %v7753_v7 }
 0x153   : > { %4465 = vmatpush1.bf16.msra.mxu1 %v4464_v26  ;;  %v4036_v26 = vld [vmem:[%s7743_s3 + $0x2a8] sm:$0xff] }
 0x155   : > { %3978 = vmatmul.mubr.msk.f32.gmra.mrb[26].mxu0 %vm467_vm0, %v5502_v27  ;;  %v4004_v27 = vld [vmem:[%s7743_s3 + $0x1a8] sm:$0xff] }
 0x156   : > { %1344 = vmatprep.mubr.f32.mxu0 %v7753_v7 }
 0x159   : > { %3979 = vmatmul.mubr.msk.f32.gmra.mrb[28].mxu0 %vm467_vm0, %v5508_v28  ;;  %v4006_v28 = vld [vmem:[%s7743_s3 + $0x1b8] sm:$0xff] }
 0x15a   : > { %1350 = vmatprep.mubr.f32.mxu0 %v7753_v7 }
 0x15d   : > { %3980 = vmatmul.mubr.msk.f32.gmra.mrb[30].mxu0 %vm467_vm0, %v5514_v29  ;;  %v4466_v29 = vpack.c.bf16 %v4006_v28, %v4004_v27  ;;  %v4038_v27 = vld [vmem:[%s7743_s3 + $0x2b8] sm:$0x3f] }
 0x15e   : > { %1356 = vmatprep.mubr.f32.mxu0 %v7753_v7 }
 0x15f   : > { %4467 = vmatprep.subr.bf16.mxu1 %v4466_v29  ;;  %v4498_v29 = vpack.c.bf16 %v4038_v27, %v4036_v26 }
 0x161   : > { %3981 = vmatmul.mubr.msk.f32.gmra.mrb[32].mxu0 %vm467_vm0, %v5520_v30  ;;  %v4003_v30 = vld [vmem:[%s7743_s3 + $0x1a0] sm:$0xff] }
 0x162   : > { %1362 = vmatprep.mubr.f32.mxu0 %v7753_v7 }
 0x165   : > { %3982 = vmatmul.mubr.msk.f32.gmra.mrb[34].mxu0 %vm467_vm0, %v5526_v31  ;;  %v4005_v31 = vld [vmem:[%s7743_s3 + $0x1b0] sm:$0xff] }
 0x166   : > { %1368 = vmatprep.mubr.f32.mxu0 %v7753_v7 }
 0x169   : > { %3983 = vmatmul.mubr.msk.f32.gmra.mrb[36].mxu0 %vm467_vm0, %v5532_v32  ;;  %v4468_v32 = vpack.c.bf16 %v4005_v31, %v4003_v30 }
 0x16a   : > { %1374 = vmatprep.mubr.f32.mxu0 %v7753_v7 }
 0x16b   : > { %4469 = vmatpush1.bf16.msra.mxu1 %v4468_v32 }
 0x16d   : > { %3984 = vmatmul.mubr.msk.f32.gmra.mrb[38].mxu0 %vm467_vm0, %v5538_v33  ;;  %v4008_v33 = vld [vmem:[%s7743_s3 + $0x1c8] sm:$0xff] }
 0x16e   : > { %1380 = vmatprep.mubr.f32.mxu0 %v7753_v7 }
 0x171   : > { %3985 = vmatmul.mubr.msk.f32.gmra.mrb[40].mxu0 %vm467_vm0, %v5544_v34  ;;  %v4010_v34 = vld [vmem:[%s7743_s3 + $0x1d8] sm:$0xff] }
 0x172   : > { %1386 = vmatprep.mubr.f32.mxu0 %v7753_v7 }
 0x175   : > { %3986 = vmatmul.mubr.msk.f32.gmra.mrb[42].mxu0 %vm467_vm0, %v5550_v35  ;;  %v4470_v35 = vpack.c.bf16 %v4010_v34, %v4008_v33  ;;  %v4035_v33 = vld [vmem:[%s7743_s3 + $0x2a0] sm:$0xff]  ;;  %v4037_v34 = vld [vmem:[%s7743_s3 + $0x2b0] sm:$0x3f] }
 0x176   : > { %1392 = vmatprep.mubr.f32.mxu0 %v7753_v7 }
 0x177   : > { %4471 = vmatprep.subr.bf16.mxu1 %v4470_v35 }
 0x179   : > { %3987 = vmatmul.mubr.msk.f32.gmra.mrb[44].mxu0 %vm467_vm0, %v5556_v36  ;;  %v4007_v36 = vld [vmem:[%s7743_s3 + $0x1c0] sm:$0xff] }
 0x17a   : > { %1398 = vmatprep.mubr.f32.mxu0 %v7753_v7 }
 0x17d   : > { %3988 = vmatmul.mubr.msk.f32.gmra.mrb[46].mxu0 %vm467_vm0, %v5562_v37  ;;  %v4009_v37 = vld [vmem:[%s7743_s3 + $0x1d0] sm:$0xff] }
 0x17e   : > { %1404 = vmatprep.mubr.f32.mxu0 %v7753_v7 }
 0x181   : > { %3989 = vmatmul.mubr.msk.f32.gmra.mrb[48].mxu0 %vm467_vm0, %v5568_v38  ;;  %v4472_v38 = vpack.c.bf16 %v4009_v37, %v4007_v36 }
 0x182   : > { %1410 = vmatprep.mubr.f32.mxu0 %v7753_v7 }
 0x183   : > { %4473 = vmatpush1.bf16.msra.mxu1 %v4472_v38  ;;  %v4501_v38 = vpack.c.bf16 %v4037_v34, %v4035_v33 }
 0x185   : > { %3990 = vmatmul.mubr.msk.f32.gmra.mrb[50].mxu0 %vm467_vm0, %v5574_v39  ;;  %v4012_v39 = vld [vmem:[%s7743_s3 + $0x1e8] sm:$0xff] }
 0x186   : > { %1416 = vmatprep.mubr.f32.mxu0 %v7753_v7 }
 0x189   : > { %3991 = vmatmul.mubr.msk.f32.gmra.mrb[52].mxu0 %vm467_vm0, %v5580_v40  ;;  %v4014_v40 = vld [vmem:[%s7743_s3 + $0x1f8] sm:$0xff] }
 0x18a   : > { %1422 = vmatprep.mubr.f32.mxu0 %v7753_v7 }
 0x18d   : > { %3992 = vmatmul.mubr.msk.f32.gmra.mrb[54].mxu0 %vm467_vm0, %v5586_v41  ;;  %v4474_v41 = vpack.c.bf16 %v4014_v40, %v4012_v39 }
 0x18e   : > { %1428 = vmatprep.mubr.f32.mxu0 %v7753_v7 }
 0x18f   : > { %4475 = vmatprep.subr.bf16.mxu1 %v4474_v41 }
 0x191   : > { %3993 = vmatmul.mubr.msk.f32.gmra.mrb[56].mxu0 %vm467_vm0, %v5592_v42  ;;  %v4011_v42 = vld [vmem:[%s7743_s3 + $0x1e0] sm:$0xff] }
 0x192   : > { %1434 = vmatprep.mubr.f32.mxu0 %v7753_v7  ;;  %v4476_v45 = vpack.c.bf16 %v4013_v43, %v4011_v42 }
 0x194   : > { %4477 = vmatpush1.bf16.msra.mxu1 %v4476_v45 }
 0x195   : > { %3994 = vmatmul.mubr.msk.f32.gmra.mrb[58].mxu0 %vm467_vm0, %v1080_v51  ;;  %4479 = vmatprep.subr.bf16.mxu1 %v4478_v49 }
 0x198   : > { %4481 = vmatpush1.bf16.msra.mxu1 %v4480_v53  ;;  %v2014_v53 = vld [vmem:[%s7743_s3 + $0x18] sm:$0xff] }
 0x199   : > { %4483 = vmatprep.subr.bf16.mxu1 %v4482_v57  ;;  %v4504_v57 = vpack.c.bf16 %v2014_v53, %v2012_v52 }
 0x19c   : > { %4485 = vmatpush1.bf16.msra.mxu1 %v4484_v61 }
 0x19d   : > { %4487 = vmatprep.subr.bf16.mxu1 %v4486_v2 }
 0x1a0   : > { %4489 = vmatpush1.bf16.msra.mxu1 %v4488_v6 }
 0x1a1   : > { %4491 = vmatprep.subr.bf16.mxu1 %v4490_v12 }
 0x1a4   : > { %4493 = vmatpush1.bf16.msra.mxu1 %v4492_v18 }
 0x1a5   : > { %4495 = vmatprep.subr.bf16.mxu1 %v4494_v16 }
 0x1a8   : > { %4497 = vmatpush1.bf16.msra.mxu1 %v4496_v23 }
 0x1a9   : > { %4500 = vmatprep.subr.msk.bf16.mxu1 %vm5987_vm3, %v4498_v29 }
 0x1ac   : > { %4503 = vmatpush1.bf16.msk.msra.mxu1 %vm5987_vm3, %v4501_v38 }
 0x1ad   : > { %4505 = vmatprep.subr.bf16.mxu1 %v4504_v57 }
 0x1f4   : > { %v1262_v15 = vpop.f32.mrb[0].mxu0 }
 0x1f5   : > { %v1264_v51 = vpop.f32.mrb[1].mxu0  ;;  %v1513_v9 = vadd.f32 %v5953_v11, %v1262_v15 }
 0x1f6   : > { %v1514_v21 = vadd.f32 %v5963_v17, %v1264_v51 }
 0x1f7   : > { %v1573_v31 = vmax.f32 %v1513_v9, 0.0 }
 0x1f8   : > { %v1268_v22 = vpop.f32.mrb[2].mxu0  ;;  %v1574_v35 = vmax.f32 %v1514_v21, 0.0 }
 0x1f9   : > { %v1515_v24 = vadd.f32 %v5953_v11, %v1268_v22  ;;  %v1270_v25 = vpop.f32.mrb[3].mxu0 }
 0x1fa   : > { %v1516_v28 = vadd.f32 %v5963_v17, %v1270_v25 }
 0x1fb   : > { %v1575_v32 = vmax.f32 %v1515_v24, 0.0 }
 0x1fc   : > { %v1576_v36 = vmax.f32 %v1516_v28, 0.0  ;;  %v1274_v37 = vpop.f32.mrb[4].mxu0 }
 0x1fd   : > { %v5999_v39 = vmax.f32 %v1573_v31, %v1575_v32  ;;  %v1517_v40 = vadd.f32 %v5953_v11, %v1274_v37  ;;  %v1276_v41 = vpop.f32.mrb[5].mxu0 }
 0x1fe   : > { %v6002_v42 = vmax.f32 %v1574_v35, %v1576_v36  ;;  %v1518_v43 = vadd.f32 %v5963_v17, %v1276_v41 }
 0x1ff   : > { %v1577_v45 = vmax.f32 %v1517_v40, 0.0 }
 0x200   : > { %v1578_v46 = vmax.f32 %v1518_v43, 0.0  ;;  %v1280_v47 = vpop.f32.mrb[6].mxu0 }
 0x201   : > { %v6007_v48 = vmax.f32 %v1575_v32, %v1577_v45  ;;  %v1519_v49 = vadd.f32 %v5953_v11, %v1280_v47  ;;  %v1282_v50 = vpop.f32.mrb[7].mxu0 }
 0x202   : > { %v6016_v54 = vmax.f32 %v1576_v36, %v1578_v46  ;;  %v1520_v55 = vadd.f32 %v5963_v17, %v1282_v50 }
 0x203   : > { %v1579_v59 = vmax.f32 %v1519_v49, 0.0 }
 0x204   : > { %v1580_v60 = vmax.f32 %v1520_v55, 0.0  ;;  %v1286_v61 = vpop.f32.mrb[8].mxu0 }
 0x205   : > { %v1521_v62 = vadd.f32 %v5953_v11, %v1286_v61  ;;  %v1288_v63 = vpop.f32.mrb[9].mxu0  ;;  %v6020_v2 = vmax.f32 %v1577_v45, %v1579_v59 }
 0x206   : > { %v6022_v3 = vmax.f32 %v1578_v46, %v1580_v60  ;;  %v1522_v4 = vadd.f32 %v5963_v17, %v1288_v63 }
 0x207   : > { %v1581_v44 = vmax.f32 %v1521_v62, 0.0  ;;  %1757 = vrot.lane.b32.xlu0 %v6020_v2, %s5147_s14 }
 0x208   : > { %v1582_v6 = vmax.f32 %v1522_v4, 0.0  ;;  %v1292_v8 = vpop.f32.mrb[10].mxu0 }
 0x209   : > { %v1523_v10 = vadd.f32 %v5953_v11, %v1292_v8  ;;  %v1294_v12 = vpop.f32.mrb[11].mxu0  ;;  %v6028_v13 = vmax.f32 %v1579_v59, %v1581_v44 }
 0x20a   : > { %v6030_v14 = vmax.f32 %v1580_v60, %v1582_v6  ;;  %v1524_v15 = vadd.f32 %v5963_v17, %v1294_v12 }
 0x20b   : > { %v1583_v18 = vmax.f32 %v1523_v10, 0.0  ;;  %1759 = vrot.lane.b32.xlu0 %v6022_v3, %s5147_s14  ;;  %1761 = vrot.lane.b32.xlu1 %v6028_v13, %s5147_s14 }
 0x20c   : > { %v1584_v51 = vmax.f32 %v1524_v15, 0.0  ;;  %v1298_v58 = vpop.f32.mrb[12].mxu0 }
 0x20d   : > { %v6037_v1 = vmax.f32 %v1581_v44, %v1583_v18  ;;  %v1525_v9 = vadd.f32 %v5953_v11, %v1298_v58  ;;  %v1300_v16 = vpop.f32.mrb[13].mxu0 }
 0x20e   : > { %v6040_v19 = vmax.f32 %v1582_v6, %v1584_v51  ;;  %v1526_v20 = vadd.f32 %v5963_v17, %v1300_v16 }
 0x20f   : > { %v1585_v21 = vmax.f32 %v1525_v9, 0.0  ;;  %1763 = vrot.lane.b32.xlu1 %v6030_v14, %s5147_s14  ;;  %1765 = vrot.lane.b32.xlu0 %v6037_v1, %s5147_s14 }
 0x210   : > { %v1586_v22 = vmax.f32 %v1526_v20, 0.0  ;;  %v1304_v23 = vpop.f32.mrb[14].mxu0 }
 0x211   : > { %v6047_v24 = vmax.f32 %v1583_v18, %v1585_v21  ;;  %v1527_v25 = vadd.f32 %v5953_v11, %v1304_v23  ;;  %v1306_v26 = vpop.f32.mrb[15].mxu0 }
 0x212   : > { %v6050_v27 = vmax.f32 %v1584_v51, %v1586_v22  ;;  %v1528_v28 = vadd.f32 %v5963_v17, %v1306_v26 }
 0x213   : > { %v1587_v29 = vmax.f32 %v1527_v25, 0.0  ;;  %1767 = vrot.lane.b32.xlu1 %v6040_v19, %s5147_s14  ;;  %1769 = vrot.lane.b32.xlu0 %v6047_v24, %s5147_s14 }
 0x214   : > { %v1588_v31 = vmax.f32 %v1528_v28, 0.0  ;;  %v1310_v32 = vpop.f32.mrb[16].mxu0 }
 0x215   : > { %v6057_v33 = vmax.f32 %v1585_v21, %v1587_v29  ;;  %v1529_v34 = vadd.f32 %v5953_v11, %v1310_v32  ;;  %v1312_v35 = vpop.f32.mrb[17].mxu0 }
 0x216   : > { %v6060_v36 = vmax.f32 %v1586_v22, %v1588_v31  ;;  %v1530_v37 = vadd.f32 %v5963_v17, %v1312_v35 }
 0x217   : > { %v1589_v38 = vmax.f32 %v1529_v34, 0.0  ;;  %1771 = vrot.lane.b32.xlu1 %v6050_v27, %s5147_s14  ;;  %1773 = vrot.lane.b32.xlu0 %v6057_v33, %s5147_s14 }
 0x218   : > { %v1590_v40 = vmax.f32 %v1530_v37, 0.0  ;;  %v1316_v41 = vpop.f32.mrb[18].mxu0 }
 0x219   : > { %v6067_v43 = vmax.f32 %v1587_v29, %v1589_v38  ;;  %v1531_v45 = vadd.f32 %v5953_v11, %v1316_v41  ;;  %v1318_v46 = vpop.f32.mrb[19].mxu0 }
 0x21a   : > { %v6070_v47 = vmax.f32 %v1588_v31, %v1590_v40  ;;  %v1532_v49 = vadd.f32 %v5963_v17, %v1318_v46 }
 0x21b   : > { %v1591_v50 = vmax.f32 %v1531_v45, 0.0  ;;  %1775 = vrot.lane.b32.xlu1 %v6060_v36, %s5147_s14  ;;  %1777 = vrot.lane.b32.xlu0 %v6067_v43, %s5147_s14 }
 0x21c   : > { %v1592_v52 = vmax.f32 %v1532_v49, 0.0  ;;  %v1322_v53 = vpop.f32.mrb[20].mxu0 }
 0x21d   : > { %v6077_v55 = vmax.f32 %v1589_v38, %v1591_v50  ;;  %v1533_v57 = vadd.f32 %v5953_v11, %v1322_v53  ;;  %v1324_v59 = vpop.f32.mrb[21].mxu0 }
 0x21e   : > { %v6080_v60 = vmax.f32 %v1590_v40, %v1592_v52  ;;  %v1534_v61 = vadd.f32 %v5963_v17, %v1324_v59 }
 0x21f   : > { %v1593_v62 = vmax.f32 %v1533_v57, 0.0  ;;  %1779 = vrot.lane.b32.xlu1 %v6070_v47, %s5147_s14  ;;  %1781 = vrot.lane.b32.xlu0 %v6077_v55, %s5147_s14 }
 0x220   : > { %v1594_v63 = vmax.f32 %v1534_v61, 0.0  ;;  %v1328_v4 = vpop.f32.mrb[22].mxu0 }
 0x221   : > { %v6087_v44 = vmax.f32 %v1591_v50, %v1593_v62  ;;  %v1535_v6 = vadd.f32 %v5953_v11, %v1328_v4  ;;  %v1330_v8 = vpop.f32.mrb[23].mxu0 }
 0x222   : > { %v6090_v10 = vmax.f32 %v1592_v52, %v1594_v63  ;;  %v1536_v12 = vadd.f32 %v5963_v17, %v1330_v8 }
 0x223   : > { %v1595_v15 = vmax.f32 %v1535_v6, 0.0  ;;  %1783 = vrot.lane.b32.xlu1 %v6080_v60, %s5147_s14  ;;  %1785 = vrot.lane.b32.xlu0 %v6087_v44, %s5147_s14 }
 0x224   : > { %v1596_v18 = vmax.f32 %v1536_v12, 0.0  ;;  %v1334_v51 = vpop.f32.mrb[24].mxu0 }
 0x225   : > { %v6097_v58 = vmax.f32 %v1593_v62, %v1595_v15  ;;  %v1537_v9 = vadd.f32 %v5953_v11, %v1334_v51  ;;  %v1336_v16 = vpop.f32.mrb[25].mxu0 }
 0x226   : > { %v6100_v20 = vmax.f32 %v1594_v63, %v1596_v18  ;;  %v1538_v21 = vadd.f32 %v5963_v17, %v1336_v16 }
 0x227   : > { %v1597_v22 = vmax.f32 %v1537_v9, 0.0  ;;  %1787 = vrot.lane.b32.xlu1 %v6090_v10, %s5147_s14  ;;  %1789 = vrot.lane.b32.xlu0 %v6097_v58, %s5147_s14 }
 0x228   : > { %v1598_v23 = vmax.f32 %v1538_v21, 0.0  ;;  %v1340_v25 = vpop.f32.mrb[26].mxu0 }
 0x229   : > { %v6107_v26 = vmax.f32 %v1595_v15, %v1597_v22  ;;  %v1539_v28 = vadd.f32 %v5953_v11, %v1340_v25  ;;  %v1342_v29 = vpop.f32.mrb[27].mxu0 }
 0x22a   : > { %v6110_v31 = vmax.f32 %v1596_v18, %v1598_v23  ;;  %v1540_v32 = vadd.f32 %v5963_v17, %v1342_v29 }
 0x22b   : > { %v1599_v34 = vmax.f32 %v1539_v28, 0.0  ;;  %1791 = vrot.lane.b32.xlu1 %v6100_v20, %s5147_s14  ;;  %1793 = vrot.lane.b32.xlu0 %v6107_v26, %s5147_s14 }
 0x22c   : > { %v1600_v35 = vmax.f32 %v1540_v32, 0.0  ;;  %v1346_v37 = vpop.f32.mrb[28].mxu0 }
 0x22d   : > { %v6117_v38 = vmax.f32 %v1597_v22, %v1599_v34  ;;  %v1541_v40 = vadd.f32 %v5953_v11, %v1346_v37  ;;  %v1348_v41 = vpop.f32.mrb[29].mxu0 }
 0x22e   : > { %v6120_v45 = vmax.f32 %v1598_v23, %v1600_v35  ;;  %v1542_v46 = vadd.f32 %v5963_v17, %v1348_v41 }
 0x22f   : > { %v1601_v49 = vmax.f32 %v1541_v40, 0.0  ;;  %1795 = vrot.lane.b32.xlu1 %v6110_v31, %s5147_s14  ;;  %1797 = vrot.lane.b32.xlu0 %v6117_v38, %s5147_s14 }
 0x230   : > { %v1602_v50 = vmax.f32 %v1542_v46, 0.0  ;;  %v1352_v52 = vpop.f32.mrb[30].mxu0 }
 0x231   : > { %v6127_v53 = vmax.f32 %v1599_v34, %v1601_v49  ;;  %v1543_v57 = vadd.f32 %v5953_v11, %v1352_v52  ;;  %v1354_v59 = vpop.f32.mrb[31].mxu0 }
 0x232   : > { %v6130_v61 = vmax.f32 %v1600_v35, %v1602_v50  ;;  %v1544_v62 = vadd.f32 %v5963_v17, %v1354_v59 }
 0x233   : > { %v1603_v63 = vmax.f32 %v1543_v57, 0.0  ;;  %1799 = vrot.lane.b32.xlu1 %v6120_v45, %s5147_s14  ;;  %1801 = vrot.lane.b32.xlu0 %v6127_v53, %s5147_s14 }
 0x234   : > { %v1604_v4 = vmax.f32 %v1544_v62, 0.0  ;;  %v1358_v6 = vpop.f32.mrb[32].mxu0 }
 0x235   : > { %v6137_v8 = vmax.f32 %v1601_v49, %v1603_v63  ;;  %v1545_v12 = vadd.f32 %v5953_v11, %v1358_v6  ;;  %v1360_v15 = vpop.f32.mrb[33].mxu0 }
 0x236   : > { %v6140_v18 = vmax.f32 %v1602_v50, %v1604_v4  ;;  %v1546_v51 = vadd.f32 %v5963_v17, %v1360_v15 }
 0x237   : > { %v1605_v9 = vmax.f32 %v1545_v12, 0.0  ;;  %1803 = vrot.lane.b32.xlu1 %v6130_v61, %s5147_s14  ;;  %1805 = vrot.lane.b32.xlu0 %v6137_v8, %s5147_s14 }
 0x238   : > { %v1606_v16 = vmax.f32 %v1546_v51, 0.0  ;;  %v1364_v21 = vpop.f32.mrb[34].mxu0 }
 0x239   : > { %v6147_v22 = vmax.f32 %v1603_v63, %v1605_v9  ;;  %v1547_v23 = vadd.f32 %v5953_v11, %v1364_v21  ;;  %v1366_v25 = vpop.f32.mrb[35].mxu0 }
 0x23a   : > { %v6150_v28 = vmax.f32 %v1604_v4, %v1606_v16  ;;  %v1548_v29 = vadd.f32 %v5963_v17, %v1366_v25 }
 0x23b   : > { %v1607_v32 = vmax.f32 %v1547_v23, 0.0  ;;  %1807 = vrot.lane.b32.xlu1 %v6140_v18, %s5147_s14  ;;  %1809 = vrot.lane.b32.xlu0 %v6147_v22, %s5147_s14 }
 0x23c   : > { %v1608_v34 = vmax.f32 %v1548_v29, 0.0  ;;  %v1370_v35 = vpop.f32.mrb[36].mxu0 }
 0x23d   : > { %v6157_v37 = vmax.f32 %v1605_v9, %v1607_v32  ;;  %v1549_v40 = vadd.f32 %v5953_v11, %v1370_v35  ;;  %v1372_v41 = vpop.f32.mrb[37].mxu0 }
 0x23e   : > { %v6160_v46 = vmax.f32 %v1606_v16, %v1608_v34  ;;  %v1550_v49 = vadd.f32 %v5963_v17, %v1372_v41 }
 0x23f   : > { %v1609_v50 = vmax.f32 %v1549_v40, 0.0  ;;  %1811 = vrot.lane.b32.xlu1 %v6150_v28, %s5147_s14  ;;  %1813 = vrot.lane.b32.xlu0 %v6157_v37, %s5147_s14 }
 0x240   : > { %v1610_v52 = vmax.f32 %v1550_v49, 0.0  ;;  %v1376_v57 = vpop.f32.mrb[38].mxu0 }
 0x241   : > { %v6167_v59 = vmax.f32 %v1607_v32, %v1609_v50  ;;  %v1551_v62 = vadd.f32 %v5953_v11, %v1376_v57  ;;  %v1378_v63 = vpop.f32.mrb[39].mxu0 }
 0x242   : > { %v6170_v4 = vmax.f32 %v1608_v34, %v1610_v52  ;;  %v1552_v6 = vadd.f32 %v5963_v17, %v1378_v63 }
 0x243   : > { %v1611_v12 = vmax.f32 %v1551_v62, 0.0  ;;  %1815 = vrot.lane.b32.xlu1 %v6160_v46, %s5147_s14  ;;  %1817 = vrot.lane.b32.xlu0 %v6167_v59, %s5147_s14 }
 0x244   : > { %v1612_v15 = vmax.f32 %v1552_v6, 0.0  ;;  %v1382_v51 = vpop.f32.mrb[40].mxu0 }
 0x245   : > { %v6177_v9 = vmax.f32 %v1609_v50, %v1611_v12  ;;  %v1553_v16 = vadd.f32 %v5953_v11, %v1382_v51  ;;  %v1384_v21 = vpop.f32.mrb[41].mxu0 }
 0x246   : > { %v6180_v23 = vmax.f32 %v1610_v52, %v1612_v15  ;;  %v1554_v25 = vadd.f32 %v5963_v17, %v1384_v21 }
 0x247   : > { %v1613_v29 = vmax.f32 %v1553_v16, 0.0  ;;  %1819 = vrot.lane.b32.xlu1 %v6170_v4, %s5147_s14  ;;  %1821 = vrot.lane.b32.xlu0 %v6177_v9, %s5147_s14 }
 0x248   : > { %v1614_v32 = vmax.f32 %v1554_v25, 0.0  ;;  %v1388_v34 = vpop.f32.mrb[42].mxu0 }
 0x249   : > { %v6187_v35 = vmax.f32 %v1611_v12, %v1613_v29  ;;  %v1555_v40 = vadd.f32 %v5953_v11, %v1388_v34  ;;  %v1390_v41 = vpop.f32.mrb[43].mxu0 }
 0x24a   : > { %v6190_v49 = vmax.f32 %v1612_v15, %v1614_v32  ;;  %v1556_v50 = vadd.f32 %v5963_v17, %v1390_v41 }
 0x24b   : > { %v1615_v52 = vmax.f32 %v1555_v40, 0.0  ;;  %1823 = vrot.lane.b32.xlu1 %v6180_v23, %s5147_s14  ;;  %1825 = vrot.lane.b32.xlu0 %v6187_v35, %s5147_s14 }
 0x24c   : > { %v1616_v57 = vmax.f32 %v1556_v50, 0.0  ;;  %v1394_v62 = vpop.f32.mrb[44].mxu0 }
 0x24d   : > { %v6197_v63 = vmax.f32 %v1613_v29, %v1615_v52  ;;  %v1557_v6 = vadd.f32 %v5953_v11, %v1394_v62  ;;  %v1396_v12 = vpop.f32.mrb[45].mxu0 }
 0x24e   : > { %v6200_v51 = vmax.f32 %v1614_v32, %v1616_v57  ;;  %v1558_v15 = vadd.f32 %v5963_v17, %v1396_v12 }
 0x24f   : > { %v1617_v16 = vmax.f32 %v1557_v6, 0.0  ;;  %1827 = vrot.lane.b32.xlu1 %v6190_v49, %s5147_s14  ;;  %1829 = vrot.lane.b32.xlu0 %v6197_v63, %s5147_s14 }
 0x250   : > { %v1618_v21 = vmax.f32 %v1558_v15, 0.0  ;;  %v1400_v25 = vpop.f32.mrb[46].mxu0 }
 0x251   : > { %v6207_v34 = vmax.f32 %v1615_v52, %v1617_v16  ;;  %v1559_v29 = vadd.f32 %v5953_v11, %v1400_v25  ;;  %v1402_v40 = vpop.f32.mrb[47].mxu0 }
 0x252   : > { %v6210_v41 = vmax.f32 %v1616_v57, %v1618_v21  ;;  %v1560_v32 = vadd.f32 %v5963_v17, %v1402_v40 }
 0x253   : > { %v1619_v50 = vmax.f32 %v1559_v29, 0.0  ;;  %1831 = vrot.lane.b32.xlu1 %v6200_v51, %s5147_s14  ;;  %1833 = vrot.lane.b32.xlu0 %v6207_v34, %s5147_s14 }
 0x254   : > { %v1620_v62 = vmax.f32 %v1560_v32, 0.0  ;;  %v1406_v6 = vpop.f32.mrb[48].mxu0 }
 0x255   : > { %v6217_v12 = vmax.f32 %v1617_v16, %v1619_v50  ;;  %v1561_v52 = vadd.f32 %v5953_v11, %v1406_v6  ;;  %v1408_v15 = vpop.f32.mrb[49].mxu0 }
 0x256   : > { %v6220_v25 = vmax.f32 %v1618_v21, %v1620_v62  ;;  %v1562_v57 = vadd.f32 %v5963_v17, %v1408_v15 }
 0x257   : > { %7785 = vst [vmem:[#allocation8_spill] sm:$0xff] %v6217_v12  ;;  %v1621_v7 = vmax.f32 %v1561_v52, 0.0  ;;  %1835 = vrot.lane.b32.xlu1 %v6210_v41, %s5147_s14  ;;  %1837 = vrot.lane.b32.xlu0 %v6217_v12, %s5147_s14 }
 0x258   : > { %7786 = vst [vmem:[#allocation9_spill] sm:$0xff] %v6220_v25  ;;  %v1622_v29 = vmax.f32 %v1562_v57, 0.0  ;;  %v1412_v40 = vpop.f32.mrb[50].mxu0 }
 0x259   : > { %v6227_v32 = vmax.f32 %v1619_v50, %v1621_v7  ;;  %v1563_v16 = vadd.f32 %v5953_v11, %v1412_v40  ;;  %v1414_v5 = vpop.f32.mrb[51].mxu0 }
 0x25a   : > { %v6230_v6 = vmax.f32 %v1620_v62, %v1622_v29  ;;  %v1564_v21 = vadd.f32 %v5963_v17, %v1414_v5 }
 0x25b   : > { %7787 = vst [vmem:[#allocation10_spill] sm:$0xff] %v6227_v32  ;;  %v1623_v0 = vmax.f32 %v1563_v16, 0.0  ;;  %1839 = vrot.lane.b32.xlu1 %v6220_v25, %s5147_s14  ;;  %1841 = vrot.lane.b32.xlu0 %v6227_v32, %s5147_s14 }
 0x25c   : > { %7788 = vst [vmem:[#allocation11_spill] sm:$0xff] %v6230_v6  ;;  %v1624_v52 = vmax.f32 %v1564_v21, 0.0  ;;  %v1418_v15 = vpop.f32.mrb[52].mxu0 }
 0x25d   : > { %v6237_v57 = vmax.f32 %v1621_v7, %v1623_v0  ;;  %v1565_v50 = vadd.f32 %v5953_v11, %v1418_v15  ;;  %v1420_v56 = vpop.f32.mrb[53].mxu0 }
 0x25e   : > { %v6240_v40 = vmax.f32 %v1622_v29, %v1624_v52  ;;  %v1566_v62 = vadd.f32 %v5963_v17, %v1420_v56 }
 0x25f   : > { %7789 = vst [vmem:[#allocation12_spill] sm:$0xff] %v6237_v57  ;;  %v1625_v12 = vmax.f32 %v1565_v50, 0.0  ;;  %1843 = vrot.lane.b32.xlu1 %v6230_v6, %s5147_s14  ;;  %1845 = vrot.lane.b32.xlu0 %v6237_v57, %s5147_s14 }
 0x260   : > { %7790 = vst [vmem:[#allocation13_spill] sm:$0xff] %v6240_v40  ;;  %v1626_v5 = vmax.f32 %v1566_v62, 0.0  ;;  %v1424_v16 = vpop.f32.mrb[54].mxu0 }
 0x261   : > { %v6247_v21 = vmax.f32 %v1623_v0, %v1625_v12  ;;  %v1567_v7 = vadd.f32 %v5953_v11, %v1424_v16  ;;  %v1426_v32 = vpop.f32.mrb[55].mxu0 }
 0x262   : > { %v6250_v15 = vmax.f32 %v1624_v52, %v1626_v5  ;;  %v1568_v29 = vadd.f32 %v5963_v17, %v1426_v32 }
 0x263   : > { %7791 = vst [vmem:[#allocation14_spill] sm:$0xff] %v6247_v21  ;;  %v1627_v25 = vmax.f32 %v1567_v7, 0.0  ;;  %1847 = vrot.lane.b32.xlu1 %v6240_v40, %s5147_s14  ;;  %1849 = vrot.lane.b32.xlu0 %v6247_v21, %s5147_s14 }
 0x264   : > { %v1628_v56 = vmax.f32 %v1568_v29, 0.0  ;;  %v1430_v50 = vpop.f32.mrb[56].mxu0 }
 0x265   : > { %v6257_v62 = vmax.f32 %v1625_v12, %v1627_v25  ;;  %v1569_v0 = vadd.f32 %v5953_v11, %v1430_v50  ;;  %v1432_v57 = vpop.f32.mrb[57].mxu0 }
 0x266   : > { %v6260_v16 = vmax.f32 %v1626_v5, %v1628_v56  ;;  %v1570_v52 = vadd.f32 %v5963_v17, %v1432_v57 }
 0x267   : > { %v1629_v6 = vmax.f32 %v1569_v0, 0.0  ;;  %1851 = vrot.lane.b32.xlu1 %v6250_v15, %s5147_s14  ;;  %1853 = vrot.lane.b32.xlu0 %v6257_v62, %s5147_s14 }
 0x268   : > { %v1630_v32 = vmax.f32 %v1570_v52, 0.0  ;;  %v1436_v7 = vpop.f32.mrb[58].mxu0 }
 0x269   : > { %v6267_v29 = vmax.f32 %v1627_v25, %v1629_v6  ;;  %v1571_v12 = vadd.f32 %v5953_v11, %v1436_v7  ;;  %v1438_v21 = vpop.f32.mrb[59].mxu0  ;;  %v2011_v25 = vld [vmem:[%s7743_s3] sm:$0xff] }
 0x26a   : > { %v6270_v50 = vmax.f32 %v1628_v56, %v1630_v32  ;;  %v1572_v5 = vadd.f32 %v5963_v17, %v1438_v21  ;;  %v2018_v21 = vld [vmem:[%s7743_s3 + $0x38] sm:$0xff] }
 0x26b   : > { %7792 = vst [vmem:[#allocation15_spill] sm:$0xff] %v6267_v29  ;;  %v1631_v40 = vmax.f32 %v1571_v12, 0.0  ;;  %1749 = vrot.lane.b32.xlu0 %v5999_v39, %s5147_s14  ;;  %1855 = vrot.lane.b32.xlu1 %v6260_v16, %s5147_s14 }
 0x26c   : > { %7793 = vst [vmem:[#allocation16_spill] sm:$0xff] %v6270_v50  ;;  %v1632_v57 = vmax.f32 %v1572_v5, 0.0 }
 0x26d   : > { %v6277_v0 = vmax.f32 %v1629_v6, %v1631_v40  ;;  %v2013_v6 = vld [vmem:[%s7743_s3 + $0x10] sm:$0xff]  ;;  %v2016_v40 = vld [vmem:[%s7743_s3 + $0x28] sm:$0xff] }
 0x26e   : > { %v6279_v52 = vmax.f32 %v1630_v32, %v1632_v57  ;;  %v4506_v5 = vpack.c.bf16 %v2013_v6, %v2011_v25 }
 0x26f   : > { %7794 = vst [vmem:[#allocation17_spill] sm:$0xff] %v6277_v0  ;;  %1753 = vrot.lane.b32.xlu0 %v6007_v48, %s5147_s14  ;;  %1751 = vrot.lane.b32.xlu1 %v6002_v42, %s5147_s14  ;;  %v5061_v11 = vpack.i.bf16 %v6277_v0, %v6267_v29  ;;  %v2015_v0 = vld [vmem:[%s7743_s3 + $0x20] sm:$0xff] }
 0x270   : > { %7795 = vst [vmem:[#allocation18_spill] sm:$0xff] %v6279_v52  ;;  %v2019_v29 = vld [vmem:[%s7743_s3 + $0x40] sm:$0xff] }
 0x273   : > { %1755 = vrot.lane.b32.xlu1 %v6016_v54, %s5147_s14  ;;  %5062 = vrot.lane.b32.xlu0 %v5061_v11, %s5147_s14  ;;  %v4508_v11 = vpack.c.bf16 %v2018_v21, %v2016_v40 }
 0x277   : > { %1859 = vrot.lane.b32.xlu1 %v6270_v50, %s5147_s14  ;;  %1863 = vrot.lane.b32.xlu0 %v6279_v52, %s5147_s14  ;;  %v2017_v52 = vld [vmem:[%s7743_s3 + $0x30] sm:$0xff] }
 0x278   : > { %v4510_v21 = vpack.c.bf16 %v2017_v52, %v2015_v0  ;;  %v2021_v50 = vld [vmem:[%s7743_s3 + $0x50] sm:$0xff] }
 0x279   : > { %v1758_v17 = vpop.permute.xlu0 %1757 }
 0x27d   : > { %v1760_v56 = vpop.permute.xlu0 %1759  ;;  %v1762_v32 = vpop.permute.xlu1 %1761 }
 0x27e   : > { %v1868_v7 = vsel %vm1865_vm4, %v1758_v17, %v1760_v56  ;;  %v6308_v12 = vmax.f32 %v6022_v3, %v1760_v56  ;;  %v2020_v3 = vld [vmem:[%s7743_s3 + $0x48] sm:$0xff] }
 0x27f   : > { %v6311_v57 = vmax.f32 %v6020_v2, %v1868_v7  ;;  %v2022_v2 = vld [vmem:[%s7743_s3 + $0x58] sm:$0xff] }
 0x280   : > { %4041 = vmatprep.mubr.msk.f32.mxu1 %vm2100_vm5, %v6308_v12  ;;  %v4512_v7 = vpack.c.bf16 %v2022_v2, %v2020_v3 }
 0x281   : > { %2248 = vmatmul.mubr.f32.vlgmr.msra.gmra.mrb[0].mxu1 %v6311_v57  ;;  %v1764_v17 = vpop.permute.xlu1 %1763  ;;  %v1766_v25 = vpop.permute.xlu0 %1765 }
 0x282   : > { %v1869_v6 = vsel %vm1865_vm4, %v1762_v32, %v1764_v17  ;;  %v6330_v40 = vmax.f32 %v6030_v14, %v1764_v17  ;;  %4507 = vmatpush1.bf16.msra.mxu1 %v4506_v5  ;;  %v2024_v14 = vld [vmem:[%s7743_s3 + $0x68] sm:$0xff]  ;;  %v2023_v17 = vld [vmem:[%s7743_s3 + $0x60] sm:$0xff] }
 0x283   : > { %v6333_v56 = vmax.f32 %v6028_v13, %v1869_v6  ;;  %4509 = vmatprep.subr.bf16.mxu1 %v4508_v11  ;;  %v2026_v13 = vld [vmem:[%s7743_s3 + $0x78] sm:$0xff]  ;;  %v4514_v11 = vpack.c.bf16 %v2021_v50, %v2019_v29  ;;  %v2025_v6 = vld [vmem:[%s7743_s3 + $0x70] sm:$0xff] }
 0x284   : > { %4042 = vmatprep.mubr.msk.f32.mxu1 %vm2100_vm5, %v6330_v40  ;;  %v4516_v2 = vpack.c.bf16 %v2026_v13, %v2024_v14 }
 0x285   : > { %2254 = vmatmul.mubr.f32.gmra.mrb[2].mxu1 %v6333_v56  ;;  %v1768_v0 = vpop.permute.xlu1 %1767  ;;  %v1770_v52 = vpop.permute.xlu0 %1769 }
 0x286   : > { %v1870_v32 = vsel %vm1865_vm4, %v1766_v25, %v1768_v0  ;;  %v6352_v5 = vmax.f32 %v6040_v19, %v1768_v0  ;;  %4511 = vmatpush1.bf16.msra.mxu1 %v4510_v21  ;;  %v2028_v19 = vld [vmem:[%s7743_s3 + $0x88] sm:$0xff]  ;;  %v2027_v0 = vld [vmem:[%s7743_s3 + $0x80] sm:$0xff] }
 0x287   : > { %v6355_v3 = vmax.f32 %v6037_v1, %v1870_v32  ;;  %4513 = vmatprep.subr.bf16.mxu1 %v4512_v7  ;;  %v2030_v1 = vld [vmem:[%s7743_s3 + $0x98] sm:$0xff]  ;;  %v4518_v7 = vpack.c.bf16 %v2025_v6, %v2023_v17  ;;  %v2029_v32 = vld [vmem:[%s7743_s3 + $0x90] sm:$0xff] }
 0x288   : > { %4043 = vmatprep.mubr.msk.f32.mxu1 %vm2100_vm5, %v6352_v5  ;;  %v4520_v13 = vpack.c.bf16 %v2030_v1, %v2028_v19  ;;  %v4522_v6 = vpack.c.bf16 %v2029_v32, %v2027_v0 }
 0x289   : > { %2258 = vmatmul.mubr.f32.gmra.mrb[4].mxu1 %v6355_v3  ;;  %v1772_v29 = vpop.permute.xlu1 %1771  ;;  %v1774_v50 = vpop.permute.xlu0 %1773 }
 0x28a   : > { %v1871_v25 = vsel %vm1865_vm4, %v1770_v52, %v1772_v29  ;;  %v6374_v21 = vmax.f32 %v6050_v27, %v1772_v29  ;;  %4515 = vmatpush1.bf16.msra.mxu1 %v4514_v11  ;;  %v2032_v27 = vld [vmem:[%s7743_s3 + $0xa8] sm:$0xff]  ;;  %v2031_v29 = vld [vmem:[%s7743_s3 + $0xa0] sm:$0xff] }
 0x28b   : > { %v6377_v14 = vmax.f32 %v6047_v24, %v1871_v25  ;;  %4517 = vmatprep.subr.bf16.mxu1 %v4516_v2  ;;  %v2034_v24 = vld [vmem:[%s7743_s3 + $0xb8] sm:$0xff]  ;;  %v2033_v25 = vld [vmem:[%s7743_s3 + $0xb0] sm:$0xff] }
 0x28c   : > { %4044 = vmatprep.mubr.msk.f32.mxu1 %vm2100_vm5, %v6374_v21  ;;  %v4524_v1 = vpack.c.bf16 %v2034_v24, %v2032_v27  ;;  %v4526_v32 = vpack.c.bf16 %v2033_v25, %v2031_v29 }
 0x28d   : > { %2264 = vmatmul.mubr.f32.gmra.mrb[6].mxu1 %v6377_v14  ;;  %v1776_v52 = vpop.permute.xlu1 %1775  ;;  %v1778_v11 = vpop.permute.xlu0 %1777 }
 0x28e   : > { %v1872_v2 = vsel %vm1865_vm4, %v1774_v50, %v1776_v52  ;;  %v6396_v17 = vmax.f32 %v6060_v36, %v1776_v52  ;;  %4519 = vmatpush1.bf16.msra.mxu1 %v4518_v7  ;;  %v2036_v36 = vld [vmem:[%s7743_s3 + $0xc8] sm:$0xff]  ;;  %v2035_v52 = vld [vmem:[%s7743_s3 + $0xc0] sm:$0xff] }
 0x28f   : > { %v6399_v19 = vmax.f32 %v6057_v33, %v1872_v2  ;;  %4521 = vmatprep.subr.bf16.mxu1 %v4520_v13  ;;  %v2038_v33 = vld [vmem:[%s7743_s3 + $0xd8] sm:$0xff]  ;;  %v2037_v2 = vld [vmem:[%s7743_s3 + $0xd0] sm:$0xff] }
 0x290   : > { %4045 = vmatprep.mubr.msk.f32.mxu1 %vm2100_vm5, %v6396_v17  ;;  %v4528_v24 = vpack.c.bf16 %v2038_v33, %v2036_v36  ;;  %v4530_v25 = vpack.c.bf16 %v2037_v2, %v2035_v52 }
 0x291   : > { %2268 = vmatmul.mubr.f32.gmra.mrb[8].mxu1 %v6399_v19  ;;  %v1780_v50 = vpop.permute.xlu1 %1779  ;;  %v1782_v7 = vpop.permute.xlu0 %1781 }
 0x292   : > { %v1873_v13 = vsel %vm1865_vm4, %v1778_v11, %v1780_v50  ;;  %v6418_v0 = vmax.f32 %v6070_v47, %v1780_v50  ;;  %4523 = vmatpush1.bf16.msra.mxu1 %v4522_v6  ;;  %v2040_v47 = vld [vmem:[%s7743_s3 + $0xe8] sm:$0xff]  ;;  %v2039_v50 = vld [vmem:[%s7743_s3 + $0xe0] sm:$0xff] }
 0x293   : > { %v6421_v27 = vmax.f32 %v6067_v43, %v1873_v13  ;;  %4525 = vmatprep.subr.bf16.mxu1 %v4524_v1  ;;  %v2042_v43 = vld [vmem:[%s7743_s3 + $0xf8] sm:$0xff]  ;;  %v2041_v13 = vld [vmem:[%s7743_s3 + $0xf0] sm:$0xff] }
 0x294   : > { %4046 = vmatprep.mubr.msk.f32.mxu1 %vm2100_vm5, %v6418_v0  ;;  %v4532_v33 = vpack.c.bf16 %v2042_v43, %v2040_v47  ;;  %v4534_v2 = vpack.c.bf16 %v2041_v13, %v2039_v50 }
 0x295   : > { %2274 = vmatmul.mubr.f32.gmra.mrb[10].mxu1 %v6421_v27  ;;  %v1784_v11 = vpop.permute.xlu1 %1783  ;;  %v1786_v6 = vpop.permute.xlu0 %1785 }
 0x296   : > { %v1874_v1 = vsel %vm1865_vm4, %v1782_v7, %v1784_v11  ;;  %v6440_v29 = vmax.f32 %v6080_v60, %v1784_v11  ;;  %4527 = vmatpush1.bf16.msra.mxu1 %v4526_v32  ;;  %v2044_v60 = vld [vmem:[%s7743_s3 + $0x108] sm:$0xff]  ;;  %v2043_v11 = vld [vmem:[%s7743_s3 + $0x100] sm:$0xff] }
 0x297   : > { %v6443_v36 = vmax.f32 %v6077_v55, %v1874_v1  ;;  %4529 = vmatprep.subr.bf16.mxu1 %v4528_v24  ;;  %v2046_v55 = vld [vmem:[%s7743_s3 + $0x118] sm:$0xff]  ;;  %v2045_v1 = vld [vmem:[%s7743_s3 + $0x110] sm:$0xff] }
 0x298   : > { %4047 = vmatprep.mubr.msk.f32.mxu1 %vm2100_vm5, %v6440_v29  ;;  %v4536_v43 = vpack.c.bf16 %v2046_v55, %v2044_v60  ;;  %v4538_v13 = vpack.c.bf16 %v2045_v1, %v2043_v11 }
 0x299   : > { %2278 = vmatmul.mubr.f32.gmra.mrb[12].mxu1 %v6443_v36  ;;  %v1788_v7 = vpop.permute.xlu1 %1787  ;;  %v1790_v32 = vpop.permute.xlu0 %1789 }
 0x29a   : > { %v1875_v24 = vsel %vm1865_vm4, %v1786_v6, %v1788_v7  ;;  %v6462_v52 = vmax.f32 %v6090_v10, %v1788_v7  ;;  %4531 = vmatpush1.bf16.msra.mxu1 %v4530_v25  ;;  %v2048_v10 = vld [vmem:[%s7743_s3 + $0x128] sm:$0xff]  ;;  %v2047_v7 = vld [vmem:[%s7743_s3 + $0x120] sm:$0xff] }
 0x29b   : > { %v6465_v47 = vmax.f32 %v6087_v44, %v1875_v24  ;;  %4533 = vmatprep.subr.bf16.mxu1 %v4532_v33  ;;  %v2050_v44 = vld [vmem:[%s7743_s3 + $0x138] sm:$0xff]  ;;  %v2049_v24 = vld [vmem:[%s7743_s3 + $0x130] sm:$0xff] }
 0x29c   : > { %4048 = vmatprep.mubr.msk.f32.mxu1 %vm2100_vm5, %v6462_v52  ;;  %v4540_v55 = vpack.c.bf16 %v2050_v44, %v2048_v10  ;;  %v4542_v1 = vpack.c.bf16 %v2049_v24, %v2047_v7 }
 0x29d   : > { %2284 = vmatmul.mubr.f32.gmra.mrb[14].mxu1 %v6465_v47  ;;  %v1792_v6 = vpop.permute.xlu1 %1791  ;;  %v1794_v25 = vpop.permute.xlu0 %1793 }
 0x29e   : > { %v1876_v33 = vsel %vm1865_vm4, %v1790_v32, %v1792_v6  ;;  %v6484_v50 = vmax.f32 %v6100_v20, %v1792_v6  ;;  %4535 = vmatpush1.bf16.msra.mxu1 %v4534_v2  ;;  %v2052_v20 = vld [vmem:[%s7743_s3 + $0x148] sm:$0xff]  ;;  %v2051_v6 = vld [vmem:[%s7743_s3 + $0x140] sm:$0xff] }
 0x29f   : > { %v6487_v60 = vmax.f32 %v6097_v58, %v1876_v33  ;;  %4537 = vmatprep.subr.bf16.mxu1 %v4536_v43  ;;  %v2054_v58 = vld [vmem:[%s7743_s3 + $0x158] sm:$0x3f]  ;;  %v2053_v33 = vld [vmem:[%s7743_s3 + $0x150] sm:$0x3f] }
 0x2a0   : > { %4049 = vmatprep.mubr.msk.f32.mxu1 %vm2100_vm5, %v6484_v50  ;;  %v4544_v44 = vpack.c.bf16 %v2054_v58, %v2052_v20  ;;  %v4547_v24 = vpack.c.bf16 %v2053_v33, %v2051_v6 }
 0x2a1   : > { %2288 = vmatmul.mubr.f32.gmra.mrb[16].mxu1 %v6487_v60  ;;  %v1796_v32 = vpop.permute.xlu1 %1795  ;;  %v1798_v2 = vpop.permute.xlu0 %1797 }
 0x2a2   : > { %v1877_v43 = vsel %vm1865_vm4, %v1794_v25, %v1796_v32  ;;  %v6506_v11 = vmax.f32 %v6110_v31, %v1796_v32  ;;  %4539 = vmatpush1.bf16.msra.mxu1 %v4538_v13  ;;  %v4094_v31 = vld [vmem:[%s7743_s3 + $0x2c8] sm:$0xff] }
 0x2a3   : > { %v6509_v10 = vmax.f32 %v6107_v26, %v1877_v43  ;;  %4541 = vmatprep.subr.bf16.mxu1 %v4540_v55  ;;  %v4096_v26 = vld [vmem:[%s7743_s3 + $0x2d8] sm:$0xff] }
 0x2a4   : > { %4050 = vmatprep.mubr.msk.f32.mxu1 %vm2100_vm5, %v6506_v11  ;;  %v4550_v58 = vpack.c.bf16 %v4096_v26, %v4094_v31 }
 0x2a5   : > { %2294 = vmatmul.mubr.f32.gmra.mrb[18].mxu1 %v6509_v10  ;;  %v1800_v25 = vpop.permute.xlu1 %1799  ;;  %v1802_v13 = vpop.permute.xlu0 %1801 }
 0x2a6   : > { %v1878_v55 = vsel %vm1865_vm4, %v1798_v2, %v1800_v25  ;;  %v6528_v7 = vmax.f32 %v6120_v45, %v1800_v25  ;;  %4543 = vmatpush1.bf16.msra.mxu1 %v4542_v1 }
 0x2a7   : > { %v6531_v20 = vmax.f32 %v6117_v38, %v1878_v55  ;;  %4546 = vmatprep.subr.msk.bf16.mxu1 %vm5987_vm3, %v4544_v44 }
 0x2a8   : > { %4051 = vmatprep.mubr.msk.f32.mxu1 %vm2100_vm5, %v6528_v7 }
 0x2a9   : > { %2298 = vmatmul.mubr.f32.gmra.mrb[20].mxu1 %v6531_v20  ;;  %v1804_v32 = vpop.permute.xlu1 %1803  ;;  %v1806_v43 = vpop.permute.xlu0 %1805 }
 0x2aa   : > { %v1879_v2 = vsel %vm1865_vm4, %v1802_v13, %v1804_v32  ;;  %v6540_v45 = vmax.f32 %v6130_v61, %v1804_v32  ;;  %4549 = vmatpush1.bf16.msk.msra.mxu1 %vm5987_vm3, %v4547_v24 }
 0x2ab   : > { %v6545_v38 = vmax.f32 %v6127_v53, %v1879_v2  ;;  %4551 = vmatprep.subr.bf16.mxu1 %v4550_v58 }
 0x2ac   : > { %4052 = vmatprep.mubr.msk.f32.mxu1 %vm2100_vm5, %v6540_v45 }
 0x2ad   : > { %2304 = vmatmul.mubr.f32.gmra.mrb[22].mxu1 %v6545_v38  ;;  %v1808_v1 = vpop.permute.xlu1 %1807  ;;  %v1810_v44 = vpop.permute.xlu0 %1809 }
 0x2ae   : > { %v1880_v6 = vsel %vm1865_vm4, %v1806_v43, %v1808_v1  ;;  %v6552_v33 = vmax.f32 %v6140_v18, %v1808_v1 }
 0x2af   : > { %v6555_v61 = vmax.f32 %v6137_v8, %v1880_v6 }
 0x2b0   : > { %4053 = vmatprep.mubr.msk.f32.mxu1 %vm2100_vm5, %v6552_v33 }
 0x2b1   : > { %2308 = vmatmul.mubr.f32.gmra.mrb[24].mxu1 %v6555_v61  ;;  %v1812_v53 = vpop.permute.xlu1 %1811  ;;  %v1814_v31 = vpop.permute.xlu0 %1813 }
 0x2b2   : > { %v1881_v26 = vsel %vm1865_vm4, %v1810_v44, %v1812_v53  ;;  %v6562_v25 = vmax.f32 %v6150_v28, %v1812_v53 }
 0x2b3   : > { %v6565_v13 = vmax.f32 %v6147_v22, %v1881_v26 }
 0x2b4   : > { %4054 = vmatprep.mubr.msk.f32.mxu1 %vm2100_vm5, %v6562_v25 }
 0x2b5   : > { %2314 = vmatmul.mubr.f32.gmra.mrb[26].mxu1 %v6565_v13  ;;  %v1816_v8 = vpop.permute.xlu1 %1815  ;;  %v1818_v18 = vpop.permute.xlu0 %1817 }
 0x2b6   : > { %v1882_v55 = vsel %vm1865_vm4, %v1814_v31, %v1816_v8  ;;  %v6572_v24 = vmax.f32 %v6160_v46, %v1816_v8 }
 0x2b7   : > { %v6575_v58 = vmax.f32 %v6157_v37, %v1882_v55 }
 0x2b8   : > { %4055 = vmatprep.mubr.msk.f32.mxu1 %vm2100_vm5, %v6572_v24 }
 0x2b9   : > { %2318 = vmatmul.mubr.f32.gmra.mrb[28].mxu1 %v6575_v58  ;;  %v1820_v22 = vpop.permute.xlu1 %1819  ;;  %v1822_v28 = vpop.permute.xlu0 %1821 }
 0x2ba   : > { %v1883_v32 = vsel %vm1865_vm4, %v1818_v18, %v1820_v22  ;;  %v6582_v43 = vmax.f32 %v6170_v4, %v1820_v22 }
 0x2bb   : > { %v6585_v2 = vmax.f32 %v6167_v59, %v1883_v32 }
 0x2bc   : > { %4056 = vmatprep.mubr.msk.f32.mxu1 %vm2100_vm5, %v6582_v43 }
 0x2bd   : > { %2324 = vmatmul.mubr.f32.gmra.mrb[30].mxu1 %v6585_v2  ;;  %v1824_v37 = vpop.permute.xlu1 %1823  ;;  %v1826_v46 = vpop.permute.xlu0 %1825 }
 0x2be   : > { %v1884_v1 = vsel %vm1865_vm4, %v1822_v28, %v1824_v37  ;;  %v6592_v44 = vmax.f32 %v6180_v23, %v1824_v37 }
 0x2bf   : > { %v6595_v6 = vmax.f32 %v6177_v9, %v1884_v1 }
 0x2c0   : > { %4057 = vmatprep.mubr.msk.f32.mxu1 %vm2100_vm5, %v6592_v44 }
 0x2c1   : > { %2328 = vmatmul.mubr.f32.gmra.mrb[32].mxu1 %v6595_v6  ;;  %v1828_v59 = vpop.permute.xlu1 %1827  ;;  %v1830_v4 = vpop.permute.xlu0 %1829 }
 0x2c2   : > { %v1885_v53 = vsel %vm1865_vm4, %v1826_v46, %v1828_v59  ;;  %v6602_v31 = vmax.f32 %v6190_v49, %v1828_v59  ;;  %v7796_v46 = vld [vmem:[#allocation9_spill] sm:$0xff]  ;;  %v7797_v59 = vld [vmem:[#allocation8_spill] sm:$0xff] }
 0x2c3   : > { %v6605_v26 = vmax.f32 %v6187_v35, %v1885_v53 }
 0x2c4   : > { %4058 = vmatprep.mubr.msk.f32.mxu1 %vm2100_vm5, %v6602_v31 }
 0x2c5   : > { %2334 = vmatmul.mubr.f32.gmra.mrb[34].mxu1 %v6605_v26  ;;  %v1832_v9 = vpop.permute.xlu1 %1831  ;;  %v1834_v23 = vpop.permute.xlu0 %1833 }
 0x2c6   : > { %v1886_v8 = vsel %vm1865_vm4, %v1830_v4, %v1832_v9  ;;  %v6612_v18 = vmax.f32 %v6200_v51, %v1832_v9  ;;  %v7798_v9 = vld [vmem:[#allocation11_spill] sm:$0xff] }
 0x2c7   : > { %v6615_v55 = vmax.f32 %v6197_v63, %v1886_v8  ;;  %v7799_v8 = vld [vmem:[#allocation10_spill] sm:$0xff] }
 0x2c8   : > { %4059 = vmatprep.mubr.msk.f32.mxu1 %vm2100_vm5, %v6612_v18 }
 0x2c9   : > { %2338 = vmatmul.mubr.f32.gmra.mrb[36].mxu1 %v6615_v55  ;;  %v1836_v35 = vpop.permute.xlu1 %1835  ;;  %v1838_v49 = vpop.permute.xlu0 %1837 }
 0x2ca   : > { %v1887_v22 = vsel %vm1865_vm4, %v1834_v23, %v1836_v35  ;;  %v6622_v28 = vmax.f32 %v6210_v41, %v1836_v35 }
 0x2cb   : > { %v6625_v32 = vmax.f32 %v6207_v34, %v1887_v22 }
 0x2cc   : > { %4060 = vmatprep.mubr.msk.f32.mxu1 %vm2100_vm5, %v6622_v28 }
 0x2cd   : > { %2344 = vmatmul.mubr.f32.gmra.mrb[38].mxu1 %v6625_v32  ;;  %v1840_v63 = vpop.permute.xlu1 %1839  ;;  %v1842_v51 = vpop.permute.xlu0 %1841 }
 0x2ce   : > { %v1888_v37 = vsel %vm1865_vm4, %v1838_v49, %v1840_v63  ;;  %v6632_v1 = vmax.f32 %v7796_v46, %v1840_v63 }
 0x2cf   : > { %v6635_v4 = vmax.f32 %v7797_v59, %v1888_v37  ;;  %v7801_v37 = vld [vmem:[#allocation13_spill] sm:$0xff]  ;;  %v7802_v59 = vld [vmem:[#allocation12_spill] sm:$0xff] }
 0x2d0   : > { %4061 = vmatprep.mubr.msk.f32.mxu1 %vm2100_vm5, %v6632_v1 }
 0x2d1   : > { %2348 = vmatmul.mubr.f32.gmra.mrb[40].mxu1 %v6635_v4  ;;  %v1844_v34 = vpop.permute.xlu1 %1843  ;;  %v1846_v41 = vpop.permute.xlu0 %1845 }
 0x2d2   : > { %v1889_v53 = vsel %vm1865_vm4, %v1842_v51, %v1844_v34  ;;  %v6642_v23 = vmax.f32 %v7798_v9, %v1844_v34 }
 0x2d3   : > { %v6645_v35 = vmax.f32 %v7799_v8, %v1889_v53 }
 0x2d4   : > { %4062 = vmatprep.mubr.msk.f32.mxu1 %vm2100_vm5, %v6642_v23 }
 0x2d5   : > { %7800 = vst [vmem:[#allocation9_spill] sm:$0xff] %v6645_v35  ;;  %2354 = vmatmul.mubr.f32.gmra.mrb[42].mxu1 %v6645_v35  ;;  %v1848_v49 = vpop.permute.xlu1 %1847  ;;  %v1850_v22 = vpop.permute.xlu0 %1849  ;;  %v7805_v35 = vld [vmem:[#allocation14_spill] sm:$0xff] }
 0x2d6   : > { %v1890_v63 = vsel %vm1865_vm4, %v1846_v41, %v1848_v49  ;;  %v6652_v46 = vmax.f32 %v7801_v37, %v1848_v49 }
 0x2d7   : > { %v6655_v51 = vmax.f32 %v7802_v59, %v1890_v63 }
 0x2d8   : > { %4063 = vmatprep.mubr.msk.f32.mxu1 %vm2100_vm5, %v6652_v46 }
 0x2d9   : > { %7803 = vst [vmem:[#allocation8_spill] sm:$0xff] %v6655_v51  ;;  %2358 = vmatmul.mubr.f32.gmra.mrb[44].mxu1 %v6655_v51  ;;  %v1852_v34 = vpop.permute.xlu1 %1851  ;;  %v1854_v53 = vpop.permute.xlu0 %1853 }
 0x2da   : > { %v1891_v9 = vsel %vm1865_vm4, %v1850_v22, %v1852_v34  ;;  %v6662_v8 = vmax.f32 %v6250_v15, %v1852_v34  ;;  %v4093_v15 = vld [vmem:[%s7743_s3 + $0x2c0] sm:$0xff] }
 0x2db   : > { %v6665_v41 = vmax.f32 %v7805_v35, %v1891_v9  ;;  %v4095_v35 = vld [vmem:[%s7743_s3 + $0x2d0] sm:$0xff] }
 0x2dc   : > { %7804 = vst [vmem:[#allocation11_spill] sm:$0xff] %v6662_v8  ;;  %4064 = vmatprep.mubr.msk.f32.mxu1 %vm2100_vm5, %v6662_v8  ;;  %v4099_v8 = vld [vmem:[%s7743_s3 + $0x2f0] sm:$0xff]  ;;  %v7809_v30 = vld [vmem:[#allocation9_spill] sm:$0xff] }
 0x2dd   : > { %7806 = vst [vmem:[#allocation10_spill] sm:$0xff] %v6665_v41  ;;  %2364 = vmatmul.mubr.f32.gmra.mrb[46].mxu1 %v6665_v41  ;;  %v1856_v49 = vpop.permute.xlu1 %1855  ;;  %v1750_v59 = vpop.permute.xlu0 %1749 }
 0x2de   : > { %v1892_v63 = vsel %vm1865_vm4, %v1854_v53, %v1856_v49  ;;  %v6672_v37 = vmax.f32 %v6260_v16, %v1856_v49  ;;  %v4098_v16 = vld [vmem:[%s7743_s3 + $0x2e8] sm:$0xff]  ;;  %v4552_v49 = vpack.c.bf16 %v4095_v35, %v4093_v15 }
 0x2df   : > { %v6675_v22 = vmax.f32 %v6257_v62, %v1892_v63  ;;  %v4100_v62 = vld [vmem:[%s7743_s3 + $0x2f8] sm:$0xff] }
 0x2e0   : > { %7807 = vst [vmem:[#allocation13_spill] sm:$0xff] %v6672_v37  ;;  %4065 = vmatprep.mubr.msk.f32.mxu1 %vm2100_vm5, %v6672_v37  ;;  %v4554_v41 = vpack.c.bf16 %v4100_v62, %v4098_v16  ;;  %v4097_v37 = vld [vmem:[%s7743_s3 + $0x2e0] sm:$0xff] }
 0x2e1   : > { %7808 = vst [vmem:[#allocation12_spill] sm:$0xff] %v6675_v22  ;;  %2368 = vmatmul.mubr.f32.gmra.mrb[48].mxu1 %v6675_v22  ;;  %v1752_v34 = vpop.permute.xlu1 %1751  ;;  %v1754_v22 = vpop.permute.xlu0 %1753  ;;  %v4556_v16 = vpack.c.bf16 %v4099_v8, %v4097_v37  ;;  %v4107_v37 = vld [vmem:[%s7743_s3 + $0x330] sm:$0xff] }
 0x2e2   : > { %v1866_v53 = vsel %vm1865_vm4, %v1750_v59, %v1752_v34  ;;  %v1954_v9 = vmax.f32 %v6002_v42, %v1752_v34  ;;  %v4102_v42 = vld [vmem:[%s7743_s3 + $0x308] sm:$0xff]  ;;  %v4101_v34 = vld [vmem:[%s7743_s3 + $0x300] sm:$0xff] }
 0x2e3   : > { %v1953_v63 = vmax.f32 %v5999_v39, %v1866_v53  ;;  %v4104_v39 = vld [vmem:[%s7743_s3 + $0x318] sm:$0xff]  ;;  %v4103_v53 = vld [vmem:[%s7743_s3 + $0x310] sm:$0xff] }
 0x2e4   : > { %4068 = vmatprep.mubr.msk.f32.mxu1 %vm2100_vm5, %v1954_v9  ;;  %v4558_v62 = vpack.c.bf16 %v4104_v39, %v4102_v42  ;;  %v4114_v42 = vld [vmem:[%s7743_s3 + $0x368] sm:$0xff] }
 0x2e5   : > { %2449 = vmatmul.mubr.f32.vlgmr.msra.gmra.mrb[0].mxu1 %v1953_v63  ;;  %v1756_v51 = vpop.permute.xlu1 %1755  ;;  %v4109_v63 = vld [vmem:[%s7743_s3 + $0x340] sm:$0xff] }
 0x2e6   : > { %v1867_v59 = vsel %vm1865_vm4, %v1754_v22, %v1756_v51  ;;  %v1956_v15 = vmax.f32 %v6016_v54, %v1756_v51  ;;  %4553 = vmatpush1.bf16.msra.mxu1 %v4552_v49  ;;  %v4106_v54 = vld [vmem:[%s7743_s3 + $0x328] sm:$0xff]  ;;  %v4560_v51 = vpack.c.bf16 %v4103_v53, %v4101_v34  ;;  %v4117_v53 = vld [vmem:[%s7743_s3 + $0x380] sm:$0xff] }
 0x2e7   : > { %v1955_v35 = vmax.f32 %v6007_v48, %v1867_v59  ;;  %4555 = vmatprep.subr.bf16.mxu1 %v4554_v41  ;;  %v4108_v48 = vld [vmem:[%s7743_s3 + $0x338] sm:$0xff]  ;;  %v4105_v41 = vld [vmem:[%s7743_s3 + $0x320] sm:$0xff]  ;;  %v4110_v22 = vld [vmem:[%s7743_s3 + $0x348] sm:$0xff] }
 0x2e8   : > { %4069 = vmatprep.mubr.msk.f32.mxu1 %vm2100_vm5, %v1956_v15  ;;  %v4562_v8 = vpack.c.bf16 %v4108_v48, %v4106_v54  ;;  %v4564_v9 = vpack.c.bf16 %v4107_v37, %v4105_v41  ;;  %v4113_v15 = vld [vmem:[%s7743_s3 + $0x360] sm:$0xff]  ;;  %v4119_v54 = vld [vmem:[%s7743_s3 + $0x390] sm:$0xff]  ;;  %v4122_v48 = vld [vmem:[%s7743_s3 + $0x3a8] sm:$0xff] }
 0x2e9   : > { %2455 = vmatmul.mubr.f32.gmra.mrb[50].mxu1 %v1955_v35  ;;  %v4118_v35 = vld [vmem:[%s7743_s3 + $0x388] sm:$0xff]  ;;  %v4121_v37 = vld [vmem:[%s7743_s3 + $0x3a0] sm:$0xff] }
 0x2ea   : > { %4070 = vmatprep.mubr.msk.f32.mxu1 %vm2100_vm5, %v6308_v12  ;;  %4557 = vmatpush1.bf16.msra.mxu1 %v4556_v16  ;;  %v4112_v12 = vld [vmem:[%s7743_s3 + $0x358] sm:$0xff] }
 0x2eb   : > { %4559 = vmatprep.subr.bf16.mxu1 %v4558_v62  ;;  %v4566_v49 = vpack.c.bf16 %v4112_v12, %v4110_v22  ;;  %v4120_v16 = vld [vmem:[%s7743_s3 + $0x398] sm:$0xff]  ;;  %v4123_v22 = vld [vmem:[%s7743_s3 + $0x3b0] sm:$0xff]  ;;  %v4126_v12 = vld [vmem:[%s7743_s3 + $0x3c8] sm:$0xff] }
 0x2ec   : > { %v4574_v34 = vpack.c.bf16 %v4120_v16, %v4118_v35  ;;  %v4131_v35 = vld [vmem:[%s7743_s3 + $0x3f0] sm:$0xff]  ;;  %v4134_v16 = vld [vmem:[%s7743_s3 + $0x408] sm:$0xff] }
 0x2ed   : > { %2459 = vmatmul.mubr.f32.gmra.mrb[4].mxu1 %v6311_v57  ;;  %v4111_v57 = vld [vmem:[%s7743_s3 + $0x350] sm:$0xff] }
 0x2ee   : > { %4071 = vmatprep.mubr.msk.f32.mxu1 %vm2100_vm5, %v6330_v40  ;;  %4561 = vmatpush1.bf16.msra.mxu1 %v4560_v51  ;;  %v4116_v40 = vld [vmem:[%s7743_s3 + $0x378] sm:$0xff]  ;;  %v4568_v39 = vpack.c.bf16 %v4111_v57, %v4109_v63  ;;  %v4125_v57 = vld [vmem:[%s7743_s3 + $0x3c0] sm:$0xff] }
 0x2ef   : > { %4563 = vmatprep.subr.bf16.mxu1 %v4562_v8  ;;  %v4570_v59 = vpack.c.bf16 %v4116_v40, %v4114_v42  ;;  %v4124_v51 = vld [vmem:[%s7743_s3 + $0x3b8] sm:$0xff]  ;;  %v4576_v8 = vpack.c.bf16 %v4119_v54, %v4117_v53  ;;  %v4127_v42 = vld [vmem:[%s7743_s3 + $0x3d0] sm:$0xff]  ;;  %v4130_v40 = vld [vmem:[%s7743_s3 + $0x3e8] sm:$0xff] }
 0x2f0   : > { %v4578_v41 = vpack.c.bf16 %v4124_v51, %v4122_v48  ;;  %v4133_v54 = vld [vmem:[%s7743_s3 + $0x400] sm:$0xff]  ;;  %v4135_v48 = vld [vmem:[%s7743_s3 + $0x410] sm:$0x3f] }
 0x2f1   : > { %2465 = vmatmul.mubr.f32.gmra.mrb[52].mxu1 %v6333_v56  ;;  %v4115_v56 = vld [vmem:[%s7743_s3 + $0x370] sm:$0xff]  ;;  %v4593_v51 = vpack.c.bf16 %v4135_v48, %v4133_v54  ;;  %v4165_v54 = vld [vmem:[%s7745_s5 + $0xc8] sm:$0xff] }
 0x2f2   : > { %4072 = vmatprep.mubr.msk.f32.mxu1 %vm2100_vm5, %v6352_v5  ;;  %4565 = vmatpush1.bf16.msra.mxu1 %v4564_v9  ;;  %v4572_v62 = vpack.c.bf16 %v4115_v56, %v4113_v15  ;;  %v4128_v9 = vld [vmem:[%s7743_s3 + $0x3d8] sm:$0xff]  ;;  %v4129_v56 = vld [vmem:[%s7743_s3 + $0x3e0] sm:$0xff] }
 0x2f3   : > { %4567 = vmatprep.subr.bf16.mxu1 %v4566_v49  ;;  %v4580_v49 = vpack.c.bf16 %v4123_v22, %v4121_v37  ;;  %v4582_v63 = vpack.c.bf16 %v4128_v9, %v4126_v12 }
 0x2f5   : > { %2469 = vmatmul.mubr.f32.gmra.mrb[8].mxu1 %v6355_v3 }
 0x2f6   : > { %4073 = vmatprep.mubr.msk.f32.mxu1 %vm2100_vm5, %v6374_v21  ;;  %4569 = vmatpush1.bf16.msra.mxu1 %v4568_v39  ;;  %v4132_v39 = vld [vmem:[%s7743_s3 + $0x3f8] sm:$0xff] }
 0x2f7   : > { %4571 = vmatprep.subr.bf16.mxu1 %v4570_v59  ;;  %v4584_v59 = vpack.c.bf16 %v4127_v42, %v4125_v57  ;;  %v4586_v15 = vpack.c.bf16 %v4132_v39, %v4130_v40  ;;  %v2982_v57 = vld [vmem:[%s7745_s5] sm:$0xff]  ;;  %v2983_v42 = vld [vmem:[%s7745_s5 + $0x8] sm:$0xff]  ;;  %v5148_v40 = vmov 0.0|0.0  }
 0x2f8   : > { %4632 = vmatprep.subr.bf16.mxu0 %v5148_v40  ;;  %v4633_v39 = vpack.c.bf16 %v2983_v42, %v2982_v57  ;;  %v2998_v57 = vld [vmem:[%s7745_s5 + $0x80] sm:$0xff]  ;;  %v2999_v42 = vld [vmem:[%s7745_s5 + $0x88] sm:$0xff] }
 0x2f9   : > { %2475 = vmatmul.mubr.f32.gmra.mrb[54].mxu1 %v6377_v14 }
 0x2fa   : > { %4074 = vmatprep.mubr.msk.f32.mxu1 %vm2100_vm5, %v6396_v17  ;;  %4573 = vmatpush1.bf16.msra.mxu1 %v4572_v62  ;;  %v4136_v62 = vld [vmem:[%s7743_s3 + $0x418] sm:$0x3f] }
 0x2fb   : > { %4575 = vmatprep.subr.bf16.mxu1 %v4574_v34  ;;  %v4588_v34 = vpack.c.bf16 %v4131_v35, %v4129_v56  ;;  %v4590_v53 = vpack.c.bf16 %v4136_v62, %v4134_v16  ;;  %4634 = vmatpush1.bf16.msra.mxu0 %v4633_v39  ;;  %v2984_v56 = vld [vmem:[%s7745_s5 + $0x10] sm:$0xff]  ;;  %v2985_v35 = vld [vmem:[%s7745_s5 + $0x18] sm:$0xff] }
 0x2fc   : > { %4635 = vmatprep.subr.bf16.mxu0 %v5148_v40  ;;  %v4636_v16 = vpack.c.bf16 %v2985_v35, %v2984_v56  ;;  %v4657_v56 = vpack.c.bf16 %v2999_v42, %v2998_v57  ;;  %v4180_v35 = vld [vmem:[%s7745_s5 + $0x140] sm:$0xff] }
 0x2fd   : > { %2479 = vmatmul.mubr.f32.gmra.mrb[12].mxu1 %v6399_v19 }
 0x2fe   : > { %4075 = vmatprep.mubr.msk.f32.mxu1 %vm2100_vm5, %v6418_v0  ;;  %4577 = vmatpush1.bf16.msra.mxu1 %v4576_v8  ;;  %v7810_v8 = vld [vmem:[#allocation8_spill] sm:$0xff] }
 0x2ff   : > { %4579 = vmatprep.subr.bf16.mxu1 %v4578_v41  ;;  %4637 = vmatpush1.bf16.msra.mxu0 %v4636_v16  ;;  %v4181_v16 = vld [vmem:[%s7745_s5 + $0x148] sm:$0xff] }
 0x300   : > { %4638 = vmatprep.subr.bf16.mxu0 %v5148_v40 }
 0x301   : > { %2485 = vmatmul.mubr.f32.gmra.mrb[56].mxu1 %v6421_v27 }
 0x302   : > { %4076 = vmatprep.mubr.msk.f32.mxu1 %vm2100_vm5, %v6440_v29  ;;  %4581 = vmatpush1.bf16.msra.mxu1 %v4580_v49 }
 0x303   : > { %4583 = vmatprep.subr.bf16.mxu1 %v4582_v63 }
 0x305   : > { %2489 = vmatmul.mubr.f32.gmra.mrb[16].mxu1 %v6443_v36 }
 0x306   : > { %4077 = vmatprep.mubr.msk.f32.mxu1 %vm2100_vm5, %v6462_v52  ;;  %4585 = vmatpush1.bf16.msra.mxu1 %v4584_v59 }
 0x307   : > { %4587 = vmatprep.subr.bf16.mxu1 %v4586_v15 }
 0x309   : > { %2495 = vmatmul.mubr.f32.gmra.mrb[58].mxu1 %v6465_v47 }
 0x30a   : > { %4078 = vmatprep.mubr.msk.f32.mxu1 %vm2100_vm5, %v6484_v50  ;;  %4589 = vmatpush1.bf16.msra.mxu1 %v4588_v34 }
 0x30b   : > { %4592 = vmatprep.subr.msk.bf16.mxu1 %vm5987_vm3, %v4590_v53  ;;  %v4164_v53 = vld [vmem:[%s7745_s5 + $0xc0] sm:$0xff] }
 0x30c   : > { %v4597_v48 = vpack.c.bf16 %v4165_v54, %v4164_v53  ;;  %v4621_v53 = vpack.c.bf16 %v4181_v16, %v4180_v35 }
 0x30d   : > { %2499 = vmatmul.mubr.f32.gmra.mrb[20].mxu1 %v6487_v60 }
 0x30e   : > { %4079 = vmatprep.mubr.msk.f32.mxu1 %vm2100_vm5, %v6506_v11  ;;  %4595 = vmatpush1.bf16.msk.msra.mxu1 %vm5987_vm3, %v4593_v51 }
 0x30f   : > { %4596 = vmatprep.subr.bf16.mxu1 %v5148_v40 }
 0x311   : > { %2505 = vmatmul.mubr.f32.gmra.mrb[60].mxu1 %v6509_v10 }
 0x312   : > { %4080 = vmatprep.mubr.msk.f32.mxu1 %vm2100_vm5, %v6528_v7 }
 0x315   : > { %2509 = vmatmul.mubr.f32.gmra.mrb[24].mxu1 %v6531_v20 }
 0x316   : > { %4081 = vmatprep.mubr.msk.f32.mxu1 %vm2100_vm5, %v6540_v45 }
 0x319   : > { %2515 = vmatmul.mubr.f32.gmra.mrb[62].mxu1 %v6545_v38 }
 0x31a   : > { %4082 = vmatprep.mubr.msk.f32.mxu1 %vm2100_vm5, %v6552_v33 }
 0x31d   : > { %2519 = vmatmul.mubr.f32.gmra.mrb[28].mxu1 %v6555_v61 }
 0x31e   : > { %4083 = vmatprep.mubr.msk.f32.mxu1 %vm2100_vm5, %v6562_v25 }
 0x321   : > { %2525 = vmatmul.mubr.f32.gmra.mrb[64].mxu1 %v6565_v13 }
 0x322   : > { %4084 = vmatprep.mubr.msk.f32.mxu1 %vm2100_vm5, %v6572_v24 }
 0x325   : > { %2529 = vmatmul.mubr.f32.gmra.mrb[32].mxu1 %v6575_v58 }
 0x326   : > { %4085 = vmatprep.mubr.msk.f32.mxu1 %vm2100_vm5, %v6582_v43 }
 0x329   : > { %2535 = vmatmul.mubr.f32.gmra.mrb[66].mxu1 %v6585_v2 }
 0x32a   : > { %4086 = vmatprep.mubr.msk.f32.mxu1 %vm2100_vm5, %v6592_v44 }
 0x32d   : > { %2539 = vmatmul.mubr.f32.gmra.mrb[36].mxu1 %v6595_v6 }
 0x32e   : > { %4087 = vmatprep.mubr.msk.f32.mxu1 %vm2100_vm5, %v6602_v31 }
 0x331   : > { %2545 = vmatmul.mubr.f32.gmra.mrb[68].mxu1 %v6605_v26 }
 0x332   : > { %4088 = vmatprep.mubr.msk.f32.mxu1 %vm2100_vm5, %v6612_v18 }
 0x335   : > { %2549 = vmatmul.mubr.f32.gmra.mrb[40].mxu1 %v6615_v55 }
 0x336   : > { %4089 = vmatprep.mubr.msk.f32.mxu1 %vm2100_vm5, %v6622_v28 }
 0x339   : > { %2555 = vmatmul.mubr.f32.gmra.mrb[70].mxu1 %v6625_v32 }
 0x33a   : > { %4090 = vmatprep.mubr.msk.f32.mxu1 %vm2100_vm5, %v6632_v1 }
 0x33d   : > { %2559 = vmatmul.mubr.f32.gmra.mrb[44].mxu1 %v6635_v4 }
 0x33e   : > { %4091 = vmatprep.mubr.msk.f32.mxu1 %vm2100_vm5, %v6642_v23 }
 0x341   : > { %2565 = vmatmul.mubr.f32.gmra.mrb[72].mxu1 %v7809_v30 }
 0x342   : > { %4092 = vmatprep.mubr.msk.f32.mxu1 %vm2100_vm5, %v6652_v46 }
 0x345   : > { %2569 = vmatmul.mubr.f32.gmra.mrb[74].mxu1 %v7810_v8 }
 0x346   : > { %4139 = vmatprep.mubr.msk.f32.mxu1 %vm2100_vm5, %v6352_v5 }
 0x349   : > { %2695 = vmatmul.mubr.f32.vlgmr.msra.gmra.mrb[0].mxu1 %v6355_v3 }
 0x34a   : > { %4140 = vmatprep.mubr.msk.f32.mxu1 %vm2100_vm5, %v6374_v21  ;;  %4598 = vmatpush1.bf16.msra.mxu1 %v4597_v48  ;;  %v4182_v48 = vld [vmem:[%s7745_s5 + $0x150] sm:$0xff] }
 0x34b   : > { %4599 = vmatprep.subr.bf16.mxu1 %v5148_v40 }
 0x34d   : > { %2701 = vmatmul.mubr.f32.gmra.mrb[76].mxu1 %v6377_v14 }
 0x34e   : > { %4141 = vmatprep.mubr.msk.f32.mxu1 %vm2100_vm5, %v6396_v17 }
 0x351   : > { %2705 = vmatmul.mubr.f32.gmra.mrb[4].mxu1 %v6399_v19 }
 0x352   : > { %4142 = vmatprep.mubr.msk.f32.mxu1 %vm2100_vm5, %v6418_v0 }
 0x355   : > { %2711 = vmatmul.mubr.f32.gmra.mrb[78].mxu1 %v6421_v27 }
 0x356   : > { %4143 = vmatprep.mubr.msk.f32.mxu1 %vm2100_vm5, %v6440_v29 }
 0x358   : > { %v2255_v5 = vpop.f32.mrb[2].mxu1 }
 0x359   : > { %v2256_v3 = vpop.f32.mrb[3].mxu1  ;;  %2715 = vmatmul.mubr.f32.gmra.mrb[8].mxu1 %v6443_v36  ;;  %v2987_v5 = vld [vmem:[%s7745_s5 + $0x28] sm:$0xff] }
 0x35a   : > { %4144 = vmatprep.mubr.msk.f32.mxu1 %vm2100_vm5, %v6462_v52 }
 0x35d   : > { %2721 = vmatmul.mubr.f32.gmra.mrb[80].mxu1 %v6465_v47 }
 0x35e   : > { %4145 = vmatprep.mubr.msk.f32.mxu1 %vm2100_vm5, %v6484_v50 }
 0x360   : > { %v2265_v21 = vpop.f32.mrb[6].mxu1 }
 0x361   : > { %v2266_v14 = vpop.f32.mrb[7].mxu1  ;;  %2725 = vmatmul.mubr.f32.gmra.mrb[12].mxu1 %v6487_v60  ;;  %v4166_v21 = vld [vmem:[%s7745_s5 + $0xd0] sm:$0xff] }
 0x362   : > { %4146 = vmatprep.mubr.msk.f32.mxu1 %vm2100_vm5, %v6506_v11  ;;  %v4167_v14 = vld [vmem:[%s7745_s5 + $0xd8] sm:$0xff] }
 0x365   : > { %2731 = vmatmul.mubr.f32.gmra.mrb[82].mxu1 %v6509_v10 }
 0x366   : > { %4147 = vmatprep.mubr.msk.f32.mxu1 %vm2100_vm5, %v6528_v7 }
 0x368   : > { %v2275_v17 = vpop.f32.mrb[10].mxu1 }
 0x369   : > { %v2276_v19 = vpop.f32.mrb[11].mxu1  ;;  %2735 = vmatmul.mubr.f32.gmra.mrb[16].mxu1 %v6531_v20  ;;  %v4600_v17 = vpack.c.bf16 %v4167_v14, %v4166_v21 }
 0x36a   : > { %4148 = vmatprep.mubr.msk.f32.mxu1 %vm2100_vm5, %v6540_v45  ;;  %v7811_v45 = vld [vmem:[#allocation11_spill] sm:$0xff] }
 0x36b   : > { %4601 = vmatpush1.bf16.msra.mxu1 %v4600_v17  ;;  %v4184_v17 = vld [vmem:[%s7745_s5 + $0x160] sm:$0xff] }
 0x36c   : > { %4602 = vmatprep.subr.bf16.mxu1 %v5148_v40 }
 0x36d   : > { %2741 = vmatmul.mubr.f32.gmra.mrb[84].mxu1 %v6545_v38  ;;  %v5063_v38 = vpop.permute.xlu0 %5062 }
 0x36e   : > { %4149 = vmatprep.mubr.msk.f32.mxu1 %vm2100_vm5, %v6552_v33  ;;  %v1860_v33 = vpop.permute.xlu1 %1859 }
 0x370   : > { %v2285_v0 = vpop.f32.mrb[14].mxu1 }
 0x371   : > { %v2286_v27 = vpop.f32.mrb[15].mxu1  ;;  %2745 = vmatmul.mubr.f32.gmra.mrb[20].mxu1 %v6555_v61  ;;  %v7812_v61 = vld [vmem:[#allocation10_spill] sm:$0xff] }
 0x372   : > { %4150 = vmatprep.mubr.msk.f32.mxu1 %vm2100_vm5, %v6562_v25  ;;  %v5064_v25 = vunpack.i.l.bf16 %v5063_v38  ;;  %v2988_v27 = vld [vmem:[%s7745_s5 + $0x30] sm:$0xff] }
 0x375   : > { %2751 = vmatmul.mubr.f32.gmra.mrb[86].mxu1 %v6565_v13  ;;  %v7813_v13 = vld [vmem:[#allocation13_spill] sm:$0xff] }
 0x376   : > { %4151 = vmatprep.mubr.msk.f32.mxu1 %vm2100_vm5, %v6572_v24  ;;  %v1893_v24 = vsel %vm1865_vm4, %v5064_v25, %v1860_v33 }
 0x378   : > { %v2295_v29 = vpop.f32.mrb[18].mxu1 }
 0x379   : > { %v2296_v36 = vpop.f32.mrb[19].mxu1  ;;  %2755 = vmatmul.mubr.f32.gmra.mrb[24].mxu1 %v6575_v58  ;;  %v7814_v58 = vld [vmem:[#allocation16_spill] sm:$0xff] }
 0x37a   : > { %4152 = vmatprep.mubr.msk.f32.mxu1 %vm2100_vm5, %v6582_v43  ;;  %v2008_v43 = vmax.f32 %v7814_v58, %v1860_v33  ;;  %v2989_v29 = vld [vmem:[%s7745_s5 + $0x38] sm:$0xff] }
 0x37b   : > { %v4642_v36 = vpack.c.bf16 %v2989_v29, %v2988_v27  ;;  %v3005_v27 = vld [vmem:[%s7745_s5 + $0xb8] sm:$0xff] }
 0x37d   : > { %2761 = vmatmul.mubr.f32.gmra.mrb[88].mxu1 %v6585_v2 }
 0x37e   : > { %4153 = vmatprep.mubr.msk.f32.mxu1 %vm2100_vm5, %v6592_v44  ;;  %v1864_v44 = vpop.permute.xlu0 %1863 }
 0x380   : > { %v2305_v52 = vpop.f32.mrb[22].mxu1 }
 0x381   : > { %v2306_v47 = vpop.f32.mrb[23].mxu1  ;;  %2765 = vmatmul.mubr.f32.gmra.mrb[28].mxu1 %v6595_v6  ;;  %v4168_v52 = vld [vmem:[%s7745_s5 + $0xe0] sm:$0xff] }
 0x382   : > { %4154 = vmatprep.mubr.msk.f32.mxu1 %vm2100_vm5, %v6602_v31  ;;  %v7815_v31 = vld [vmem:[#allocation12_spill] sm:$0xff]  ;;  %v4169_v47 = vld [vmem:[%s7745_s5 + $0xe8] sm:$0xff] }
 0x385   : > { %2771 = vmatmul.mubr.f32.gmra.mrb[90].mxu1 %v6605_v26  ;;  %v5065_v26 = vunpack.i.h.bf16 %v5063_v38  ;;  %v4171_v38 = vld [vmem:[%s7745_s5 + $0xf8] sm:$0xff] }
 0x386   : > { %4155 = vmatprep.mubr.msk.f32.mxu1 %vm2100_vm5, %v6612_v18  ;;  %v7816_v18 = vld [vmem:[#allocation15_spill] sm:$0xff] }
 0x388   : > { %v2315_v50 = vpop.f32.mrb[26].mxu1 }
 0x389   : > { %v2316_v60 = vpop.f32.mrb[27].mxu1  ;;  %2775 = vmatmul.mubr.f32.gmra.mrb[32].mxu1 %v6615_v55  ;;  %v2007_v55 = vmax.f32 %v7816_v18, %v1893_v24  ;;  %v4603_v50 = vpack.c.bf16 %v4169_v47, %v4168_v52  ;;  %v2993_v24 = vld [vmem:[%s7745_s5 + $0x58] sm:$0xff]  ;;  %v4174_v18 = vld [vmem:[%s7745_s5 + $0x110] sm:$0xff] }
 0x38a   : > { %4156 = vmatprep.mubr.msk.f32.mxu1 %vm2100_vm5, %v6622_v28  ;;  %v1894_v28 = vsel %vm1865_vm4, %v5065_v26, %v1864_v44  ;;  %v4187_v52 = vld [vmem:[%s7745_s5 + $0x178] sm:$0xff] }
 0x38b   : > { %4604 = vmatpush1.bf16.msra.mxu1 %v4603_v50 }
 0x38c   : > { %4605 = vmatprep.subr.bf16.mxu1 %v5148_v40 }
 0x38d   : > { %2781 = vmatmul.mubr.f32.gmra.mrb[92].mxu1 %v6625_v32  ;;  %v7817_v32 = vld [vmem:[#allocation18_spill] sm:$0xff] }
 0x38e   : > { %4157 = vmatprep.mubr.msk.f32.mxu1 %vm2100_vm5, %v6632_v1  ;;  %v2010_v1 = vmax.f32 %v7817_v32, %v1864_v44  ;;  %v4172_v44 = vld [vmem:[%s7745_s5 + $0x100] sm:$0xff] }
 0x390   : > { %v2325_v11 = vpop.f32.mrb[30].mxu1 }
 0x391   : > { %v2326_v10 = vpop.f32.mrb[31].mxu1  ;;  %2785 = vmatmul.mubr.f32.gmra.mrb[36].mxu1 %v6635_v4  ;;  %v7818_v4 = vld [vmem:[#allocation17_spill] sm:$0xff] }
 0x392   : > { %4158 = vmatprep.mubr.msk.f32.mxu1 %vm2100_vm5, %v6642_v23  ;;  %v2009_v23 = vmax.f32 %v7818_v4, %v1894_v28  ;;  %v2990_v10 = vld [vmem:[%s7745_s5 + $0x40] sm:$0xff]  ;;  %v2995_v4 = vld [vmem:[%s7745_s5 + $0x68] sm:$0xff] }
 0x393   : > { %v2994_v28 = vld [vmem:[%s7745_s5 + $0x60] sm:$0xff] }
 0x395   : > { %2791 = vmatmul.mubr.f32.gmra.mrb[94].mxu1 %v7809_v30 }
 0x396   : > { %4159 = vmatprep.mubr.msk.f32.mxu1 %vm2100_vm5, %v6652_v46 }
 0x398   : > { %v2335_v7 = vpop.f32.mrb[34].mxu1 }
 0x399   : > { %v2336_v20 = vpop.f32.mrb[35].mxu1  ;;  %2795 = vmatmul.mubr.f32.gmra.mrb[40].mxu1 %v7810_v8  ;;  %v2986_v8 = vld [vmem:[%s7745_s5 + $0x20] sm:$0xff]  ;;  %v2991_v7 = vld [vmem:[%s7745_s5 + $0x48] sm:$0xff] }
 0x39a   : > { %4160 = vmatprep.mubr.msk.f32.mxu1 %vm2100_vm5, %v7811_v45  ;;  %v4639_v3 = vpack.c.bf16 %v2987_v5, %v2986_v8  ;;  %v4170_v20 = vld [vmem:[%s7745_s5 + $0xf0] sm:$0xff]  ;;  %v4645_v45 = vpack.c.bf16 %v2991_v7, %v2990_v10  ;;  %v3003_v8 = vld [vmem:[%s7745_s5 + $0xa8] sm:$0xff] }
 0x39c   : > { %4640 = vmatpush1.bf16.msra.mxu0 %v4639_v3 }
 0x39d   : > { %2801 = vmatmul.mubr.f32.gmra.mrb[96].mxu1 %v7812_v61  ;;  %4641 = vmatprep.subr.bf16.mxu0 %v5148_v40  ;;  %v4606_v61 = vpack.c.bf16 %v4171_v38, %v4170_v20 }
 0x39e   : > { %4161 = vmatprep.mubr.msk.f32.mxu1 %vm2100_vm5, %v7813_v13  ;;  %v2992_v13 = vld [vmem:[%s7745_s5 + $0x50] sm:$0xff] }
 0x39f   : > { %4607 = vmatpush1.bf16.msra.mxu1 %v4606_v61  ;;  %v4648_v58 = vpack.c.bf16 %v2993_v24, %v2992_v13 }
 0x3a0   : > { %v2345_v2 = vpop.f32.mrb[38].mxu1  ;;  %4643 = vmatpush1.bf16.msra.mxu0 %v4642_v36  ;;  %4608 = vmatprep.subr.bf16.mxu1 %v5148_v40  ;;  %v4186_v36 = vld [vmem:[%s7745_s5 + $0x170] sm:$0xff] }
 0x3a1   : > { %v2346_v6 = vpop.f32.mrb[39].mxu1  ;;  %2805 = vmatmul.mubr.f32.gmra.mrb[44].mxu1 %v7815_v31  ;;  %4644 = vmatprep.subr.bf16.mxu0 %v5148_v40 }
 0x3a2   : > { %4162 = vmatprep.mubr.msk.f32.mxu1 %vm2100_vm5, %v2008_v43  ;;  %v4173_v6 = vld [vmem:[%s7745_s5 + $0x108] sm:$0xff] }
 0x3a3   : > { %v4609_v31 = vpack.c.bf16 %v4173_v6, %v4172_v44 }
 0x3a4   : > { %4646 = vmatpush1.bf16.msra.mxu0 %v4645_v45  ;;  %v2843_v45 = vld [vmem:[%s7744_s4] sm:$0x3] }
 0x3a5   : > { %2811 = vmatmul.mubr.f32.gmra.mrb[98].mxu1 %v2007_v55  ;;  %4647 = vmatprep.subr.bf16.mxu0 %v5148_v40  ;;  %v4175_v55 = vld [vmem:[%s7745_s5 + $0x118] sm:$0xff] }
 0x3a6   : > { %4163 = vmatprep.mubr.msk.f32.mxu1 %vm2100_vm5, %v2010_v1  ;;  %4610 = vmatpush1.bf16.msra.mxu1 %v4609_v31  ;;  %v4612_v1 = vpack.c.bf16 %v4175_v55, %v4174_v18 }
 0x3a7   : > { %4611 = vmatprep.subr.bf16.mxu1 %v5148_v40 }
 0x3a8   : > { %v2355_v46 = vpop.f32.mrb[42].mxu1  ;;  %4649 = vmatpush1.bf16.msra.mxu0 %v4648_v58 }
 0x3a9   : > { %v2356_v41 = vpop.f32.mrb[43].mxu1  ;;  %2815 = vmatmul.mubr.f32.gmra.mrb[100].mxu1 %v2009_v23  ;;  %4650 = vmatprep.subr.bf16.mxu0 %v5148_v40  ;;  %v4651_v23 = vpack.c.bf16 %v2995_v4, %v2994_v28  ;;  %v4176_v46 = vld [vmem:[%s7745_s5 + $0x120] sm:$0xff] }
 0x3aa   : > { %4613 = vmatpush1.bf16.msra.mxu1 %v4612_v1  ;;  %v4177_v41 = vld [vmem:[%s7745_s5 + $0x128] sm:$0xff] }
 0x3ab   : > { %4614 = vmatprep.subr.bf16.mxu1 %v5148_v40 }
 0x3ac   : > { %4652 = vmatpush1.bf16.msra.mxu0 %v4651_v23 }
 0x3ad   : > { %4653 = vmatprep.subr.bf16.mxu0 %v5148_v40 }
 0x3b0   : > { %v2365_v37 = vpop.f32.mrb[46].mxu1 }
 0x3b1   : > { %v2366_v22 = vpop.f32.mrb[47].mxu1  ;;  %v2996_v37 = vld [vmem:[%s7745_s5 + $0x70] sm:$0xff] }
 0x3b2   : > { %v4615_v22 = vpack.c.bf16 %v4177_v41, %v4176_v46 }
 0x3b4   : > { %v2369_v12 = vpop.f32.mrb[48].mxu1  ;;  %4616 = vmatpush1.bf16.msra.mxu1 %v4615_v22 }
 0x3b5   : > { %v2370_v9 = vpop.f32.mrb[49].mxu1  ;;  %v2997_v12 = vld [vmem:[%s7745_s5 + $0x78] sm:$0xff]  ;;  %4617 = vmatprep.subr.bf16.mxu1 %v5148_v40 }
 0x3b6   : > { %v4178_v9 = vld [vmem:[%s7745_s5 + $0x130] sm:$0xff] }
 0x3bc   : > { %v2456_v49 = vpop.f32.mrb[50].mxu1 }
 0x3bd   : > { %v2457_v63 = vpop.f32.mrb[51].mxu1  ;;  %v4179_v49 = vld [vmem:[%s7745_s5 + $0x138] sm:$0xff] }
 0x3be   : > { %v4654_v63 = vpack.c.bf16 %v2997_v12, %v2996_v37 }
 0x3c0   : > { %4655 = vmatpush1.bf16.msra.mxu0 %v4654_v63 }
 0x3c1   : > { %4656 = vmatprep.subr.bf16.mxu0 %v5148_v40 }
 0x3c4   : > { %v2466_v59 = vpop.f32.mrb[52].mxu1  ;;  %4658 = vmatpush1.bf16.msra.mxu0 %v4657_v56 }
 0x3c5   : > { %v2467_v15 = vpop.f32.mrb[53].mxu1  ;;  %v4618_v59 = vpack.c.bf16 %v4179_v49, %v4178_v9  ;;  %4659 = vmatprep.subr.bf16.mxu0 %v5148_v40 }
 0x3c7   : > { %4619 = vmatpush1.bf16.msra.mxu1 %v4618_v59 }
 0x3c8   : > { %4620 = vmatprep.subr.bf16.mxu1 %v5148_v40 }
 0x3cb   : > { %4622 = vmatpush1.bf16.msra.mxu1 %v4621_v53 }
 0x3cc   : > { %v2476_v62 = vpop.f32.mrb[54].mxu1  ;;  %4623 = vmatprep.subr.bf16.mxu1 %v5148_v40 }
 0x3cd   : > { %v2477_v34 = vpop.f32.mrb[55].mxu1  ;;  %v3000_v62 = vld [vmem:[%s7745_s5 + $0x90] sm:$0xff] }
 0x3ce   : > { %v3001_v34 = vld [vmem:[%s7745_s5 + $0x98] sm:$0xff] }
 0x3cf   : > { %v4660_v54 = vpack.c.bf16 %v3001_v34, %v3000_v62 }
 0x3d1   : > { %4661 = vmatpush1.bf16.msra.mxu0 %v4660_v54 }
 0x3d2   : > { %4662 = vmatprep.subr.bf16.mxu0 %v5148_v40 }
 0x3d4   : > { %v2486_v51 = vpop.f32.mrb[56].mxu1 }
 0x3d5   : > { %v2487_v30 = vpop.f32.mrb[57].mxu1  ;;  %v4183_v51 = vld [vmem:[%s7745_s5 + $0x158] sm:$0xff] }
 0x3d6   : > { %v3002_v30 = vld [vmem:[%s7745_s5 + $0xa0] sm:$0xff]  ;;  %v4624_v3 = vpack.c.bf16 %v4183_v51, %v4182_v48 }
 0x3d7   : > { %v4663_v14 = vpack.c.bf16 %v3003_v8, %v3002_v30 }
 0x3d8   : > { %4625 = vmatpush1.bf16.msra.mxu1 %v4624_v3 }
 0x3d9   : > { %4664 = vmatpush1.bf16.msra.mxu0 %v4663_v14  ;;  %4626 = vmatprep.subr.bf16.mxu1 %v5148_v40 }
 0x3da   : > { %4665 = vmatprep.subr.bf16.mxu0 %v5148_v40 }
 0x3dc   : > { %v2496_v19 = vpop.f32.mrb[58].mxu1 }
 0x3dd   : > { %v2497_v0 = vpop.f32.mrb[59].mxu1  ;;  %v4185_v19 = vld [vmem:[%s7745_s5 + $0x168] sm:$0xff] }
 0x3de   : > { %v3004_v0 = vld [vmem:[%s7745_s5 + $0xb0] sm:$0xff]  ;;  %v4627_v29 = vpack.c.bf16 %v4185_v19, %v4184_v17 }
 0x3df   : > { %v4666_v47 = vpack.c.bf16 %v3005_v27, %v3004_v0 }
 0x3e0   : > { %4628 = vmatpush1.bf16.msra.mxu1 %v4627_v29 }
 0x3e1   : > { %4629 = vmatprep.subr.bf16.mxu1 %v5148_v40  ;;  %4667 = vmatpush1.bf16.msra.mxu0 %v4666_v47 }
 0x3e2   : > { %4704 = vmatprep.subr.bf16.mxu0 %v5148_v40 }
 0x3e4   : > { %v2506_v60 = vpop.f32.mrb[60].mxu1 }
 0x3e5   : > { %v2507_v11 = vpop.f32.mrb[61].mxu1  ;;  %v4630_v60 = vpack.c.bf16 %v4187_v52, %v4186_v36 }
 0x3e7   : > { %4631 = vmatpush1.bf16.msra.mxu1 %v4630_v60 }
 0x3e8   : > { %4668 = vmatprep.subr.bf16.mxu1 %v5148_v40 }
 0x3ec   : > { %v2516_v33 = vpop.f32.mrb[62].mxu1 }
 0x3ed   : > { %v2517_v25 = vpop.f32.mrb[63].mxu1  ;;  %v7819_v33 = vld [vmem:[#allocation7_spill] sm:$0xff] }
 0x3ee   : > { %v7820_v61 = vsub.s32 0, %v7819_v33  ;;  %v7821_v13 = vsub.s32 1, %v7819_v33 }
 0x3f0   : > { %v7139_v25 = vrot.slane %v2843_v45, %v7820_v61  ;;  %v7143_v24 = vrot.slane %v2843_v45, %v7821_v13 }
 0x3f4   : > { %v2526_v43 = vpop.f32.mrb[64].mxu1 }
 0x3f5   : > { %v2527_v2 = vpop.f32.mrb[65].mxu1 }
 0x3fc   : > { %v2536_v26 = vpop.f32.mrb[66].mxu1 }
 0x3fd   : > { %v2537_v32 = vpop.f32.mrb[67].mxu1 }
 0x404   : > { %v2546_v39 = vpop.f32.mrb[68].mxu1 }
 0x405   : > { %v2547_v15 = vpop.f32.mrb[69].mxu1 }
 0x40c   : > { %v2556_v5 = vpop.f32.mrb[70].mxu1 }
 0x40d   : > { %v2557_v21 = vpop.f32.mrb[71].mxu1 }
 0x414   : > { %v2566_v50 = vpop.f32.mrb[72].mxu1 }
 0x415   : > { %v2567_v11 = vpop.f32.mrb[73].mxu1 }
 0x418   : > { %v2570_v10 = vpop.f32.mrb[74].mxu1 }
 0x419   : > { %v2571_v7 = vpop.f32.mrb[75].mxu1 }
 0x41c   : > { %v2696_v20 = vpop.f32.mrb[0].mxu1 }
 0x41d   : > { %v2698_v38 = vpop.f32.mrb[1].mxu1  ;;  %v2855_v2 = vadd.f32 %v7139_v25, %v2696_v20 }
 0x41e   : > { %v2856_v44 = vadd.f32 %v7143_v24, %v2698_v38 }
 0x41f   : > { %v2879_v55 = vmax.f32 %v2855_v2, 0.0 }
 0x420   : > { %v2702_v58 = vpop.f32.mrb[76].mxu1  ;;  %v2880_v32 = vmax.f32 %v2856_v44, 0.0 }
 0x421   : > { %v2703_v43 = vpop.f32.mrb[77].mxu1 }
 0x424   : > { %v2706_v6 = vpop.f32.mrb[4].mxu1 }
 0x425   : > { %v2857_v31 = vadd.f32 %v7139_v25, %v2706_v6  ;;  %v2708_v26 = vpop.f32.mrb[5].mxu1 }
 0x426   : > { %v2858_v18 = vadd.f32 %v7143_v24, %v2708_v26 }
 0x427   : > { %v2881_v28 = vmax.f32 %v2857_v31, 0.0 }
 0x428   : > { %v2882_v1 = vmax.f32 %v2858_v18, 0.0  ;;  %v2712_v4 = vpop.f32.mrb[78].mxu1 }
 0x429   : > { %v7149_v23 = vmax.f32 %v2879_v55, %v2881_v28  ;;  %v2713_v46 = vpop.f32.mrb[79].mxu1 }
 0x42a   : > { %v7151_v41 = vmax.f32 %v2880_v32, %v2882_v1 }
 0x42c   : > { %v2716_v37 = vpop.f32.mrb[8].mxu1 }
 0x42d   : > { %v2718_v22 = vpop.f32.mrb[9].mxu1  ;;  %v2859_v49 = vadd.f32 %v7139_v25, %v2716_v37 }
 0x42e   : > { %v2860_v63 = vadd.f32 %v7143_v24, %v2718_v22 }
 0x42f   : > { %v2883_v15 = vmax.f32 %v2859_v49, 0.0 }
 0x430   : > { %v2722_v12 = vpop.f32.mrb[80].mxu1  ;;  %v2884_v35 = vmax.f32 %v2860_v63, 0.0 }
 0x431   : > { %v2723_v9 = vpop.f32.mrb[81].mxu1 }
 0x434   : > { %v2726_v57 = vpop.f32.mrb[12].mxu1 }
 0x435   : > { %v2861_v42 = vadd.f32 %v7139_v25, %v2726_v57  ;;  %v2728_v39 = vpop.f32.mrb[13].mxu1 }
 0x436   : > { %v2862_v59 = vadd.f32 %v7143_v24, %v2728_v39 }
 0x437   : > { %v2885_v56 = vmax.f32 %v2861_v42, 0.0 }
 0x438   : > { %v2886_v16 = vmax.f32 %v2862_v59, 0.0  ;;  %v2732_v62 = vpop.f32.mrb[82].mxu1 }
 0x439   : > { %v7157_v34 = vmax.f32 %v2883_v15, %v2885_v56  ;;  %v2733_v53 = vpop.f32.mrb[83].mxu1 }
 0x43a   : > { %v7159_v54 = vmax.f32 %v2884_v35, %v2886_v16 }
 0x43b   : > { %v5066_v48 = vpack.i.bf16 %v7149_v23, %v7157_v34 }
 0x43c   : > { %v2736_v51 = vpop.f32.mrb[16].mxu1  ;;  %2933 = vrot.lane.b32.xlu0 %v7159_v54, %s5149_s26 }
 0x43d   : > { %v2738_v30 = vpop.f32.mrb[17].mxu1  ;;  %5067 = vrot.lane.b32.xlu1 %v5066_v48, %s5149_s26  ;;  %v2863_v3 = vadd.f32 %v7139_v25, %v2736_v51 }
 0x43e   : > { %v2864_v21 = vadd.f32 %v7143_v24, %v2738_v30 }
 0x43f   : > { %v2887_v27 = vmax.f32 %v2863_v3, 0.0 }
 0x440   : > { %v2742_v8 = vpop.f32.mrb[84].mxu1  ;;  %v2888_v36 = vmax.f32 %v2864_v21, 0.0 }
 0x441   : > { %v2743_v5 = vpop.f32.mrb[85].mxu1  ;;  %2929 = vrot.lane.b32.xlu1 %v7151_v41, %s5149_s26 }
 0x444   : > { %v2746_v14 = vpop.f32.mrb[20].mxu1 }
 0x445   : > { %v2865_v17 = vadd.f32 %v7139_v25, %v2746_v14  ;;  %v2748_v19 = vpop.f32.mrb[21].mxu1 }
 0x446   : > { %v2866_v0 = vadd.f32 %v7143_v24, %v2748_v19 }
 0x447   : > { %v2889_v29 = vmax.f32 %v2865_v17, 0.0 }
 0x448   : > { %v2890_v52 = vmax.f32 %v2866_v0, 0.0  ;;  %v2752_v47 = vpop.f32.mrb[86].mxu1 }
 0x449   : > { %v7172_v50 = vmax.f32 %v2887_v27, %v2889_v29  ;;  %v2753_v60 = vpop.f32.mrb[87].mxu1 }
 0x44a   : > { %v7174_v11 = vmax.f32 %v2888_v36, %v2890_v52 }
 0x44c   : > { %v2756_v10 = vpop.f32.mrb[24].mxu1  ;;  %2937 = vrot.lane.b32.xlu1 %v7174_v11, %s5149_s26 }
 0x44d   : > { %v2758_v7 = vpop.f32.mrb[25].mxu1  ;;  %v2867_v38 = vadd.f32 %v7139_v25, %v2756_v10 }
 0x44e   : > { %v2868_v33 = vadd.f32 %v7143_v24, %v2758_v7 }
 0x44f   : > { %v2891_v2 = vmax.f32 %v2867_v38, 0.0  ;;  %v4190_v38 = vld [vmem:[%s7745_s5 + $0x180] sm:$0xff] }
 0x450   : > { %v2762_v20 = vpop.f32.mrb[88].mxu1  ;;  %v2892_v6 = vmax.f32 %v2868_v33, 0.0  ;;  %v4191_v33 = vld [vmem:[%s7745_s5 + $0x188] sm:$0xff] }
 0x451   : > { %v2763_v45 = vpop.f32.mrb[89].mxu1 }
 0x454   : > { %v2766_v61 = vpop.f32.mrb[28].mxu1 }
 0x455   : > { %v2869_v13 = vadd.f32 %v7139_v25, %v2766_v61  ;;  %v2768_v58 = vpop.f32.mrb[29].mxu1 }
 0x456   : > { %v2870_v43 = vadd.f32 %v7143_v24, %v2768_v58 }
 0x457   : > { %v2893_v44 = vmax.f32 %v2869_v13, 0.0  ;;  %v4215_v13 = vld [vmem:[%s7745_s5 + $0x240] sm:$0xff] }
 0x458   : > { %v2894_v31 = vmax.f32 %v2870_v43, 0.0  ;;  %v2772_v26 = vpop.f32.mrb[90].mxu1 }
 0x459   : > { %v7182_v18 = vmax.f32 %v2891_v2, %v2893_v44  ;;  %v2773_v55 = vpop.f32.mrb[91].mxu1  ;;  %v4669_v2 = vpack.c.bf16 %v4191_v33, %v4190_v38  ;;  %v4193_v26 = vld [vmem:[%s7745_s5 + $0x198] sm:$0xff] }
 0x45a   : > { %v7184_v28 = vmax.f32 %v2892_v6, %v2894_v31  ;;  %v4192_v31 = vld [vmem:[%s7745_s5 + $0x190] sm:$0xff] }
 0x45b   : > { %v5071_v32 = vpack.i.bf16 %v7182_v18, %v7172_v50 }
 0x45c   : > { %v2776_v1 = vpop.f32.mrb[32].mxu1 }
 0x45d   : > { %v2871_v4 = vadd.f32 %v7139_v25, %v2776_v1  ;;  %v2778_v46 = vpop.f32.mrb[33].mxu1  ;;  %5072 = vrot.lane.b32.xlu0 %v5071_v32, %s5149_s26 }
 0x45e   : > { %v2872_v12 = vadd.f32 %v7143_v24, %v2778_v46  ;;  %v4218_v46 = vld [vmem:[%s7745_s5 + $0x258] sm:$0xff] }
 0x45f   : > { %v2895_v42 = vmax.f32 %v2871_v4, 0.0 }
 0x460   : > { %v2782_v37 = vpop.f32.mrb[92].mxu1  ;;  %v2896_v59 = vmax.f32 %v2872_v12, 0.0  ;;  %v4219_v12 = vld [vmem:[%s7745_s5 + $0x260] sm:$0xff] }
 0x461   : > { %v2783_v22 = vpop.f32.mrb[93].mxu1  ;;  %2941 = vrot.lane.b32.xlu0 %v7184_v28, %s5149_s26  ;;  %v4672_v37 = vpack.c.bf16 %v4193_v26, %v4192_v31  ;;  %v4209_v31 = vld [vmem:[%s7745_s5 + $0x218] sm:$0xff] }
 0x464   : > { %v2786_v9 = vpop.f32.mrb[36].mxu1 }
 0x465   : > { %v2873_v49 = vadd.f32 %v7139_v25, %v2786_v9  ;;  %v2788_v63 = vpop.f32.mrb[37].mxu1  ;;  %v4220_v9 = vld [vmem:[%s7745_s5 + $0x268] sm:$0xff] }
 0x466   : > { %v2874_v57 = vadd.f32 %v7143_v24, %v2788_v63  ;;  %v4196_v63 = vld [vmem:[%s7745_s5 + $0x1b0] sm:$0xff] }
 0x467   : > { %v2897_v39 = vmax.f32 %v2873_v49, 0.0 }
 0x468   : > { %v2898_v15 = vmax.f32 %v2874_v57, 0.0  ;;  %v2792_v56 = vpop.f32.mrb[94].mxu1  ;;  %v4197_v57 = vld [vmem:[%s7745_s5 + $0x1b8] sm:$0xff] }
 0x469   : > { %v7195_v35 = vmax.f32 %v2895_v42, %v2897_v39  ;;  %v2793_v16 = vpop.f32.mrb[95].mxu1  ;;  %v4711_v42 = vpack.c.bf16 %v4220_v9, %v4219_v12  ;;  %v4221_v39 = vld [vmem:[%s7745_s5 + $0x270] sm:$0xff]  ;;  %v4678_v56 = vpack.c.bf16 %v4197_v57, %v4196_v63  ;;  %v4213_v12 = vld [vmem:[%s7745_s5 + $0x238] sm:$0xff] }
 0x46a   : > { %v7197_v62 = vmax.f32 %v2896_v59, %v2898_v15  ;;  %v4222_v59 = vld [vmem:[%s7745_s5 + $0x278] sm:$0xff]  ;;  %v4237_v63 = vld [vmem:[%s7745_s5 + $0x2f0] sm:$0xff] }
 0x46b   : > { %v4238_v57 = vld [vmem:[%s7745_s5 + $0x2f8] sm:$0xff] }
 0x46c   : > { %v2796_v53 = vpop.f32.mrb[40].mxu1  ;;  %2945 = vrot.lane.b32.xlu0 %v7197_v62, %s5149_s26 }
 0x46d   : > { %v2875_v48 = vadd.f32 %v7139_v25, %v2796_v53  ;;  %v2798_v51 = vpop.f32.mrb[41].mxu1  ;;  %v4198_v53 = vld [vmem:[%s7745_s5 + $0x1c0] sm:$0xff] }
 0x46e   : > { %v2876_v5 = vadd.f32 %v7143_v24, %v2798_v51  ;;  %v4714_v51 = vpack.c.bf16 %v4222_v59, %v4221_v39  ;;  %v4240_v39 = vld [vmem:[%s7745_s5 + $0x300] sm:$0xff]  ;;  %v4241_v59 = vld [vmem:[%s7745_s5 + $0x308] sm:$0xff] }
 0x46f   : > { %v2899_v19 = vmax.f32 %v2875_v48, 0.0  ;;  %v4199_v48 = vld [vmem:[%s7745_s5 + $0x1c8] sm:$0xff] }
 0x470   : > { %v2802_v30 = vpop.f32.mrb[96].mxu1  ;;  %v2900_v27 = vmax.f32 %v2876_v5, 0.0  ;;  %v4200_v5 = vld [vmem:[%s7745_s5 + $0x1d0] sm:$0xff] }
 0x471   : > { %v2803_v8 = vpop.f32.mrb[97].mxu1  ;;  %v4224_v30 = vld [vmem:[%s7745_s5 + $0x288] sm:$0xff] }
 0x472   : > { %v4681_v8 = vpack.c.bf16 %v4199_v48, %v4198_v53  ;;  %v4738_v53 = vpack.c.bf16 %v4238_v57, %v4237_v63  ;;  %v4256_v63 = vld [vmem:[%s7745_s5 + $0x380] sm:$0xff]  ;;  %v4257_v57 = vld [vmem:[%s7745_s5 + $0x388] sm:$0xff] }
 0x474   : > { %v2806_v3 = vpop.f32.mrb[44].mxu1 }
 0x475   : > { %v2877_v21 = vadd.f32 %v7139_v25, %v2806_v3  ;;  %v2808_v14 = vpop.f32.mrb[45].mxu1  ;;  %v4201_v3 = vld [vmem:[%s7745_s5 + $0x1d8] sm:$0xff] }
 0x476   : > { %v2878_v17 = vadd.f32 %v7143_v24, %v2808_v14  ;;  %v4225_v14 = vld [vmem:[%s7745_s5 + $0x290] sm:$0xff] }
 0x477   : > { %v2901_v0 = vmax.f32 %v2877_v21, 0.0 }
 0x478   : > { %v2902_v29 = vmax.f32 %v2878_v17, 0.0  ;;  %v2812_v36 = vpop.f32.mrb[98].mxu1  ;;  %v4226_v17 = vld [vmem:[%s7745_s5 + $0x298] sm:$0xff] }
 0x479   : > { %v7205_v52 = vmax.f32 %v2899_v19, %v2901_v0  ;;  %v2813_v47 = vpop.f32.mrb[99].mxu1  ;;  %v4684_v19 = vpack.c.bf16 %v4201_v3, %v4200_v5  ;;  %v4202_v0 = vld [vmem:[%s7745_s5 + $0x1e0] sm:$0xff]  ;;  %v4242_v5 = vld [vmem:[%s7745_s5 + $0x310] sm:$0xff]  ;;  %v4243_v3 = vld [vmem:[%s7745_s5 + $0x318] sm:$0xff] }
 0x47a   : > { %v7207_v60 = vmax.f32 %v2900_v27, %v2902_v29  ;;  %v4203_v27 = vld [vmem:[%s7745_s5 + $0x1e8] sm:$0xff]  ;;  %v4720_v29 = vpack.c.bf16 %v4226_v17, %v4225_v14  ;;  %v4227_v36 = vld [vmem:[%s7745_s5 + $0x2a0] sm:$0xff] }
 0x47b   : > { %v5076_v10 = vpack.i.bf16 %v7205_v52, %v7195_v35  ;;  %v4228_v47 = vld [vmem:[%s7745_s5 + $0x2a8] sm:$0xff] }
 0x47c   : > { %v2816_v7 = vpop.f32.mrb[100].mxu1 }
 0x47d   : > { %5077 = vrot.lane.b32.xlu1 %v5076_v10, %s5149_s26  ;;  %v2817_v25 = vpop.f32.mrb[101].mxu1  ;;  %v4687_v10 = vpack.c.bf16 %v4203_v27, %v4202_v0  ;;  %v4204_v7 = vld [vmem:[%s7745_s5 + $0x1f0] sm:$0xff]  ;;  %v4744_v0 = vpack.c.bf16 %v4243_v3, %v4242_v5  ;;  %v4261_v5 = vld [vmem:[%s7745_s5 + $0x3a8] sm:$0xff] }
 0x47e   : > { %v4205_v25 = vld [vmem:[%s7745_s5 + $0x1f8] sm:$0xff] }
 0x47f   : > { %v4690_v38 = vpack.c.bf16 %v4205_v25, %v4204_v7  ;;  %v4247_v7 = vld [vmem:[%s7745_s5 + $0x338] sm:$0xff] }
 0x481   : > { %2949 = vrot.lane.b32.xlu1 %v7207_v60, %s5149_s26 }
 0x4ae   : > { %v2934_v24 = vpop.permute.xlu0 %2933 }
 0x4af   : > { %v2973_v20 = vmax.f32 %v7159_v54, %v2934_v24  ;;  %v5068_v45 = vpop.permute.xlu1 %5067  ;;  %v4216_v54 = vld [vmem:[%s7745_s5 + $0x248] sm:$0xff] }
 0x4b0   : > { %v5069_v61 = vunpack.i.l.bf16 %v5068_v45  ;;  %v5070_v58 = vunpack.i.h.bf16 %v5068_v45  ;;  %v4705_v1 = vpack.c.bf16 %v4216_v54, %v4215_v13  ;;  %v4230_v45 = vld [vmem:[%s7745_s5 + $0x2b8] sm:$0xff]  ;;  %v4207_v13 = vld [vmem:[%s7745_s5 + $0x208] sm:$0xff] }
 0x4b1   : > { %4188 = vmatprep.mubr.msk.f32.mxu1 %vm3031_vm6, %v2973_v20  ;;  %v4229_v20 = vld [vmem:[%s7745_s5 + $0x2b0] sm:$0xff] }
 0x4b2   : > { %v2953_v43 = vsel %vm2951_vm7, %v5069_v61, %v2934_v24  ;;  %v4723_v24 = vpack.c.bf16 %v4228_v47, %v4227_v36  ;;  %v4206_v61 = vld [vmem:[%s7745_s5 + $0x200] sm:$0xff]  ;;  %v4726_v54 = vpack.c.bf16 %v4230_v45, %v4229_v20  ;;  %v4270_v36 = vld [vmem:[%s7745_s5 + $0x3e8] sm:$0xff]  ;;  %v4272_v20 = vld [vmem:[%s7745_s5 + $0x3f8] sm:$0xff] }
 0x4b3   : > { %v2972_v44 = vmax.f32 %v7157_v34, %v2953_v43  ;;  %v2930_v6 = vpop.permute.xlu1 %2929  ;;  %v4217_v34 = vld [vmem:[%s7745_s5 + $0x250] sm:$0xff]  ;;  %v4232_v43 = vld [vmem:[%s7745_s5 + $0x2c8] sm:$0xff] }
 0x4b4   : > { %v2952_v55 = vsel %vm2951_vm7, %v5070_v58, %v2930_v6  ;;  %v2971_v32 = vmax.f32 %v7151_v41, %v2930_v6  ;;  %v4195_v41 = vld [vmem:[%s7745_s5 + $0x1a8] sm:$0xff]  ;;  %v4708_v22 = vpack.c.bf16 %v4218_v46, %v4217_v34  ;;  %v4231_v58 = vld [vmem:[%s7745_s5 + $0x2c0] sm:$0xff]  ;;  %v4208_v6 = vld [vmem:[%s7745_s5 + $0x210] sm:$0xff] }
 0x4b5   : > { %v2970_v4 = vmax.f32 %v7149_v23, %v2952_v55  ;;  %3100 = vmatmul.mubr.f32.vlgmr.msra.gmra.mrb[102].mxu1 %v2972_v44  ;;  %v4194_v23 = vld [vmem:[%s7745_s5 + $0x1a0] sm:$0xff]  ;;  %v4729_v55 = vpack.c.bf16 %v4232_v43, %v4231_v58  ;;  %v4211_v34 = vld [vmem:[%s7745_s5 + $0x228] sm:$0xff] }
 0x4b6   : > { %4670 = vmatpush1.bf16.msra.mxu1 %v4669_v2  ;;  %4189 = vmatprep.mubr.msk.f32.mxu0 %vm3031_vm6, %v2971_v32  ;;  %v4675_v49 = vpack.c.bf16 %v4195_v41, %v4194_v23  ;;  %v4693_v2 = vpack.c.bf16 %v4207_v13, %v4206_v61  ;;  %v4233_v32 = vld [vmem:[%s7745_s5 + $0x2d0] sm:$0xff]  ;;  %v4236_v23 = vld [vmem:[%s7745_s5 + $0x2e8] sm:$0xff] }
 0x4b7   : > { %3173 = vmatmul.mubr.f32.vlgmr.msra.gmra.mrb[60].mxu0 %v2970_v4  ;;  %4671 = vmatprep.subr.bf16.mxu1 %v5148_v40  ;;  %v4696_v4 = vpack.c.bf16 %v4209_v31, %v4208_v6  ;;  %v4249_v61 = vld [vmem:[%s7745_s5 + $0x348] sm:$0xff]  ;;  %v4251_v6 = vld [vmem:[%s7745_s5 + $0x358] sm:$0xff] }
 0x4b8   : > { %4706 = vmatpush1.bf16.msra.mxu0 %v4705_v1  ;;  %v4234_v1 = vld [vmem:[%s7745_s5 + $0x2d8] sm:$0xff]  ;;  %v4274_v58 = vld [vmem:[%s7745_s5 + $0x408] sm:$0xff] }
 0x4b9   : > { %4707 = vmatprep.subr.bf16.mxu0 %v5148_v40  ;;  %v4732_v46 = vpack.c.bf16 %v4234_v1, %v4233_v32  ;;  %v4276_v32 = vld [vmem:[%s7745_s5 + $0x418] sm:$0xff] }
 0x4ba   : > { %4673 = vmatpush1.bf16.msra.mxu1 %v4672_v37  ;;  %v4235_v37 = vld [vmem:[%s7745_s5 + $0x2e0] sm:$0xff] }
 0x4bb   : > { %4674 = vmatprep.subr.bf16.mxu1 %v5148_v40 }
 0x4bc   : > { %4709 = vmatpush1.bf16.msra.mxu0 %v4708_v22  ;;  %v4212_v22 = vld [vmem:[%s7745_s5 + $0x230] sm:$0xff] }
 0x4bd   : > { %4710 = vmatprep.subr.bf16.mxu0 %v5148_v40 }
 0x4be   : > { %4676 = vmatpush1.bf16.msra.mxu1 %v4675_v49  ;;  %v7274_v15 = vpop.permute.xlu1 %2937  ;;  %v4735_v49 = vpack.c.bf16 %v4236_v23, %v4235_v37  ;;  %v4254_v23 = vld [vmem:[%s7745_s5 + $0x370] sm:$0xff] }
 0x4bf   : > { %v2975_v16 = vmax.f32 %v7174_v11, %v7274_v15  ;;  %4677 = vmatprep.subr.bf16.mxu1 %v5148_v40  ;;  %v4223_v11 = vld [vmem:[%s7745_s5 + $0x280] sm:$0xff] }
 0x4c0   : > { %4712 = vmatpush1.bf16.msra.mxu0 %v4711_v42  ;;  %v4717_v21 = vpack.c.bf16 %v4224_v30, %v4223_v11  ;;  %v4702_v42 = vpack.c.bf16 %v4213_v12, %v4212_v22  ;;  %v4266_v11 = vld [vmem:[%s7745_s5 + $0x3c8] sm:$0xff]  ;;  %v4279_v12 = vld [vmem:[%s7745_s5 + $0x430] sm:$0xff] }
 0x4c1   : > { %4214 = vmatprep.mubr.msk.f32.mxu1 %vm3031_vm6, %v2975_v16  ;;  %4713 = vmatprep.subr.bf16.mxu0 %v5148_v40 }
 0x4c2   : > { %4679 = vmatpush1.bf16.msra.mxu1 %v4678_v56 }
 0x4c3   : > { %4680 = vmatprep.subr.bf16.mxu1 %v5148_v40 }
 0x4c4   : > { %4715 = vmatpush1.bf16.msra.mxu0 %v4714_v51  ;;  %v4265_v51 = vld [vmem:[%s7745_s5 + $0x3c0] sm:$0xff] }
 0x4c5   : > { %4716 = vmatprep.subr.bf16.mxu0 %v5148_v40  ;;  %v4777_v14 = vpack.c.bf16 %v4266_v11, %v4265_v51  ;;  %v4283_v11 = vld [vmem:[%s7745_s5 + $0x450] sm:$0xff] }
 0x4c6   : > { %4682 = vmatpush1.bf16.msra.mxu1 %v4681_v8  ;;  %v4741_v8 = vpack.c.bf16 %v4241_v59, %v4240_v39  ;;  %v4281_v39 = vld [vmem:[%s7745_s5 + $0x440] sm:$0xff]  ;;  %v4282_v59 = vld [vmem:[%s7745_s5 + $0x448] sm:$0xff] }
 0x4c7   : > { %4683 = vmatprep.subr.bf16.mxu1 %v5148_v40  ;;  %v4801_v51 = vpack.c.bf16 %v4282_v59, %v4281_v39 }
 0x4c8   : > { %4718 = vmatpush1.bf16.msra.mxu0 %v4717_v21 }
 0x4c9   : > { %4719 = vmatprep.subr.bf16.mxu0 %v5148_v40 }
 0x4ca   : > { %4685 = vmatpush1.bf16.msra.mxu1 %v4684_v19  ;;  %v4268_v19 = vld [vmem:[%s7745_s5 + $0x3d8] sm:$0xff] }
 0x4cb   : > { %4686 = vmatprep.subr.bf16.mxu1 %v5148_v40 }
 0x4cc   : > { %4721 = vmatpush1.bf16.msra.mxu0 %v4720_v29  ;;  %v4269_v29 = vld [vmem:[%s7745_s5 + $0x3e0] sm:$0xff] }
 0x4cd   : > { %4722 = vmatprep.subr.bf16.mxu0 %v5148_v40  ;;  %v4783_v25 = vpack.c.bf16 %v4270_v36, %v4269_v29 }
 0x4ce   : > { %4688 = vmatpush1.bf16.msra.mxu1 %v4687_v10  ;;  %v4246_v10 = vld [vmem:[%s7745_s5 + $0x330] sm:$0xff] }
 0x4cf   : > { %v5073_v33 = vpop.permute.xlu0 %5072  ;;  %4689 = vmatprep.subr.bf16.mxu1 %v5148_v40  ;;  %v4750_v45 = vpack.c.bf16 %v4247_v7, %v4246_v10 }
 0x4d0   : > { %4724 = vmatpush1.bf16.msra.mxu0 %v4723_v24  ;;  %v5074_v9 = vunpack.i.l.bf16 %v5073_v33  ;;  %v5075_v56 = vunpack.i.h.bf16 %v5073_v33  ;;  %v4271_v24 = vld [vmem:[%s7745_s5 + $0x3f0] sm:$0xff]  ;;  %v4248_v33 = vld [vmem:[%s7745_s5 + $0x340] sm:$0xff] }
 0x4d1   : > { %4725 = vmatprep.subr.bf16.mxu0 %v5148_v40  ;;  %v4786_v13 = vpack.c.bf16 %v4272_v20, %v4271_v24  ;;  %v4753_v43 = vpack.c.bf16 %v4249_v61, %v4248_v33  ;;  %v3584_v20 = vld [vmem:[%s7747_s7 + $0x8] sm:$0xff]  ;;  %v3587_v33 = vld [vmem:[%s7747_s7 + $0x20] sm:$0xff] }
 0x4d2   : > { %4691 = vmatpush1.bf16.msra.mxu1 %v4690_v38  ;;  %v2954_v16 = vsel %vm2951_vm7, %v5074_v9, %v7274_v15  ;;  %v4280_v9 = vld [vmem:[%s7745_s5 + $0x438] sm:$0xff]  ;;  %v3588_v61 = vld [vmem:[%s7747_s7 + $0x28] sm:$0xff] }
 0x4d3   : > { %v2942_v44 = vpop.permute.xlu0 %2941  ;;  %4692 = vmatprep.subr.bf16.mxu1 %v5148_v40  ;;  %v2974_v15 = vmax.f32 %v7172_v50, %v2954_v16  ;;  %v4267_v50 = vld [vmem:[%s7745_s5 + $0x3d0] sm:$0xff] }
 0x4d4   : > { %4727 = vmatpush1.bf16.msra.mxu0 %v4726_v54  ;;  %v2977_v26 = vmax.f32 %v7184_v28, %v2942_v44  ;;  %v4210_v28 = vld [vmem:[%s7745_s5 + $0x220] sm:$0xff]  ;;  %v2955_v30 = vsel %vm2951_vm7, %v5075_v56, %v2942_v44  ;;  %v4780_v27 = vpack.c.bf16 %v4268_v19, %v4267_v50  ;;  %v4250_v44 = vld [vmem:[%s7745_s5 + $0x350] sm:$0xff]  ;;  %v4765_v56 = vpack.c.bf16 %v4257_v57, %v4256_v63  ;;  %v4263_v19 = vld [vmem:[%s7745_s5 + $0x3b8] sm:$0xff] }
 0x4d5   : > { %4728 = vmatprep.subr.bf16.mxu0 %v5148_v40  ;;  %v4699_v41 = vpack.c.bf16 %v4211_v34, %v4210_v28  ;;  %v2976_v17 = vmax.f32 %v7182_v18, %v2955_v30  ;;  %v4244_v18 = vld [vmem:[%s7745_s5 + $0x320] sm:$0xff]  ;;  %v4756_v1 = vpack.c.bf16 %v4251_v6, %v4250_v44  ;;  %v4258_v16 = vld [vmem:[%s7745_s5 + $0x390] sm:$0xff]  ;;  %v4284_v30 = vld [vmem:[%s7745_s5 + $0x458] sm:$0xff] }
 0x4d6   : > { %4694 = vmatpush1.bf16.msra.mxu1 %v4693_v2  ;;  %4239 = vmatprep.mubr.msk.f32.mxu0 %vm3031_vm6, %v2977_v26  ;;  %v4273_v54 = vld [vmem:[%s7745_s5 + $0x400] sm:$0xff]  ;;  %v4804_v3 = vpack.c.bf16 %v4284_v30, %v4283_v11  ;;  %v4262_v50 = vld [vmem:[%s7745_s5 + $0x3b0] sm:$0xff]  ;;  %v3592_v44 = vld [vmem:[%s7747_s7 + $0x48] sm:$0xff] }
 0x4d7   : > { %4695 = vmatprep.subr.bf16.mxu1 %v5148_v40  ;;  %v4789_v26 = vpack.c.bf16 %v4274_v58, %v4273_v54  ;;  %v4277_v34 = vld [vmem:[%s7745_s5 + $0x420] sm:$0xff]  ;;  %v4774_v29 = vpack.c.bf16 %v4263_v19, %v4262_v50  ;;  %v3589_v54 = vld [vmem:[%s7747_s7 + $0x30] sm:$0xff]  ;;  %v3590_v58 = vld [vmem:[%s7747_s7 + $0x38] sm:$0xff] }
 0x4d8   : > { %4730 = vmatpush1.bf16.msra.mxu0 %v4729_v55  ;;  %v4275_v55 = vld [vmem:[%s7745_s5 + $0x410] sm:$0xff]  ;;  %v3680_v11 = vld [vmem:[%s7749_s9] sm:$0xff]  ;;  %v3681_v30 = vld [vmem:[%s7749_s9 + $0x8] sm:$0xff] }
 0x4d9   : > { %4731 = vmatprep.subr.bf16.mxu0 %v5148_v40  ;;  %v4792_v28 = vpack.c.bf16 %v4276_v32, %v4275_v55  ;;  %v3595_v32 = vld [vmem:[%s7747_s7 + $0x60] sm:$0xff]  ;;  %v3685_v50 = vld [vmem:[%s7749_s9 + $0x28] sm:$0xff] }
 0x4da   : > { %4697 = vmatpush1.bf16.msra.mxu1 %v4696_v4  ;;  %v4253_v4 = vld [vmem:[%s7745_s5 + $0x368] sm:$0xff] }
 0x4db   : > { %4698 = vmatprep.subr.bf16.mxu1 %v5148_v40 }
 0x4dc   : > { %4733 = vmatpush1.bf16.msra.mxu0 %v4732_v46  ;;  %v4278_v46 = vld [vmem:[%s7745_s5 + $0x428] sm:$0xff] }
 0x4dd   : > { %4734 = vmatprep.subr.bf16.mxu0 %v5148_v40  ;;  %v4795_v22 = vpack.c.bf16 %v4278_v46, %v4277_v34 }
 0x4de   : > { %4700 = vmatpush1.bf16.msra.mxu1 %v4699_v41  ;;  %v7402_v48 = vpop.permute.xlu0 %2945  ;;  %v4255_v41 = vld [vmem:[%s7745_s5 + $0x378] sm:$0xff] }
 0x4df   : > { %4701 = vmatprep.subr.bf16.mxu1 %v5148_v40  ;;  %v2979_v21 = vmax.f32 %v7197_v62, %v7402_v48  ;;  %v4245_v62 = vld [vmem:[%s7745_s5 + $0x328] sm:$0xff] }
 0x4e0   : > { %4736 = vmatpush1.bf16.msra.mxu0 %v4735_v49  ;;  %v4747_v47 = vpack.c.bf16 %v4245_v62, %v4244_v18  ;;  %v4762_v49 = vpack.c.bf16 %v4255_v41, %v4254_v23  ;;  %v4287_v62 = vld [vmem:[%s7745_s5 + $0x470] sm:$0xff] }
 0x4e1   : > { %4737 = vmatprep.subr.bf16.mxu0 %v5148_v40 }
 0x4e2   : > { %4703 = vmatpush1.bf16.msra.mxu1 %v4702_v42  ;;  %v4798_v42 = vpack.c.bf16 %v4280_v9, %v4279_v12 }
 0x4e3   : > { %4740 = vmatprep.subr.bf16.mxu1 %v5148_v40 }
 0x4e4   : > { %4739 = vmatpush1.bf16.msra.mxu0 %v4738_v53  ;;  %v4259_v53 = vld [vmem:[%s7745_s5 + $0x398] sm:$0xff] }
 0x4e5   : > { %3271 = vmatmul.mubr.f32.vlgmr.msra.gmra.mrb[104].mxu1 %v2974_v15  ;;  %4776 = vmatprep.subr.bf16.mxu0 %v5148_v40  ;;  %v4260_v15 = vld [vmem:[%s7745_s5 + $0x3a0] sm:$0xff] }
 0x4e6   : > { %4742 = vmatpush1.bf16.msra.mxu1 %v4741_v8  ;;  %4264 = vmatprep.mubr.msk.f32.mxu1 %vm3031_vm6, %v2979_v21  ;;  %v4768_v8 = vpack.c.bf16 %v4259_v53, %v4258_v16  ;;  %v4285_v21 = vld [vmem:[%s7745_s5 + $0x460] sm:$0xff] }
 0x4e7   : > { %3370 = vmatmul.mubr.f32.vlgmr.msra.gmra.mrb[62].mxu0 %v2976_v17  ;;  %4743 = vmatprep.subr.bf16.mxu1 %v5148_v40  ;;  %v4771_v17 = vpack.c.bf16 %v4261_v5, %v4260_v15  ;;  %v4290_v16 = vld [vmem:[%s7746_s6] ss:$0 sm:$0xff]  ;;  %v4834_v15 = vpack.c.bf16 %v3681_v30, %v3680_v11 }
 0x4e8   : > { %4778 = vmatpush1.bf16.msra.mxu0 %v4777_v14  ;;  %v4286_v14 = vld [vmem:[%s7745_s5 + $0x468] sm:$0xff] }
 0x4e9   : > { %4779 = vmatprep.subr.bf16.mxu0 %v5148_v40  ;;  %v4807_v18 = vpack.c.bf16 %v4286_v14, %v4285_v21  ;;  %v3683_v21 = vld [vmem:[%s7749_s9 + $0x18] sm:$0xff] }
 0x4ea   : > { %4745 = vmatpush1.bf16.msra.mxu1 %v4744_v0 }
 0x4eb   : > { %4746 = vmatprep.subr.bf16.mxu1 %v5148_v40 }
 0x4ec   : > { %4781 = vmatpush1.bf16.msra.mxu0 %v4780_v27  ;;  %v4288_v27 = vld [vmem:[%s7745_s5 + $0x478] sm:$0xff] }
 0x4ed   : > { %4782 = vmatprep.subr.bf16.mxu0 %v5148_v40  ;;  %v4810_v10 = vpack.c.bf16 %v4288_v27, %v4287_v62  ;;  %v3688_v27 = vld [vmem:[%s7749_s9 + $0x40] sm:$0xff] }
 0x4ee   : > { %4748 = vmatpush1.bf16.msra.mxu1 %v4747_v47 }
 0x4ef   : > { %v7459_v38 = vpop.permute.xlu1 %5077  ;;  %4749 = vmatprep.subr.bf16.mxu1 %v5148_v40 }
 0x4f0   : > { %4784 = vmatpush1.bf16.msra.mxu0 %v4783_v25  ;;  %v5079_v0 = vunpack.i.l.bf16 %v7459_v38  ;;  %v5080_v36 = vunpack.i.h.bf16 %v7459_v38  ;;  %v3586_v38 = vld [vmem:[%s7747_s7 + $0x18] sm:$0xff] }
 0x4f1   : > { %4785 = vmatprep.subr.bf16.mxu0 %v5148_v40 }
 0x4f2   : > { %4751 = vmatpush1.bf16.msra.mxu1 %v4750_v45  ;;  %v2956_v47 = vsel %vm2951_vm7, %v5079_v0, %v7402_v48  ;;  %v3583_v48 = vld [vmem:[%s7747_s7] sm:$0xff]  ;;  %v3585_v45 = vld [vmem:[%s7747_s7 + $0x10] sm:$0xff] }
 0x4f3   : > { %v7475_v2 = vpop.permute.xlu1 %2949  ;;  %4752 = vmatprep.subr.bf16.mxu1 %v5148_v40  ;;  %v2978_v25 = vmax.f32 %v7195_v35, %v2956_v47  ;;  %v4813_v35 = vpack.c.bf16 %v3584_v20, %v3583_v48  ;;  %v3686_v0 = vld [vmem:[%s7749_s9 + $0x30] sm:$0xff]  ;;  %v4293_v48 = vld [vmem:[%s7750_s10] ss:$0 sm:$0xff] }
 0x4f4   : > { %v2981_v31 = vmax.f32 %v7207_v60, %v7475_v2  ;;  %4787 = vmatpush1.bf16.msra.mxu0 %v4786_v13  ;;  %v4252_v60 = vld [vmem:[%s7745_s5 + $0x360] sm:$0xff]  ;;  %v2957_v7 = vsel %vm2951_vm7, %v5080_v36, %v7475_v2  ;;  %v4819_v13 = vpack.c.bf16 %v3588_v61, %v3587_v33  ;;  %v3690_v47 = vld [vmem:[%s7749_s9 + $0x50] sm:$0xf] }
 0x4f5   : > { %4788 = vmatprep.subr.bf16.mxu0 %v5148_v40  ;;  %v4759_v37 = vpack.c.bf16 %v4253_v4, %v4252_v60  ;;  %v2980_v24 = vmax.f32 %v7205_v52, %v2957_v7  ;;  %v4816_v52 = vpack.c.bf16 %v3586_v38, %v3585_v45  ;;  %v3591_v2 = vld [vmem:[%s7747_s7 + $0x40] sm:$0xff]  ;;  %v7822_v4 = vmov 0.0  }
 0x4f6   : > { %4754 = vmatpush1.bf16.msra.mxu1 %v4753_v43  ;;  %4289 = vmatprep.mubr.msk.f32.mxu0 %vm3031_vm6, %v2981_v31  ;;  %v4822_v43 = vpack.c.bf16 %v3590_v58, %v3589_v54  ;;  %v4825_v6 = vpack.c.bf16 %v3592_v44, %v3591_v2  ;;  %v3593_v31 = vld [vmem:[%s7747_s7 + $0x50] sm:$0xff] }
 0x4f7   : > { %4755 = vmatprep.subr.bf16.mxu1 %v5148_v40 }
 0x4f8   : > { %4790 = vmatpush1.bf16.msra.mxu0 %v4789_v26  ;;  %v3594_v26 = vld [vmem:[%s7747_s7 + $0x58] sm:$0xff] }
 0x4f9   : > { %4791 = vmatprep.subr.bf16.mxu0 %v5148_v40  ;;  %v4828_v55 = vpack.c.bf16 %v3594_v26, %v3593_v31 }
 0x4fa   : > { %4757 = vmatpush1.bf16.msra.mxu1 %v4756_v1  ;;  %v3596_v1 = vld [vmem:[%s7747_s7 + $0x68] sm:$0xff] }
 0x4fb   : > { %4758 = vmatprep.subr.bf16.mxu1 %v5148_v40  ;;  %v4831_v60 = vpack.c.bf16 %v3596_v1, %v3595_v32 }
 0x4fc   : > { %4793 = vmatpush1.bf16.msra.mxu0 %v4792_v28  ;;  %v3597_v28 = vld [vmem:[%s7747_s7 + $0x70] sm:$0xff] }
 0x4fd   : > { %4794 = vmatprep.subr.bf16.mxu0 %v5148_v40 }
 0x4fe   : > { %4760 = vmatpush1.bf16.msra.mxu1 %v4759_v37 }
 0x4ff   : > { %4761 = vmatprep.subr.bf16.mxu1 %v5148_v40 }
 0x500   : > { %4796 = vmatpush1.bf16.msra.mxu0 %v4795_v22 }
 0x501   : > { %4797 = vmatprep.subr.bf16.mxu0 %v5148_v40 }
 0x502   : > { %4763 = vmatpush1.bf16.msra.mxu1 %v4762_v49 }
 0x503   : > { %4764 = vmatprep.subr.bf16.mxu1 %v5148_v40 }
 0x504   : > { %4799 = vmatpush1.bf16.msra.mxu0 %v4798_v42 }
 0x505   : > { %4800 = vmatprep.subr.bf16.mxu0 %v5148_v40 }
 0x506   : > { %4766 = vmatpush1.bf16.msra.mxu1 %v4765_v56 }
 0x507   : > { %4767 = vmatprep.subr.bf16.mxu1 %v5148_v40 }
 0x508   : > { %4802 = vmatpush1.bf16.msra.mxu0 %v4801_v51 }
 0x509   : > { %4803 = vmatprep.subr.bf16.mxu0 %v5148_v40 }
 0x50a   : > { %4769 = vmatpush1.bf16.msra.mxu1 %v4768_v8 }
 0x50b   : > { %4770 = vmatprep.subr.bf16.mxu1 %v5148_v40 }
 0x50c   : > { %4805 = vmatpush1.bf16.msra.mxu0 %v4804_v3  ;;  %v3682_v3 = vld [vmem:[%s7749_s9 + $0x10] sm:$0xff] }
 0x50d   : > { %4806 = vmatprep.subr.bf16.mxu0 %v5148_v40  ;;  %v4837_v14 = vpack.c.bf16 %v3683_v21, %v3682_v3 }
 0x50e   : > { %4772 = vmatpush1.bf16.msra.mxu1 %v4771_v17  ;;  %v3684_v17 = vld [vmem:[%s7749_s9 + $0x20] sm:$0xff] }
 0x50f   : > { %4773 = vmatprep.subr.bf16.mxu1 %v5148_v40  ;;  %v4840_v19 = vpack.c.bf16 %v3685_v50, %v3684_v17 }
 0x510   : > { %4808 = vmatpush1.bf16.msra.mxu0 %v4807_v18  ;;  %v3687_v18 = vld [vmem:[%s7749_s9 + $0x38] sm:$0xff] }
 0x511   : > { %4809 = vmatprep.subr.bf16.mxu0 %v5148_v40  ;;  %v4843_v62 = vpack.c.bf16 %v3687_v18, %v3686_v0 }
 0x512   : > { %4775 = vmatpush1.bf16.msra.mxu1 %v4774_v29  ;;  %v3689_v29 = vld [vmem:[%s7749_s9 + $0x48] sm:$0xff] }
 0x513   : > { %4812 = vmatprep.subr.bf16.mxu1 %v5148_v40  ;;  %v4846_v36 = vpack.c.bf16 %v3689_v29, %v3688_v27 }
 0x514   : > { %4811 = vmatpush1.bf16.msra.mxu0 %v4810_v10 }
 0x515   : > { %3469 = vmatmul.mubr.f32.vlgmr.msra.gmra.mrb[106].mxu1 %v2978_v25 }
 0x516   : > { %4814 = vmatpush3.bf16.msra.mxu1 %v4813_v35  ;;  %4358 = vmatprep.mubr.msk.f32.mxu1 %vm5150_vm8, %v7822_v4 }
 0x517   : > { %3568 = vmatmul.mubr.f32.vlgmr.msra.gmra.mrb[64].mxu0 %v2980_v24  ;;  %4815 = vmatprep.subr.bf16.mxu1 %v5148_v40 }
 0x51a   : > { %4817 = vmatpush3.bf16.msra.mxu1 %v4816_v52 }
 0x51b   : > { %4818 = vmatprep.subr.bf16.mxu1 %v5148_v40 }
 0x51e   : > { %4820 = vmatpush3.bf16.msra.mxu1 %v4819_v13 }
 0x51f   : > { %4821 = vmatprep.subr.bf16.mxu1 %v5148_v40 }
 0x522   : > { %4823 = vmatpush3.bf16.msra.mxu1 %v4822_v43 }
 0x523   : > { %4824 = vmatprep.subr.bf16.mxu1 %v5148_v40 }
 0x526   : > { %4826 = vmatpush3.bf16.msra.mxu1 %v4825_v6 }
 0x527   : > { %4827 = vmatprep.subr.bf16.mxu1 %v5148_v40 }
 0x52a   : > { %4829 = vmatpush3.bf16.msra.mxu1 %v4828_v55 }
 0x52b   : > { %4830 = vmatprep.subr.bf16.mxu1 %v5148_v40 }
 0x52e   : > { %4832 = vmatpush3.bf16.msra.mxu1 %v4831_v60 }
 0x52f   : > { %4356 = vmatprep.subr.mxu1 %v7822_v4 }
 0x532   : > { %4357 = vmatpush3.msra.mxu1 %v3597_v28 }
 0x533   : > { %4833 = vmatprep.subr.bf16.mxu1 %v5148_v40 }
 0x588   : > { %v3101_v34 = vpop.f32.mrb[102].mxu1 }
 0x589   : > { %v3103_v46 = vpop.f32.mrb[103].mxu1 }
 0x58a   : > { %v3174_v37 = vpop.f32.mrb[60].mxu0 }
 0x58b   : > { %v3175_v23 = vadd.f32 %v3174_v37, %v3101_v34  ;;  %v3176_v41 = vpop.f32.mrb[61].mxu0 }
 0x5b8   : > { %v3272_v22 = vpop.f32.mrb[104].mxu1 }
 0x5b9   : > { %v3276_v12 = vadd.f32 %v3272_v22, %v3175_v23  ;;  %v3274_v9 = vpop.f32.mrb[105].mxu1 }
 0x5ba   : > { %v3371_v49 = vpop.f32.mrb[62].mxu0 }
 0x5bb   : > { %v3375_v63 = vadd.f32 %v3371_v49, %v3276_v12  ;;  %v3373_v57 = vpop.f32.mrb[63].mxu0 }
 0x5e8   : > { %v3470_v42 = vpop.f32.mrb[106].mxu1 }
 0x5e9   : > { %v3474_v39 = vadd.f32 %v3470_v42, %v3375_v63  ;;  %v3472_v59 = vpop.f32.mrb[107].mxu1 }
 0x5ea   : > { %v3569_v56 = vpop.f32.mrb[64].mxu0 }
 0x5eb   : > { %v3573_v53 = vadd.f32 %v3569_v56, %v3474_v39  ;;  %v3571_v51 = vpop.f32.mrb[65].mxu0 }
 0x5ed   : > { %v3581_v8 = vadd.f32 %v4290_v16, %v3573_v53 }
 0x5ef   : > { %v3582_v5 = vmax.f32 %v3581_v8, 0.0 }
 0x5f1   : > { %4359 = vmatmul.mubr.msk.f32.vlgmr.msra.gmra.mrb[108].mxu1 %vm3605_vm9, %v3582_v5 }
 0x5f2   : > { %4835 = vmatpush3.bf16.msra.mxu1 %v4834_v15  ;;  %4383 = vmatprep.mubr.msk.f32.mxu1 %vm5150_vm8, %v7822_v4 }
 0x5f3   : > { %4836 = vmatprep.subr.bf16.mxu1 %v5148_v40 }
 0x5f6   : > { %4838 = vmatpush3.bf16.msra.mxu1 %v4837_v14 }
 0x5f7   : > { %4839 = vmatprep.subr.bf16.mxu1 %v5148_v40 }
 0x5fa   : > { %4841 = vmatpush3.bf16.msra.mxu1 %v4840_v19 }
 0x5fb   : > { %4842 = vmatprep.subr.bf16.mxu1 %v5148_v40 }
 0x5fe   : > { %4844 = vmatpush3.bf16.msra.mxu1 %v4843_v62 }
 0x5ff   : > { %4845 = vmatprep.subr.bf16.mxu1 %v5148_v40  ;;  %v4291_v40 = vld [vmem:[%s7748_s8] ss:$0 sm:$0xff] }
 0x602   : > { %4847 = vmatpush3.bf16.msra.mxu1 %v4846_v36 }
 0x603   : > { %4381 = vmatprep.subr.mxu1 %v7822_v4 }
 0x606   : > { %4382 = vmatpush3.msk.msra.mxu1 %vm3702_vm10, %v3690_v47 }
 0x6c4   : > { %v3675_v10 = vpop.f32.mrb[108].mxu1 }
 0x6c5   : > { %v3676_v7 = vadd.f32 %v4291_v40, %v3675_v10  ;;  %v4360_v25 = vpop.f32.mrb[109].mxu1 }
 0x6c7   : > { %v3679_v24 = vmax.f32 %v3676_v7, 0.0 }
 0x6c9   : > { %4384 = vmatmul.mubr.msk.f32.vlgmr.msra.gmra.mrb[110].mxu1 %vm3698_vm11, %v3679_v24 }
 0x79c   : > { %v3772_v20 = vpop.f32.mrb[110].mxu1 }
 0x79d   : > { %v3773_v45 = vadd.f32 %v4293_v48, %v3772_v20  ;;  %v4385_v35 = vpop.f32.mrb[111].mxu1 }
 0x79f   : > { %3776 = vst [vmem:[%s380_s13] sm:$0xff] %v3773_v45 }
 0x7a0   : > { %5094 = shalt.err (!%p5091_p3)
}
 0x7a1   : > { %s5095_s25 = scalar_lea.hbm %s7698_s15, 128  ;;  %s5099_s13 = scalar_lea.hbm %s7751_s11, 256 }
 0x7a2   : > { %p5096_p4 = scmp.ne.s32.totalorder %s7698_s15, %s5095_s25  ;;  %p5100_p9 = scmp.lt.u32.totalorder %s7698_s15, %s7751_s11 }
 0x7a3   : > { %p5101_p10 = scmp.lt.u32.totalorder %s5099_s13, %s5095_s25  ;;  %p5103_p12 = scmp.lt.u32.totalorder %s5095_s25, %s7698_s15 }
 0x7a4   : > { %p5097_p7 = pnand %p5096_p4, %p5250_p5 }
 0x7a5   : > { %p5102_p11 = por %p5101_p10, %p5100_p9 }
 0x7a6   : > { %p5098_p8 = pneg %p5097_p7 }
 0x7a7   : > { %p5104_p13 = por %p5103_p12, %p5102_p11 }
 0x7a9   : > { %p5105_p0 = pnand %p5104_p13, %p5098_p8 }
 0x7ab   : > { %5108 = shalt.err (!%p5105_p0)
}
 0x7ac   : > { %5016 = dma.vmem_to_hbm [thread:$0]  (%p5250_p5), %s7700_s12, 128, %s7698_s15, %s3778_s22  }
 0x7ad PF: > { %p5022_p1 = scmp.ge.s32.totalorder %s5143_s20, 2  ;;  %s3803_s24 = sand.u32 1, %s5131_s17  }
 0x7ae   : > { %s3804_s21 = scalar_lea.sflag [#allocation3], %s3803_s24 }
 0x7af   : > { %p5019_p2 = pnand %p5022_p1, %p5254_p6 }
 0x7b1   : > { %5126 = dma.done.wait (!%p5019_p2), %s3804_s21, 128  }
 0x7b2   : > { %5128 = vsyncadd (!%p5019_p2), %s3804_s21, 4294967168  ;;  %s7823_s29 = sld [smem:[#allocation5_spill]]  ;;  %s7824_s19 = sld [smem:[#allocation6_spill]] }
 0x7b3   : > { %p21_p3 = scmp.ge.s32.totalorder %s5237_s23, 4   ;;  %s7825_s17 = smov %s5135_s18 }
 0x7b4   : > { %s7827_s20 = smov %s5237_s23 }
 0x7b5   :  { %23 = sbr.rel (!%p21_p3) target bundleno = 3 (0x3), region = 108 }
 0x7b8   : > { %s7826_s18 = smov %s7823_s29 }
 0x7bc   :  { %3809 = vsyncpa [#allocation3], 1 }
 0x7bd   :  { %3811 = vsyncpa [#allocation3 + $0x1], 1 }

</bundles_post_ra>
